<compile_context>
chip_gen: v6e
topology: v6e:2x2x1
jax: 0.10.0
libtpu: 0.0.40
codegen_flags: <defaults>
</compile_context>

<pallas_src>
import functools

import numpy as np
import jax
import jax.numpy as jnp
from jax.experimental import pallas as pl
from jax.experimental.pallas import tpu as pltpu

LEAKY = 0.2
K3 = 3
TAPS = K3 * K3 * K3  # 27


# ----------------------------- Pallas kernel -------------------------------- #

def _rownorm(x):
    """Per-row min/max normalize of a (C, M) f32 tile."""
    mn = jnp.min(x, axis=1, keepdims=True)
    mx = jnp.max(x, axis=1, keepdims=True)
    return (x - mn) * pl.reciprocal(mx - mn, approx=True)


def _masked_rownorm(x, m):
    """Per-row min/max normalize over the positions where m > 0 (m: (1, M))."""
    big = jnp.float32(1e30)
    mn = jnp.min(jnp.where(m > 0, x, big), axis=1, keepdims=True)
    mx = jnp.max(jnp.where(m > 0, x, -big), axis=1, keepdims=True)
    return (x - mn) * pl.reciprocal(mx - mn, approx=True)


def _pyd_loss_kernel(p_ref, w1_ref, t1_ref, wcat_ref, tmask_ref, cmask_ref,
                     inter_ref, o_ref, fpad_ref, gcat_ref, *,
                     normal, offsets, pad_lanes, c_out, c_int):
    m1 = p_ref.shape[1]
    c2 = 2 * c_out

    # ---- level 1: both branches in ONE block-diagonal bf16 matmul ----------
    feat = jnp.dot(w1_ref[...], p_ref[...], preferred_element_type=jnp.float32)
    feat = jnp.maximum(feat, LEAKY * feat)                      # (2*Cout, M1)

    if normal:
        diff1 = _rownorm(feat) - _rownorm(t1_ref[...])
    else:
        diff1 = feat - t1_ref[...]
    d1sq = diff1 * diff1
    o_ref[0] = jnp.sum(d1sq[:c_out, :])                         # enc level-1 SSQ
    o_ref[1] = jnp.sum(d1sq[c_out:, :])                         # dec level-1 SSQ

    # ---- level 2: shift-based conv on the level-1 grid, entirely in VMEM ----
    # feat is parked in a zero-padded scratch; each of the 27 taps is a static
    # lane-shifted slice x boundary mask, written into a (27*2*Cout, M1) bf16
    # scratch; the whole conv is then ONE K=864 matmul (no S, no acc chain).
    fpad_ref[...] = jnp.zeros_like(fpad_ref)
    fpad_ref[:, pad_lanes:pad_lanes + m1] = feat
    fp = fpad_ref[...]                                          # (2*Cout, M1 + 2*pad)
    tmask = tmask_ref[...]                                      # (27, M1)

    for tap in range(TAPS):                                     # static offsets
        s = pad_lanes + offsets[tap]
        g = fp[:, s:s + m1] * tmask[tap:tap + 1, :]
        gcat_ref[tap * c2:(tap + 1) * c2, :] = g.astype(gcat_ref.dtype)

    acc2 = jnp.dot(wcat_ref[...], gcat_ref[...],
                   preferred_element_type=jnp.float32)          # (2*Cint, M1)
    feat2 = jnp.maximum(acc2, LEAKY * acc2)

    cm = cmask_ref[...]                                         # (1, M1)
    inter = inter_ref[...]                                      # (Cint, M1)
    if normal:
        a2 = _masked_rownorm(feat2, cm)
        b2 = _masked_rownorm(inter, cm)
    else:
        a2, b2 = feat2, inter
    d_enc = (a2[:c_int, :] - b2) * cm
    d_dec = (a2[c_int:, :] - b2) * cm
    o_ref[2] = jnp.sum(d_enc * d_enc)                           # enc-inter SSQ
    o_ref[3] = jnp.sum(d_dec * d_dec)                           # dec-inter SSQ


# ------------------------------ JAX glue ------------------------------------ #

def _im2col_T_channel_major(x, k=3, stride=2, pad=1):
    """x: (B, C, D, H, W) -> (C*k^3, B*oD*oH*oW); K ordered (C slowest, kd, kh, kw)."""
    B, C, D, H, W = x.shape
    oD = (D + 2 * pad - k) // stride + 1
    oH = (H + 2 * pad - k) // stride + 1
    oW = (W + 2 * pad - k) // stride + 1
    xc = jnp.transpose(x, (1, 0, 2, 3, 4))
    xp = jnp.pad(xc, ((0, 0), (0, 0), (pad, pad), (pad, pad), (pad, pad)))
    cols = []
    for kd in range(k):
        for kh in range(k):
            for kw in range(k):
                cols.append(xp[:, :,
                               kd:kd + stride * oD:stride,
                               kh:kh + stride * oH:stride,
                               kw:kw + stride * oW:stride])
    cols = jnp.stack(cols, axis=1)                               # (C, 27, B, oD, oH, oW)
    return cols.reshape(C * k * k * k, B * oD * oH * oW), (oD, oH, oW)


def _channel_major(x):
    """(B, C, D, H, W) -> (C, B*D*H*W)."""
    C = x.shape[1]
    return jnp.transpose(x, (1, 0, 2, 3, 4)).reshape(C, -1)


def _build_level2_masks(B, d1, h1, w1):
    """Per-tap boundary masks (27, M1), the stride-2 'centre' mask (1, M1) and
    the static lane offsets for a stride-2 / pad-1 / 3x3x3 conv on the flattened
    level-1 output grid (b, z, y, x)."""
    M1 = B * d1 * h1 * w1
    tap_masks = np.zeros((TAPS, M1), np.float32)
    offsets = []
    for kd in range(K3):
        for kh in range(K3):
            for kw in range(K3):
                tap = (kd * K3 + kh) * K3 + kw
                dz, dy, dx = kd - 1, kh - 1, kw - 1
                offsets.append(dz * (h1 * w1) + dy * w1 + dx)
                for b in range(B):
                    for z in range(d1):
                        for y in range(h1):
                            for x in range(w1):
                                if (0 <= z + dz < d1 and 0 <= y + dy < h1
                                        and 0 <= x + dx < w1):
                                    m = ((b * d1 + z) * h1 + y) * w1 + x
                                    tap_masks[tap, m] = 1.0
    centre = np.zeros((1, M1), np.float32)
    for b in range(B):
        for z in range(0, d1, 2):
            for y in range(0, h1, 2):
                for x in range(0, w1, 2):
                    centre[0, ((b * d1 + z) * h1 + y) * w1 + x] = 1.0
    return jnp.asarray(tap_masks), jnp.asarray(centre), tuple(offsets)


def _scatter_to_level1_grid(x_cm5, d1, h1, w1):
    """(C, B, d2, h2, w2) -> (C, B*d1*h1*w1), values placed at even (z, y, x)."""
    C, B = x_cm5.shape[:2]
    out = jnp.zeros((C, B, d1, h1, w1), x_cm5.dtype)
    out = out.at[:, :, ::2, ::2, ::2].set(x_cm5)
    return out.reshape(C, B * d1 * h1 * w1)


def pyd_loss(params, enc_feature_pair, inter_feature, dec_feature_pair,
             normal=True):
    pre_enc, cur_enc = enc_feature_pair
    cur_dec, pre_dec = dec_feature_pair

    B, Cin = pre_enc.shape[:2]
    Cout = params["enc_w"].shape[0]
    Cint = params["enc_inter_w"].shape[0]

    # Level-1 im2col (XLA glue), transposed channel-major (K1, M1).
    # TODO(synk): move level-1 im2col in-kernel (strided loads of the padded raw
    # input) to remove the 27x patch materialisation in HBM at production sizes.
    p_enc, (d1, h1, w1) = _im2col_T_channel_major(pre_enc)
    p_dec, _ = _im2col_T_channel_major(pre_dec)
    K1 = Cin * TAPS
    M1 = B * d1 * h1 * w1
    patches = jnp.concatenate([p_enc, p_dec], axis=0).astype(jnp.bfloat16)  # (2*K1, M1)

    # Block-diagonal level-1 weight (2*Cout, 2*K1), bf16.
    w_enc = params["enc_w"].reshape(Cout, K1)
    w_dec = params["dec_w"].reshape(Cout, K1)
    zero1 = jnp.zeros((Cout, K1), w_enc.dtype)
    w1bd = jnp.concatenate(
        [jnp.concatenate([w_enc, zero1], axis=1),
         jnp.concatenate([zero1, w_dec], axis=1)], axis=0).astype(jnp.bfloat16)

    # Level-1 targets, rows stacked [enc; dec], f32 (elementwise only).
    t1 = jnp.concatenate([_channel_major(cur_enc),
                          _channel_major(cur_dec)], axis=0).astype(jnp.float32)

    # Fused block-diagonal level-2 weight (2*Cint, 27*2*Cout), bf16.
    def taps_first(w):  # (Cint, Cout, 3,3,3) -> (27, Cint, Cout)
        return jnp.transpose(w.reshape(w.shape[0], w.shape[1], TAPS), (2, 0, 1))
    w2e = taps_first(params["enc_inter_w"])
    w2d = taps_first(params["dec_inter_w"])
    zero2 = jnp.zeros((TAPS, Cint, Cout), w2e.dtype)
    wcat = jnp.concatenate(
        [jnp.concatenate([w2e, zero2], axis=2),
         jnp.concatenate([zero2, w2d], axis=2)], axis=1)         # (27, 2*Cint, 2*Cout)
    wcat = jnp.transpose(wcat, (1, 0, 2)).reshape(2 * Cint, TAPS * 2 * Cout)
    wcat = wcat.astype(jnp.bfloat16)

    tap_masks, centre_mask, offsets = _build_level2_masks(B, d1, h1, w1)

    inter_cm5 = jnp.transpose(inter_feature, (1, 0, 2, 3, 4))    # (Cint, B, d2,h2,w2)
    inter_sc = _scatter_to_level1_grid(inter_cm5, d1, h1, w1).astype(jnp.float32)

    # Lane padding for the shifted slices (kept 128-aligned so the feat store is
    # an aligned store; only the 27 reads are lane-rotated).
    max_off = h1 * w1 + w1 + 1
    pad_lanes = ((max_off + 127) // 128) * 128
    c2 = 2 * Cout

    kern = functools.partial(_pyd_loss_kernel, normal=normal, offsets=offsets,
                             pad_lanes=pad_lanes, c_out=Cout, c_int=Cint)

    # Explicit VMEM budget (review: v7x 64 MiB physical, small default scoped limits).
    block_bytes = (patches.size * 2 + w1bd.size * 2 + t1.size * 4 + wcat.size * 2
                   + tap_masks.size * 4 + centre_mask.size * 4 + inter_sc.size * 4)
    scratch_bytes = c2 * (M1 + 2 * pad_lanes) * 4 + TAPS * c2 * M1 * 2
    vmem_limit = int(min(64 << 20, max(2 * block_bytes + scratch_bytes + (2 << 20),
                                       16 << 20)))

    ssq = pl.pallas_call(
        kern,
        out_shape=jax.ShapeDtypeStruct((4,), jnp.float32),
        in_specs=[pl.BlockSpec(memory_space=pltpu.VMEM)] * 7,
        out_specs=pl.BlockSpec(memory_space=pltpu.SMEM),
        scratch_shapes=[
            pltpu.VMEM((c2, M1 + 2 * pad_lanes), jnp.float32),   # padded level-1 feature
            pltpu.VMEM((TAPS * c2, M1), jnp.bfloat16),           # fused level-2 operand
        ],
        compiler_params=pltpu.CompilerParams(vmem_limit_bytes=vmem_limit),
    )(patches, w1bd, t1, wcat, tap_masks, centre_mask, inter_sc)

    # Tiny XLA tail: sqrt of the 4 SSQs, then average.
    return jnp.sum(jnp.sqrt(ssq)) / 4.0


# ------------------------- pure-JAX reference -------------------------------- #

def _conv3d_leaky_ref(x, w):
    out = jax.lax.conv_general_dilated(
        x, w, window_strides=(2, 2, 2),
        padding=((1, 1), (1, 1), (1, 1)),
        dimension_numbers=("NCDHW", "OIDHW", "NCDHW"),
        precision=jax.lax.Precision.HIGHEST)
    return jnp.where(out >= 0, out, LEAKY * out)


def _normalize_ref(x):
    mn = jnp.min(x, axis=(0, 2, 3, 4), keepdims=True)
    mx = jnp.max(x, axis=(0, 2, 3, 4), keepdims=True)
    return (x - mn) / (mx - mn)


def pyd_loss_ref(params, enc_pair, inter, dec_pair):
    pre_enc, cur_enc = enc_pair
    pre_enc = _conv3d_leaky_ref(pre_enc, params["enc_w"])
    enc_loss = jnp.sqrt(jnp.sum((_normalize_ref(pre_enc) - _normalize_ref(cur_enc)) ** 2))
    cur_dec, pre_dec = dec_pair
    pre_dec = _conv3d_leaky_ref(pre_dec, params["dec_w"])
    dec_loss = jnp.sqrt(jnp.sum((_normalize_ref(pre_dec) - _normalize_ref(cur_dec)) ** 2))
    pre_enc2 = _conv3d_leaky_ref(pre_enc, params["enc_inter_w"])
    enc_inter_loss = jnp.sqrt(jnp.sum((_normalize_ref(pre_enc2) - _normalize_ref(inter)) ** 2))
    pre_dec2 = _conv3d_leaky_ref(pre_dec, params["dec_inter_w"])
    dec_inter_loss = jnp.sqrt(jnp.sum((_normalize_ref(pre_dec2) - _normalize_ref(inter)) ** 2))
    return (enc_loss + dec_loss + enc_inter_loss + dec_inter_loss) / 4


# --------------------------------- main -------------------------------------- #

if __name__ == "__main__":
    key = jax.random.PRNGKey(0)
    ks = jax.random.split(key, 9)

    # pre_level=1, cur_level=2  ->  (in, out, inter) channels = (8, 16, 32)
    B, D, H, W = 2, 8, 8, 8
    Cin, Cout, Cint = 8, 16, 32

    pre_enc = jax.random.normal(ks[0], (B, Cin, D, H, W), jnp.float32)
    cur_enc = jax.random.normal(ks[1], (B, Cout, D // 2, H // 2, W // 2), jnp.float32)
    pre_dec = jax.random.normal(ks[2], (B, Cin, D, H, W), jnp.float32)
    cur_dec = jax.random.normal(ks[3], (B, Cout, D // 2, H // 2, W // 2), jnp.float32)
    inter   = jax.random.normal(ks[4], (B, Cint, D // 4, H // 4, W // 4), jnp.float32)

    # Conv3d weight layout: (C_out, C_in, 3, 3, 3), bias=False.
    scale = 0.05
    params = {
        "enc_w":       scale * jax.random.normal(ks[5], (Cout, Cin, 3, 3, 3), jnp.float32),
        "dec_w":       scale * jax.random.normal(ks[6], (Cout, Cin, 3, 3, 3), jnp.float32),
        "enc_inter_w": scale * jax.random.normal(ks[7], (Cint, Cout, 3, 3, 3), jnp.float32),
        "dec_inter_w": scale * jax.random.normal(ks[8], (Cint, Cout, 3, 3, 3), jnp.float32),
    }

    loss_fn = jax.jit(functools.partial(pyd_loss, normal=True))
    loss = loss_fn(params, (pre_enc, cur_enc), inter, (cur_dec, pre_dec))
    loss = jax.block_until_ready(loss)

    ref = jax.block_until_ready(
        pyd_loss_ref(params, (pre_enc, cur_enc), inter, (cur_dec, pre_dec)))

    rel_err = abs(float(loss) - float(ref)) / max(abs(float(ref)), 1e-6)
    assert rel_err < 5e-2, f"mismatch: pallas={float(loss)} ref={float(ref)} rel={rel_err}"

    print("KERNEL_OK")
</pallas_src>

<mosaic_0001>
module attributes {stable_mosaic.version = 11 : i64} {
  func.func @_pyd_loss_kernel(%arg0: memref<432x128xbf16, #tpu.memory_space<vmem>>, %arg1: memref<32x432xbf16, #tpu.memory_space<vmem>>, %arg2: memref<32x128xf32, #tpu.memory_space<vmem>>, %arg3: memref<64x864xbf16, #tpu.memory_space<vmem>>, %arg4: memref<27x128xf32, #tpu.memory_space<vmem>>, %arg5: memref<1x128xf32, #tpu.memory_space<vmem>>, %arg6: memref<32x128xf32, #tpu.memory_space<vmem>>, %arg7: memref<4xf32, #tpu.memory_space<smem>>, %arg8: memref<32x384xf32, #tpu.memory_space<vmem>>, %arg9: memref<864x128xbf16, #tpu.memory_space<vmem>>) attributes {dimension_semantics = [], scalar_prefetch = 0 : i64, scratch_operands = 2 : i64, tpu.core_type = #tpu.core_type<tc>} {
    %c0 = arith.constant 0 : index
    %c0_0 = arith.constant 0 : index
    %0 = vector.load %arg1[%c0, %c0_0] : memref<32x432xbf16, #tpu.memory_space<vmem>>, vector<32x432xbf16>
    %c0_1 = arith.constant 0 : index
    %c0_2 = arith.constant 0 : index
    %1 = vector.load %arg0[%c0_1, %c0_2] : memref<432x128xbf16, #tpu.memory_space<vmem>>, vector<432x128xbf16>
    %cst = arith.constant dense<0.000000e+00> : vector<32x128xf32>
    %2 = tpu.matmul %0, %1, %cst {dimension_numbers = #tpu.dot_dimension_numbers<[1], [0], [0], [1], [0, 0, 1, 1], [], []>} : vector<32x432xbf16>, vector<432x128xbf16>, vector<32x128xf32> -> vector<32x128xf32>
    %cst_3 = arith.constant 2.000000e-01 : f32
    %3 = vector.broadcast %cst_3 : f32 to vector<32x128xf32>
    %4 = arith.mulf %3, %2 : vector<32x128xf32>
    %5 = arith.maximumf %2, %4 : vector<32x128xf32>
    %cst_4 = arith.constant dense<0x7F800000> : vector<32xf32>
    %6 = vector.multi_reduction <minimumf>, %5, %cst_4 [1] : vector<32x128xf32> to vector<32xf32>
    %7 = vector.shape_cast %6 : vector<32xf32> to vector<32x1xf32>
    %cst_5 = arith.constant dense<0xFF800000> : vector<32xf32>
    %8 = vector.multi_reduction <maximumf>, %5, %cst_5 [1] : vector<32x128xf32> to vector<32xf32>
    %9 = vector.shape_cast %8 : vector<32xf32> to vector<32x1xf32>
    %10 = vector.broadcast %7 : vector<32x1xf32> to vector<32x128xf32>
    %11 = arith.subf %5, %10 : vector<32x128xf32>
    %12 = arith.subf %9, %7 : vector<32x1xf32>
    %13 = tpu.reciprocal %12 {approx = true} : vector<32x1xf32> -> vector<32x1xf32>
    %14 = vector.broadcast %13 : vector<32x1xf32> to vector<32x128xf32>
    %15 = arith.mulf %11, %14 : vector<32x128xf32>
    %c0_6 = arith.constant 0 : index
    %c0_7 = arith.constant 0 : index
    %16 = vector.load %arg2[%c0_6, %c0_7] : memref<32x128xf32, #tpu.memory_space<vmem>>, vector<32x128xf32>
    %cst_8 = arith.constant dense<0x7F800000> : vector<32xf32>
    %17 = vector.multi_reduction <minimumf>, %16, %cst_8 [1] : vector<32x128xf32> to vector<32xf32>
    %18 = vector.shape_cast %17 : vector<32xf32> to vector<32x1xf32>
    %cst_9 = arith.constant dense<0xFF800000> : vector<32xf32>
    %19 = vector.multi_reduction <maximumf>, %16, %cst_9 [1] : vector<32x128xf32> to vector<32xf32>
    %20 = vector.shape_cast %19 : vector<32xf32> to vector<32x1xf32>
    %21 = vector.broadcast %18 : vector<32x1xf32> to vector<32x128xf32>
    %22 = arith.subf %16, %21 : vector<32x128xf32>
    %23 = arith.subf %20, %18 : vector<32x1xf32>
    %24 = tpu.reciprocal %23 {approx = true} : vector<32x1xf32> -> vector<32x1xf32>
    %25 = vector.broadcast %24 : vector<32x1xf32> to vector<32x128xf32>
    %26 = arith.mulf %22, %25 : vector<32x128xf32>
    %27 = arith.subf %15, %26 : vector<32x128xf32>
    %28 = arith.mulf %27, %27 : vector<32x128xf32>
    %29 = vector.extract_strided_slice %28 {offsets = [0, 0], sizes = [16, 128], strides = [1, 1]} : vector<32x128xf32> to vector<16x128xf32>
    %30 = vector.shape_cast %29 : vector<16x128xf32> to vector<1x16x128xf32>
    %cst_10 = arith.constant dense<0.000000e+00> : vector<1xf32>
    %31 = vector.multi_reduction <add>, %30, %cst_10 [1, 2] : vector<1x16x128xf32> to vector<1xf32>
    %32 = vector.shape_cast %31 : vector<1xf32> to vector<1x1x1xf32>
    %33 = vector.extract %32[0, 0, 0] : f32 from vector<1x1x1xf32>
    %c0_11 = arith.constant 0 : index
    %34 = memref.load %arg7[%c0_11] : memref<4xf32, #tpu.memory_space<smem>>
    memref.store %33, %arg7[%c0_11] : memref<4xf32, #tpu.memory_space<smem>>
    %35 = vector.extract_strided_slice %28 {offsets = [16, 0], sizes = [16, 128], strides = [1, 1]} : vector<32x128xf32> to vector<16x128xf32>
    %36 = vector.shape_cast %35 : vector<16x128xf32> to vector<1x16x128xf32>
    %cst_12 = arith.constant dense<0.000000e+00> : vector<1xf32>
    %37 = vector.multi_reduction <add>, %36, %cst_12 [1, 2] : vector<1x16x128xf32> to vector<1xf32>
    %38 = vector.shape_cast %37 : vector<1xf32> to vector<1x1x1xf32>
    %39 = vector.extract %38[0, 0, 0] : f32 from vector<1x1x1xf32>
    %c1 = arith.constant 1 : index
    %40 = memref.load %arg7[%c1] : memref<4xf32, #tpu.memory_space<smem>>
    memref.store %39, %arg7[%c1] : memref<4xf32, #tpu.memory_space<smem>>
    %cst_13 = arith.constant 0.000000e+00 : f32
    %41 = vector.broadcast %cst_13 : f32 to vector<32x384xf32>
    %c0_14 = arith.constant 0 : index
    %c0_15 = arith.constant 0 : index
    %42 = vector.load %arg8[%c0_14, %c0_15] : memref<32x384xf32, #tpu.memory_space<vmem>>, vector<32x384xf32>
    tpu.vector_store %arg8[%c0_14, %c0_15], %41 {strides = array<i32>} : memref<32x384xf32, #tpu.memory_space<vmem>>, vector<32x384xf32>,
    %c0_16 = arith.constant 0 : index
    %c128 = arith.constant 128 : index
    %43 = vector.load %arg8[%c0_16, %c128] : memref<32x384xf32, #tpu.memory_space<vmem>>, vector<32x128xf32>
    tpu.vector_store %arg8[%c0_16, %c128], %5 {strides = array<i32>} : memref<32x384xf32, #tpu.memory_space<vmem>>, vector<32x128xf32>,
    %c0_17 = arith.constant 0 : index
    %c0_18 = arith.constant 0 : index
    %44 = vector.load %arg8[%c0_17, %c0_18] : memref<32x384xf32, #tpu.memory_space<vmem>>, vector<32x384xf32>
    %c0_19 = arith.constant 0 : index
    %c0_20 = arith.constant 0 : index
    %45 = vector.load %arg4[%c0_19, %c0_20] : memref<27x128xf32, #tpu.memory_space<vmem>>, vector<27x128xf32>
    %46 = vector.extract_strided_slice %44 {offsets = [0, 107], sizes = [32, 128], strides = [1, 1]} : vector<32x384xf32> to vector<32x128xf32>
    %47 = vector.extract_strided_slice %45 {offsets = [0, 0], sizes = [1, 128], strides = [1, 1]} : vector<27x128xf32> to vector<1x128xf32>
    %48 = vector.broadcast %47 : vector<1x128xf32> to vector<32x128xf32>
    %49 = arith.mulf %46, %48 : vector<32x128xf32>
    %50 = arith.truncf %49 : vector<32x128xf32> to vector<32x128xbf16>
    %c0_21 = arith.constant 0 : index
    %c0_22 = arith.constant 0 : index
    %51 = vector.load %arg9[%c0_21, %c0_22] : memref<864x128xbf16, #tpu.memory_space<vmem>>, vector<32x128xbf16>
    tpu.vector_store %arg9[%c0_21, %c0_22], %50 {strides = array<i32>} : memref<864x128xbf16, #tpu.memory_space<vmem>>, vector<32x128xbf16>,
    %52 = vector.extract_strided_slice %44 {offsets = [0, 108], sizes = [32, 128], strides = [1, 1]} : vector<32x384xf32> to vector<32x128xf32>
    %53 = vector.extract_strided_slice %45 {offsets = [1, 0], sizes = [1, 128], strides = [1, 1]} : vector<27x128xf32> to vector<1x128xf32>
    %54 = vector.broadcast %53 : vector<1x128xf32> to vector<32x128xf32>
    %55 = arith.mulf %52, %54 : vector<32x128xf32>
    %56 = arith.truncf %55 : vector<32x128xf32> to vector<32x128xbf16>
    %c32 = arith.constant 32 : index
    %c0_23 = arith.constant 0 : index
    %57 = vector.load %arg9[%c32, %c0_23] : memref<864x128xbf16, #tpu.memory_space<vmem>>, vector<32x128xbf16>
    tpu.vector_store %arg9[%c32, %c0_23], %56 {strides = array<i32>} : memref<864x128xbf16, #tpu.memory_space<vmem>>, vector<32x128xbf16>,
    %58 = vector.extract_strided_slice %44 {offsets = [0, 109], sizes = [32, 128], strides = [1, 1]} : vector<32x384xf32> to vector<32x128xf32>
    %59 = vector.extract_strided_slice %45 {offsets = [2, 0], sizes = [1, 128], strides = [1, 1]} : vector<27x128xf32> to vector<1x128xf32>
    %60 = vector.broadcast %59 : vector<1x128xf32> to vector<32x128xf32>
    %61 = arith.mulf %58, %60 : vector<32x128xf32>
    %62 = arith.truncf %61 : vector<32x128xf32> to vector<32x128xbf16>
    %c64 = arith.constant 64 : index
    %c0_24 = arith.constant 0 : index
    %63 = vector.load %arg9[%c64, %c0_24] : memref<864x128xbf16, #tpu.memory_space<vmem>>, vector<32x128xbf16>
    tpu.vector_store %arg9[%c64, %c0_24], %62 {strides = array<i32>} : memref<864x128xbf16, #tpu.memory_space<vmem>>, vector<32x128xbf16>,
    %64 = vector.extract_strided_slice %44 {offsets = [0, 111], sizes = [32, 128], strides = [1, 1]} : vector<32x384xf32> to vector<32x128xf32>
    %65 = vector.extract_strided_slice %45 {offsets = [3, 0], sizes = [1, 128], strides = [1, 1]} : vector<27x128xf32> to vector<1x128xf32>
    %66 = vector.broadcast %65 : vector<1x128xf32> to vector<32x128xf32>
    %67 = arith.mulf %64, %66 : vector<32x128xf32>
    %68 = arith.truncf %67 : vector<32x128xf32> to vector<32x128xbf16>
    %c96 = arith.constant 96 : index
    %c0_25 = arith.constant 0 : index
    %69 = vector.load %arg9[%c96, %c0_25] : memref<864x128xbf16, #tpu.memory_space<vmem>>, vector<32x128xbf16>
    tpu.vector_store %arg9[%c96, %c0_25], %68 {strides = array<i32>} : memref<864x128xbf16, #tpu.memory_space<vmem>>, vector<32x128xbf16>,
    %70 = vector.extract_strided_slice %44 {offsets = [0, 112], sizes = [32, 128], strides = [1, 1]} : vector<32x384xf32> to vector<32x128xf32>
    %71 = vector.extract_strided_slice %45 {offsets = [4, 0], sizes = [1, 128], strides = [1, 1]} : vector<27x128xf32> to vector<1x128xf32>
    %72 = vector.broadcast %71 : vector<1x128xf32> to vector<32x128xf32>
    %73 = arith.mulf %70, %72 : vector<32x128xf32>
    %74 = arith.truncf %73 : vector<32x128xf32> to vector<32x128xbf16>
    %c128_26 = arith.constant 128 : index
    %c0_27 = arith.constant 0 : index
    %75 = vector.load %arg9[%c128_26, %c0_27] : memref<864x128xbf16, #tpu.memory_space<vmem>>, vector<32x128xbf16>
    tpu.vector_store %arg9[%c128_26, %c0_27], %74 {strides = array<i32>} : memref<864x128xbf16, #tpu.memory_space<vmem>>, vector<32x128xbf16>,
    %76 = vector.extract_strided_slice %44 {offsets = [0, 113], sizes = [32, 128], strides = [1, 1]} : vector<32x384xf32> to vector<32x128xf32>
    %77 = vector.extract_strided_slice %45 {offsets = [5, 0], sizes = [1, 128], strides = [1, 1]} : vector<27x128xf32> to vector<1x128xf32>
    %78 = vector.broadcast %77 : vector<1x128xf32> to vector<32x128xf32>
    %79 = arith.mulf %76, %78 : vector<32x128xf32>
    %80 = arith.truncf %79 : vector<32x128xf32> to vector<32x128xbf16>
    %c160 = arith.constant 160 : index
    %c0_28 = arith.constant 0 : index
    %81 = vector.load %arg9[%c160, %c0_28] : memref<864x128xbf16, #tpu.memory_space<vmem>>, vector<32x128xbf16>
    tpu.vector_store %arg9[%c160, %c0_28], %80 {strides = array<i32>} : memref<864x128xbf16, #tpu.memory_space<vmem>>, vector<32x128xbf16>,
    %82 = vector.extract_strided_slice %44 {offsets = [0, 115], sizes = [32, 128], strides = [1, 1]} : vector<32x384xf32> to vector<32x128xf32>
    %83 = vector.extract_strided_slice %45 {offsets = [6, 0], sizes = [1, 128], strides = [1, 1]} : vector<27x128xf32> to vector<1x128xf32>
    %84 = vector.broadcast %83 : vector<1x128xf32> to vector<32x128xf32>
    %85 = arith.mulf %82, %84 : vector<32x128xf32>
    %86 = arith.truncf %85 : vector<32x128xf32> to vector<32x128xbf16>
    %c192 = arith.constant 192 : index
    %c0_29 = arith.constant 0 : index
    %87 = vector.load %arg9[%c192, %c0_29] : memref<864x128xbf16, #tpu.memory_space<vmem>>, vector<32x128xbf16>
    tpu.vector_store %arg9[%c192, %c0_29], %86 {strides = array<i32>} : memref<864x128xbf16, #tpu.memory_space<vmem>>, vector<32x128xbf16>,
    %88 = vector.extract_strided_slice %44 {offsets = [0, 116], sizes = [32, 128], strides = [1, 1]} : vector<32x384xf32> to vector<32x128xf32>
    %89 = vector.extract_strided_slice %45 {offsets = [7, 0], sizes = [1, 128], strides = [1, 1]} : vector<27x128xf32> to vector<1x128xf32>
    %90 = vector.broadcast %89 : vector<1x128xf32> to vector<32x128xf32>
    %91 = arith.mulf %88, %90 : vector<32x128xf32>
    %92 = arith.truncf %91 : vector<32x128xf32> to vector<32x128xbf16>
    %c224 = arith.constant 224 : index
    %c0_30 = arith.constant 0 : index
    %93 = vector.load %arg9[%c224, %c0_30] : memref<864x128xbf16, #tpu.memory_space<vmem>>, vector<32x128xbf16>
    tpu.vector_store %arg9[%c224, %c0_30], %92 {strides = array<i32>} : memref<864x128xbf16, #tpu.memory_space<vmem>>, vector<32x128xbf16>,
    %94 = vector.extract_strided_slice %44 {offsets = [0, 117], sizes = [32, 128], strides = [1, 1]} : vector<32x384xf32> to vector<32x128xf32>
    %95 = vector.extract_strided_slice %45 {offsets = [8, 0], sizes = [1, 128], strides = [1, 1]} : vector<27x128xf32> to vector<1x128xf32>
    %96 = vector.broadcast %95 : vector<1x128xf32> to vector<32x128xf32>
    %97 = arith.mulf %94, %96 : vector<32x128xf32>
    %98 = arith.truncf %97 : vector<32x128xf32> to vector<32x128xbf16>
    %c256 = arith.constant 256 : index
    %c0_31 = arith.constant 0 : index
    %99 = vector.load %arg9[%c256, %c0_31] : memref<864x128xbf16, #tpu.memory_space<vmem>>, vector<32x128xbf16>
    tpu.vector_store %arg9[%c256, %c0_31], %98 {strides = array<i32>} : memref<864x128xbf16, #tpu.memory_space<vmem>>, vector<32x128xbf16>,
    %100 = vector.extract_strided_slice %44 {offsets = [0, 123], sizes = [32, 128], strides = [1, 1]} : vector<32x384xf32> to vector<32x128xf32>
    %101 = vector.extract_strided_slice %45 {offsets = [9, 0], sizes = [1, 128], strides = [1, 1]} : vector<27x128xf32> to vector<1x128xf32>
    %102 = vector.broadcast %101 : vector<1x128xf32> to vector<32x128xf32>
    %103 = arith.mulf %100, %102 : vector<32x128xf32>
    %104 = arith.truncf %103 : vector<32x128xf32> to vector<32x128xbf16>
    %c288 = arith.constant 288 : index
    %c0_32 = arith.constant 0 : index
    %105 = vector.load %arg9[%c288, %c0_32] : memref<864x128xbf16, #tpu.memory_space<vmem>>, vector<32x128xbf16>
    tpu.vector_store %arg9[%c288, %c0_32], %104 {strides = array<i32>} : memref<864x128xbf16, #tpu.memory_space<vmem>>, vector<32x128xbf16>,
    %106 = vector.extract_strided_slice %44 {offsets = [0, 124], sizes = [32, 128], strides = [1, 1]} : vector<32x384xf32> to vector<32x128xf32>
    %107 = vector.extract_strided_slice %45 {offsets = [10, 0], sizes = [1, 128], strides = [1, 1]} : vector<27x128xf32> to vector<1x128xf32>
    %108 = vector.broadcast %107 : vector<1x128xf32> to vector<32x128xf32>
    %109 = arith.mulf %106, %108 : vector<32x128xf32>
    %110 = arith.truncf %109 : vector<32x128xf32> to vector<32x128xbf16>
    %c320 = arith.constant 320 : index
    %c0_33 = arith.constant 0 : index
    %111 = vector.load %arg9[%c320, %c0_33] : memref<864x128xbf16, #tpu.memory_space<vmem>>, vector<32x128xbf16>
    tpu.vector_store %arg9[%c320, %c0_33], %110 {strides = array<i32>} : memref<864x128xbf16, #tpu.memory_space<vmem>>, vector<32x128xbf16>,
    %112 = vector.extract_strided_slice %44 {offsets = [0, 125], sizes = [32, 128], strides = [1, 1]} : vector<32x384xf32> to vector<32x128xf32>
    %113 = vector.extract_strided_slice %45 {offsets = [11, 0], sizes = [1, 128], strides = [1, 1]} : vector<27x128xf32> to vector<1x128xf32>
    %114 = vector.broadcast %113 : vector<1x128xf32> to vector<32x128xf32>
    %115 = arith.mulf %112, %114 : vector<32x128xf32>
    %116 = arith.truncf %115 : vector<32x128xf32> to vector<32x128xbf16>
    %c352 = arith.constant 352 : index
    %c0_34 = arith.constant 0 : index
    %117 = vector.load %arg9[%c352, %c0_34] : memref<864x128xbf16, #tpu.memory_space<vmem>>, vector<32x128xbf16>
    tpu.vector_store %arg9[%c352, %c0_34], %116 {strides = array<i32>} : memref<864x128xbf16, #tpu.memory_space<vmem>>, vector<32x128xbf16>,
    %118 = vector.extract_strided_slice %44 {offsets = [0, 127], sizes = [32, 128], strides = [1, 1]} : vector<32x384xf32> to vector<32x128xf32>
    %119 = vector.extract_strided_slice %45 {offsets = [12, 0], sizes = [1, 128], strides = [1, 1]} : vector<27x128xf32> to vector<1x128xf32>
    %120 = vector.broadcast %119 : vector<1x128xf32> to vector<32x128xf32>
    %121 = arith.mulf %118, %120 : vector<32x128xf32>
    %122 = arith.truncf %121 : vector<32x128xf32> to vector<32x128xbf16>
    %c384 = arith.constant 384 : index
    %c0_35 = arith.constant 0 : index
    %123 = vector.load %arg9[%c384, %c0_35] : memref<864x128xbf16, #tpu.memory_space<vmem>>, vector<32x128xbf16>
    tpu.vector_store %arg9[%c384, %c0_35], %122 {strides = array<i32>} : memref<864x128xbf16, #tpu.memory_space<vmem>>, vector<32x128xbf16>,
    %124 = vector.extract_strided_slice %44 {offsets = [0, 128], sizes = [32, 128], strides = [1, 1]} : vector<32x384xf32> to vector<32x128xf32>
    %125 = vector.extract_strided_slice %45 {offsets = [13, 0], sizes = [1, 128], strides = [1, 1]} : vector<27x128xf32> to vector<1x128xf32>
    %126 = vector.broadcast %125 : vector<1x128xf32> to vector<32x128xf32>
    %127 = arith.mulf %124, %126 : vector<32x128xf32>
    %128 = arith.truncf %127 : vector<32x128xf32> to vector<32x128xbf16>
    %c416 = arith.constant 416 : index
    %c0_36 = arith.constant 0 : index
    %129 = vector.load %arg9[%c416, %c0_36] : memref<864x128xbf16, #tpu.memory_space<vmem>>, vector<32x128xbf16>
    tpu.vector_store %arg9[%c416, %c0_36], %128 {strides = array<i32>} : memref<864x128xbf16, #tpu.memory_space<vmem>>, vector<32x128xbf16>,
    %130 = vector.extract_strided_slice %44 {offsets = [0, 129], sizes = [32, 128], strides = [1, 1]} : vector<32x384xf32> to vector<32x128xf32>
    %131 = vector.extract_strided_slice %45 {offsets = [14, 0], sizes = [1, 128], strides = [1, 1]} : vector<27x128xf32> to vector<1x128xf32>
    %132 = vector.broadcast %131 : vector<1x128xf32> to vector<32x128xf32>
    %133 = arith.mulf %130, %132 : vector<32x128xf32>
    %134 = arith.truncf %133 : vector<32x128xf32> to vector<32x128xbf16>
    %c448 = arith.constant 448 : index
    %c0_37 = arith.constant 0 : index
    %135 = vector.load %arg9[%c448, %c0_37] : memref<864x128xbf16, #tpu.memory_space<vmem>>, vector<32x128xbf16>
    tpu.vector_store %arg9[%c448, %c0_37], %134 {strides = array<i32>} : memref<864x128xbf16, #tpu.memory_space<vmem>>, vector<32x128xbf16>,
    %136 = vector.extract_strided_slice %44 {offsets = [0, 131], sizes = [32, 128], strides = [1, 1]} : vector<32x384xf32> to vector<32x128xf32>
    %137 = vector.extract_strided_slice %45 {offsets = [15, 0], sizes = [1, 128], strides = [1, 1]} : vector<27x128xf32> to vector<1x128xf32>
    %138 = vector.broadcast %137 : vector<1x128xf32> to vector<32x128xf32>
    %139 = arith.mulf %136, %138 : vector<32x128xf32>
    %140 = arith.truncf %139 : vector<32x128xf32> to vector<32x128xbf16>
    %c480 = arith.constant 480 : index
    %c0_38 = arith.constant 0 : index
    %141 = vector.load %arg9[%c480, %c0_38] : memref<864x128xbf16, #tpu.memory_space<vmem>>, vector<32x128xbf16>
    tpu.vector_store %arg9[%c480, %c0_38], %140 {strides = array<i32>} : memref<864x128xbf16, #tpu.memory_space<vmem>>, vector<32x128xbf16>,
    %142 = vector.extract_strided_slice %44 {offsets = [0, 132], sizes = [32, 128], strides = [1, 1]} : vector<32x384xf32> to vector<32x128xf32>
    %143 = vector.extract_strided_slice %45 {offsets = [16, 0], sizes = [1, 128], strides = [1, 1]} : vector<27x128xf32> to vector<1x128xf32>
    %144 = vector.broadcast %143 : vector<1x128xf32> to vector<32x128xf32>
    %145 = arith.mulf %142, %144 : vector<32x128xf32>
    %146 = arith.truncf %145 : vector<32x128xf32> to vector<32x128xbf16>
    %c512 = arith.constant 512 : index
    %c0_39 = arith.constant 0 : index
    %147 = vector.load %arg9[%c512, %c0_39] : memref<864x128xbf16, #tpu.memory_space<vmem>>, vector<32x128xbf16>
    tpu.vector_store %arg9[%c512, %c0_39], %146 {strides = array<i32>} : memref<864x128xbf16, #tpu.memory_space<vmem>>, vector<32x128xbf16>,
    %148 = vector.extract_strided_slice %44 {offsets = [0, 133], sizes = [32, 128], strides = [1, 1]} : vector<32x384xf32> to vector<32x128xf32>
    %149 = vector.extract_strided_slice %45 {offsets = [17, 0], sizes = [1, 128], strides = [1, 1]} : vector<27x128xf32> to vector<1x128xf32>
    %150 = vector.broadcast %149 : vector<1x128xf32> to vector<32x128xf32>
    %151 = arith.mulf %148, %150 : vector<32x128xf32>
    %152 = arith.truncf %151 : vector<32x128xf32> to vector<32x128xbf16>
    %c544 = arith.constant 544 : index
    %c0_40 = arith.constant 0 : index
    %153 = vector.load %arg9[%c544, %c0_40] : memref<864x128xbf16, #tpu.memory_space<vmem>>, vector<32x128xbf16>
    tpu.vector_store %arg9[%c544, %c0_40], %152 {strides = array<i32>} : memref<864x128xbf16, #tpu.memory_space<vmem>>, vector<32x128xbf16>,
    %154 = vector.extract_strided_slice %44 {offsets = [0, 139], sizes = [32, 128], strides = [1, 1]} : vector<32x384xf32> to vector<32x128xf32>
    %155 = vector.extract_strided_slice %45 {offsets = [18, 0], sizes = [1, 128], strides = [1, 1]} : vector<27x128xf32> to vector<1x128xf32>
    %156 = vector.broadcast %155 : vector<1x128xf32> to vector<32x128xf32>
    %157 = arith.mulf %154, %156 : vector<32x128xf32>
    %158 = arith.truncf %157 : vector<32x128xf32> to vector<32x128xbf16>
    %c576 = arith.constant 576 : index
    %c0_41 = arith.constant 0 : index
    %159 = vector.load %arg9[%c576, %c0_41] : memref<864x128xbf16, #tpu.memory_space<vmem>>, vector<32x128xbf16>
    tpu.vector_store %arg9[%c576, %c0_41], %158 {strides = array<i32>} : memref<864x128xbf16, #tpu.memory_space<vmem>>, vector<32x128xbf16>,
    %160 = vector.extract_strided_slice %44 {offsets = [0, 140], sizes = [32, 128], strides = [1, 1]} : vector<32x384xf32> to vector<32x128xf32>
    %161 = vector.extract_strided_slice %45 {offsets = [19, 0], sizes = [1, 128], strides = [1, 1]} : vector<27x128xf32> to vector<1x128xf32>
    %162 = vector.broadcast %161 : vector<1x128xf32> to vector<32x128xf32>
    %163 = arith.mulf %160, %162 : vector<32x128xf32>
    %164 = arith.truncf %163 : vector<32x128xf32> to vector<32x128xbf16>
    %c608 = arith.constant 608 : index
    %c0_42 = arith.constant 0 : index
    %165 = vector.load %arg9[%c608, %c0_42] : memref<864x128xbf16, #tpu.memory_space<vmem>>, vector<32x128xbf16>
    tpu.vector_store %arg9[%c608, %c0_42], %164 {strides = array<i32>} : memref<864x128xbf16, #tpu.memory_space<vmem>>, vector<32x128xbf16>,
    %166 = vector.extract_strided_slice %44 {offsets = [0, 141], sizes = [32, 128], strides = [1, 1]} : vector<32x384xf32> to vector<32x128xf32>
    %167 = vector.extract_strided_slice %45 {offsets = [20, 0], sizes = [1, 128], strides = [1, 1]} : vector<27x128xf32> to vector<1x128xf32>
    %168 = vector.broadcast %167 : vector<1x128xf32> to vector<32x128xf32>
    %169 = arith.mulf %166, %168 : vector<32x128xf32>
    %170 = arith.truncf %169 : vector<32x128xf32> to vector<32x128xbf16>
    %c640 = arith.constant 640 : index
    %c0_43 = arith.constant 0 : index
    %171 = vector.load %arg9[%c640, %c0_43] : memref<864x128xbf16, #tpu.memory_space<vmem>>, vector<32x128xbf16>
    tpu.vector_store %arg9[%c640, %c0_43], %170 {strides = array<i32>} : memref<864x128xbf16, #tpu.memory_space<vmem>>, vector<32x128xbf16>,
    %172 = vector.extract_strided_slice %44 {offsets = [0, 143], sizes = [32, 128], strides = [1, 1]} : vector<32x384xf32> to vector<32x128xf32>
    %173 = vector.extract_strided_slice %45 {offsets = [21, 0], sizes = [1, 128], strides = [1, 1]} : vector<27x128xf32> to vector<1x128xf32>
    %174 = vector.broadcast %173 : vector<1x128xf32> to vector<32x128xf32>
    %175 = arith.mulf %172, %174 : vector<32x128xf32>
    %176 = arith.truncf %175 : vector<32x128xf32> to vector<32x128xbf16>
    %c672 = arith.constant 672 : index
    %c0_44 = arith.constant 0 : index
    %177 = vector.load %arg9[%c672, %c0_44] : memref<864x128xbf16, #tpu.memory_space<vmem>>, vector<32x128xbf16>
    tpu.vector_store %arg9[%c672, %c0_44], %176 {strides = array<i32>} : memref<864x128xbf16, #tpu.memory_space<vmem>>, vector<32x128xbf16>,
    %178 = vector.extract_strided_slice %44 {offsets = [0, 144], sizes = [32, 128], strides = [1, 1]} : vector<32x384xf32> to vector<32x128xf32>
    %179 = vector.extract_strided_slice %45 {offsets = [22, 0], sizes = [1, 128], strides = [1, 1]} : vector<27x128xf32> to vector<1x128xf32>
    %180 = vector.broadcast %179 : vector<1x128xf32> to vector<32x128xf32>
    %181 = arith.mulf %178, %180 : vector<32x128xf32>
    %182 = arith.truncf %181 : vector<32x128xf32> to vector<32x128xbf16>
    %c704 = arith.constant 704 : index
    %c0_45 = arith.constant 0 : index
    %183 = vector.load %arg9[%c704, %c0_45] : memref<864x128xbf16, #tpu.memory_space<vmem>>, vector<32x128xbf16>
    tpu.vector_store %arg9[%c704, %c0_45], %182 {strides = array<i32>} : memref<864x128xbf16, #tpu.memory_space<vmem>>, vector<32x128xbf16>,
    %184 = vector.extract_strided_slice %44 {offsets = [0, 145], sizes = [32, 128], strides = [1, 1]} : vector<32x384xf32> to vector<32x128xf32>
    %185 = vector.extract_strided_slice %45 {offsets = [23, 0], sizes = [1, 128], strides = [1, 1]} : vector<27x128xf32> to vector<1x128xf32>
    %186 = vector.broadcast %185 : vector<1x128xf32> to vector<32x128xf32>
    %187 = arith.mulf %184, %186 : vector<32x128xf32>
    %188 = arith.truncf %187 : vector<32x128xf32> to vector<32x128xbf16>
    %c736 = arith.constant 736 : index
    %c0_46 = arith.constant 0 : index
    %189 = vector.load %arg9[%c736, %c0_46] : memref<864x128xbf16, #tpu.memory_space<vmem>>, vector<32x128xbf16>
    tpu.vector_store %arg9[%c736, %c0_46], %188 {strides = array<i32>} : memref<864x128xbf16, #tpu.memory_space<vmem>>, vector<32x128xbf16>,
    %190 = vector.extract_strided_slice %44 {offsets = [0, 147], sizes = [32, 128], strides = [1, 1]} : vector<32x384xf32> to vector<32x128xf32>
    %191 = vector.extract_strided_slice %45 {offsets = [24, 0], sizes = [1, 128], strides = [1, 1]} : vector<27x128xf32> to vector<1x128xf32>
    %192 = vector.broadcast %191 : vector<1x128xf32> to vector<32x128xf32>
    %193 = arith.mulf %190, %192 : vector<32x128xf32>
    %194 = arith.truncf %193 : vector<32x128xf32> to vector<32x128xbf16>
    %c768 = arith.constant 768 : index
    %c0_47 = arith.constant 0 : index
    %195 = vector.load %arg9[%c768, %c0_47] : memref<864x128xbf16, #tpu.memory_space<vmem>>, vector<32x128xbf16>
    tpu.vector_store %arg9[%c768, %c0_47], %194 {strides = array<i32>} : memref<864x128xbf16, #tpu.memory_space<vmem>>, vector<32x128xbf16>,
    %196 = vector.extract_strided_slice %44 {offsets = [0, 148], sizes = [32, 128], strides = [1, 1]} : vector<32x384xf32> to vector<32x128xf32>
    %197 = vector.extract_strided_slice %45 {offsets = [25, 0], sizes = [1, 128], strides = [1, 1]} : vector<27x128xf32> to vector<1x128xf32>
    %198 = vector.broadcast %197 : vector<1x128xf32> to vector<32x128xf32>
    %199 = arith.mulf %196, %198 : vector<32x128xf32>
    %200 = arith.truncf %199 : vector<32x128xf32> to vector<32x128xbf16>
    %c800 = arith.constant 800 : index
    %c0_48 = arith.constant 0 : index
    %201 = vector.load %arg9[%c800, %c0_48] : memref<864x128xbf16, #tpu.memory_space<vmem>>, vector<32x128xbf16>
    tpu.vector_store %arg9[%c800, %c0_48], %200 {strides = array<i32>} : memref<864x128xbf16, #tpu.memory_space<vmem>>, vector<32x128xbf16>,
    %202 = vector.extract_strided_slice %44 {offsets = [0, 149], sizes = [32, 128], strides = [1, 1]} : vector<32x384xf32> to vector<32x128xf32>
    %203 = vector.extract_strided_slice %45 {offsets = [26, 0], sizes = [1, 128], strides = [1, 1]} : vector<27x128xf32> to vector<1x128xf32>
    %204 = vector.broadcast %203 : vector<1x128xf32> to vector<32x128xf32>
    %205 = arith.mulf %202, %204 : vector<32x128xf32>
    %206 = arith.truncf %205 : vector<32x128xf32> to vector<32x128xbf16>
    %c832 = arith.constant 832 : index
    %c0_49 = arith.constant 0 : index
    %207 = vector.load %arg9[%c832, %c0_49] : memref<864x128xbf16, #tpu.memory_space<vmem>>, vector<32x128xbf16>
    tpu.vector_store %arg9[%c832, %c0_49], %206 {strides = array<i32>} : memref<864x128xbf16, #tpu.memory_space<vmem>>, vector<32x128xbf16>,
    %c0_50 = arith.constant 0 : index
    %c0_51 = arith.constant 0 : index
    %208 = vector.load %arg3[%c0_50, %c0_51] : memref<64x864xbf16, #tpu.memory_space<vmem>>, vector<64x864xbf16>
    %c0_52 = arith.constant 0 : index
    %c0_53 = arith.constant 0 : index
    %209 = vector.load %arg9[%c0_52, %c0_53] : memref<864x128xbf16, #tpu.memory_space<vmem>>, vector<864x128xbf16>
    %cst_54 = arith.constant dense<0.000000e+00> : vector<64x128xf32>
    %210 = tpu.matmul %208, %209, %cst_54 {dimension_numbers = #tpu.dot_dimension_numbers<[1], [0], [0], [1], [0, 0, 1, 1], [], []>} : vector<64x864xbf16>, vector<864x128xbf16>, vector<64x128xf32> -> vector<64x128xf32>
    %cst_55 = arith.constant 2.000000e-01 : f32
    %211 = vector.broadcast %cst_55 : f32 to vector<64x128xf32>
    %212 = arith.mulf %211, %210 : vector<64x128xf32>
    %213 = arith.maximumf %210, %212 : vector<64x128xf32>
    %c0_56 = arith.constant 0 : index
    %c0_57 = arith.constant 0 : index
    %214 = vector.load %arg5[%c0_56, %c0_57] : memref<1x128xf32, #tpu.memory_space<vmem>>, vector<1x128xf32>
    %c0_58 = arith.constant 0 : index
    %c0_59 = arith.constant 0 : index
    %215 = vector.load %arg6[%c0_58, %c0_59] : memref<32x128xf32, #tpu.memory_space<vmem>>, vector<32x128xf32>
    %cst_60 = arith.constant 0.000000e+00 : f32
    %216 = vector.broadcast %cst_60 : f32 to vector<1x128xf32>
    %217 = arith.cmpf ogt, %214, %216 : vector<1x128xf32>
    %cst_61 = arith.constant 1.000000e+30 : f32
    %218 = vector.shape_cast %217 : vector<1x128xi1> to vector<1x128xi1>
    %219 = vector.broadcast %218 : vector<1x128xi1> to vector<64x128xi1>
    %220 = vector.broadcast %cst_61 : f32 to vector<64x128xf32>
    %221 = arith.select %219, %213, %220 : vector<64x128xi1>, vector<64x128xf32>
    %cst_62 = arith.constant dense<0x7F800000> : vector<64xf32>
    %222 = vector.multi_reduction <minimumf>, %221, %cst_62 [1] : vector<64x128xf32> to vector<64xf32>
    %223 = vector.shape_cast %222 : vector<64xf32> to vector<64x1xf32>
    %cst_63 = arith.constant 0.000000e+00 : f32
    %224 = vector.broadcast %cst_63 : f32 to vector<1x128xf32>
    %225 = arith.cmpf ogt, %214, %224 : vector<1x128xf32>
    %cst_64 = arith.constant 0.000000e+00 : f32
    %cst_65 = arith.constant 1.000000e+30 : f32
    %226 = arith.subf %cst_64, %cst_65 : f32
    %227 = vector.shape_cast %225 : vector<1x128xi1> to vector<1x128xi1>
    %228 = vector.broadcast %227 : vector<1x128xi1> to vector<64x128xi1>
    %229 = vector.broadcast %226 : f32 to vector<64x128xf32>
    %230 = arith.select %228, %213, %229 : vector<64x128xi1>, vector<64x128xf32>
    %cst_66 = arith.constant dense<0xFF800000> : vector<64xf32>
    %231 = vector.multi_reduction <maximumf>, %230, %cst_66 [1] : vector<64x128xf32> to vector<64xf32>
    %232 = vector.shape_cast %231 : vector<64xf32> to vector<64x1xf32>
    %233 = vector.broadcast %223 : vector<64x1xf32> to vector<64x128xf32>
    %234 = arith.subf %213, %233 : vector<64x128xf32>
    %235 = arith.subf %232, %223 : vector<64x1xf32>
    %236 = tpu.reciprocal %235 {approx = true} : vector<64x1xf32> -> vector<64x1xf32>
    %237 = vector.broadcast %236 : vector<64x1xf32> to vector<64x128xf32>
    %238 = arith.mulf %234, %237 : vector<64x128xf32>
    %cst_67 = arith.constant 0.000000e+00 : f32
    %239 = vector.broadcast %cst_67 : f32 to vector<1x128xf32>
    %240 = arith.cmpf ogt, %214, %239 : vector<1x128xf32>
    %cst_68 = arith.constant 1.000000e+30 : f32
    %241 = vector.shape_cast %240 : vector<1x128xi1> to vector<1x128xi1>
    %242 = vector.broadcast %241 : vector<1x128xi1> to vector<32x128xi1>
    %243 = vector.broadcast %cst_68 : f32 to vector<32x128xf32>
    %244 = arith.select %242, %215, %243 : vector<32x128xi1>, vector<32x128xf32>
    %cst_69 = arith.constant dense<0x7F800000> : vector<32xf32>
    %245 = vector.multi_reduction <minimumf>, %244, %cst_69 [1] : vector<32x128xf32> to vector<32xf32>
    %246 = vector.shape_cast %245 : vector<32xf32> to vector<32x1xf32>
    %cst_70 = arith.constant 0.000000e+00 : f32
    %247 = vector.broadcast %cst_70 : f32 to vector<1x128xf32>
    %248 = arith.cmpf ogt, %214, %247 : vector<1x128xf32>
    %cst_71 = arith.constant 0.000000e+00 : f32
    %cst_72 = arith.constant 1.000000e+30 : f32
    %249 = arith.subf %cst_71, %cst_72 : f32
    %250 = vector.shape_cast %248 : vector<1x128xi1> to vector<1x128xi1>
    %251 = vector.broadcast %250 : vector<1x128xi1> to vector<32x128xi1>
    %252 = vector.broadcast %249 : f32 to vector<32x128xf32>
    %253 = arith.select %251, %215, %252 : vector<32x128xi1>, vector<32x128xf32>
    %cst_73 = arith.constant dense<0xFF800000> : vector<32xf32>
    %254 = vector.multi_reduction <maximumf>, %253, %cst_73 [1] : vector<32x128xf32> to vector<32xf32>
    %255 = vector.shape_cast %254 : vector<32xf32> to vector<32x1xf32>
    %256 = vector.broadcast %246 : vector<32x1xf32> to vector<32x128xf32>
    %257 = arith.subf %215, %256 : vector<32x128xf32>
    %258 = arith.subf %255, %246 : vector<32x1xf32>
    %259 = tpu.reciprocal %258 {approx = true} : vector<32x1xf32> -> vector<32x1xf32>
    %260 = vector.broadcast %259 : vector<32x1xf32> to vector<32x128xf32>
    %261 = arith.mulf %257, %260 : vector<32x128xf32>
    %262 = vector.extract_strided_slice %238 {offsets = [0, 0], sizes = [32, 128], strides = [1, 1]} : vector<64x128xf32> to vector<32x128xf32>
    %263 = arith.subf %262, %261 : vector<32x128xf32>
    %264 = vector.broadcast %214 : vector<1x128xf32> to vector<32x128xf32>
    %265 = arith.mulf %263, %264 : vector<32x128xf32>
    %266 = vector.extract_strided_slice %238 {offsets = [32, 0], sizes = [32, 128], strides = [1, 1]} : vector<64x128xf32> to vector<32x128xf32>
    %267 = arith.subf %266, %261 : vector<32x128xf32>
    %268 = vector.broadcast %214 : vector<1x128xf32> to vector<32x128xf32>
    %269 = arith.mulf %267, %268 : vector<32x128xf32>
    %270 = arith.mulf %265, %265 : vector<32x128xf32>
    %271 = vector.shape_cast %270 : vector<32x128xf32> to vector<1x32x128xf32>
    %cst_74 = arith.constant dense<0.000000e+00> : vector<1xf32>
    %272 = vector.multi_reduction <add>, %271, %cst_74 [1, 2] : vector<1x32x128xf32> to vector<1xf32>
    %273 = vector.shape_cast %272 : vector<1xf32> to vector<1x1x1xf32>
    %274 = vector.extract %273[0, 0, 0] : f32 from vector<1x1x1xf32>
    %c2 = arith.constant 2 : index
    %275 = memref.load %arg7[%c2] : memref<4xf32, #tpu.memory_space<smem>>
    memref.store %274, %arg7[%c2] : memref<4xf32, #tpu.memory_space<smem>>
    %276 = arith.mulf %269, %269 : vector<32x128xf32>
    %277 = vector.shape_cast %276 : vector<32x128xf32> to vector<1x32x128xf32>
    %cst_75 = arith.constant dense<0.000000e+00> : vector<1xf32>
    %278 = vector.multi_reduction <add>, %277, %cst_75 [1, 2] : vector<1x32x128xf32> to vector<1xf32>
    %279 = vector.shape_cast %278 : vector<1xf32> to vector<1x1x1xf32>
    %280 = vector.extract %279[0, 0, 0] : f32 from vector<1x1x1xf32>
    %c3 = arith.constant 3 : index
    %281 = memref.load %arg7[%c3] : memref<4xf32, #tpu.memory_space<smem>>
    memref.store %280, %arg7[%c3] : memref<4xf32, #tpu.memory_space<smem>>
    return
  }
}

</mosaic_0001>

<bundles_post_ra>
// kernel: pyd_loss.1
= control target key start
LH: loop header
LB: loop body
LE: loop exit
PB: predicated region body
PF: predicated region fallthrough
CT: control target
= control target key end

     0   :  { %v4005_v1 = vmov 0   ;;  %v535_v19 = vlaneseq  ;;  %vm290_vm0 = vcmask 392192   ;;  %s4006_s21 = smov 116   ;;  %s4007_s24 = smov 115   ;;  %s5318_s0 = inlined_call_operand.vmem [shape: bf16[432,128], index: 0, kind: input, shape index: {}]   ;;  %s5319_s1 = inlined_call_operand.vmem [shape: bf16[32,432], index: 1, kind: input, shape index: {}]   ;;  %s5320_s2 = inlined_call_operand.vmem [shape: f32[32,128], index: 2, kind: input, shape index: {}]   ;;  %s5321_s3 = inlined_call_operand.vmem [shape: bf16[64,864], index: 3, kind: input, shape index: {}]   ;;  %s5322_s4 = inlined_call_operand.vmem [shape: f32[27,128], index: 4, kind: input, shape index: {}]   ;;  %s5323_s5 = inlined_call_operand.vmem [shape: f32[1,128], index: 5, kind: input, shape index: {}]   ;;  %s5324_s6 = inlined_call_operand.vmem [shape: f32[32,128], index: 6, kind: input, shape index: {}]   ;;  %s5325_s7 = inlined_call_operand.vmem [shape: f32[4], index: 7, kind: output, shape index: {}]  }
   0x1   :  { %v3812_v0 = vld [vmem:[%s5318_s0 + $0xb8] sm:$0xff]   ;;  %346 = vmatprep.subr.bf16.mxu1 %v4005_v1  ;;  %v3815_v4 = vld [vmem:[%s5318_s0 + $0xb0] sm:$0xff]   ;;  %v3818_v7 = vld [vmem:[%s5318_s0 + $0xa8] sm:$0xff]   ;;  %s4008_s28 = smov 111   ;;  %s5326_s29 = smov 109  }
   0x2   :  { %v3813_v2 = vld [vmem:[%s5318_s0 + $0x78] sm:$0xff]   ;;  %347 = vmatpush1.bf16.msra.mxu1 %v3812_v0  ;;  %v3816_v5 = vld [vmem:[%s5318_s0 + $0x70] sm:$0xff]   ;;  %v3819_v8 = vld [vmem:[%s5318_s0 + $0x68] sm:$0xff]   ;;  %v4146_v24 = vshrl.u32 %v535_v19, 7  ;;  %s4010_s30 = smov 113  }
   0x3   :  { %v3814_v3 = vld [vmem:[%s5318_s0 + $0x38] sm:$0xff]   ;;  %3598 = vmatprep.subr.bf16.mxu0 %v3813_v2  ;;  %348 = vmatprep.subr.bf16.mxu1 %v4005_v1  ;;  %v3817_v6 = vld [vmem:[%s5318_s0 + $0x30] sm:$0xff]   ;;  %v3820_v9 = vld [vmem:[%s5318_s0 + $0x28] sm:$0xff]  }
   0x4   :  { %3599 = vmatpush3.bf16.msra.mxu0 %v3814_v3  ;;  %v3821_v10 = vld [vmem:[%s5318_s0 + $0xa0] sm:$0xff]   ;;  %v3825_v13 = vld [vmem:[%s5318_s0 + $0x58] sm:$0xff]   ;;  %v3828_v16 = vld [vmem:[%s5318_s0 + $0x50] sm:$0xff]   ;;  %v4162_v29 = vsub.s32 7, %v4146_v24  ;;  %v4165_v30 = vsub.s32 6, %v4146_v24  ;;  %v4182_v35 = vsub.s32 3, %v4146_v24 }
   0x5   :  { %3600 = vmatprep.subr.bf16.mxu0 %v3816_v5  ;;  %v3822_v11 = vld [vmem:[%s5318_s0 + $0x60] sm:$0xff]   ;;  %v3824_v14 = vld [vmem:[%s5318_s0 + $0x98] sm:$0xff]   ;;  %v3827_v17 = vld [vmem:[%s5318_s0 + $0x90] sm:$0xff]   ;;  %v4185_v36 = vsub.s32 5, %v4146_v24  ;;  %v4193_v40 = vsub.s32 2, %v4146_v24  ;;  %v4225_v50 = vsub.s32 1, %v4146_v24 }
   0x6   :  { %349 = vmatpush1.bf16.msra.mxu1 %v3815_v4  ;;  %v3823_v12 = vld [vmem:[%s5318_s0 + $0x20] sm:$0xff]   ;;  %v3826_v15 = vld [vmem:[%s5318_s0 + $0x18] sm:$0xff]   ;;  %v3829_v18 = vld [vmem:[%s5318_s0 + $0x10] sm:$0xff]   ;;  %v781_v52 = vsub.s32 4, %v4146_v24 }
   0x7   :  { %350 = vmatprep.subr.bf16.mxu1 %v4005_v1  ;;  %v3831_v20 = vld [vmem:[%s5318_s0 + $0x48] sm:$0xff]   ;;  %v3834_v23 = vld [vmem:[%s5318_s0 + $0x40] sm:$0xff]   ;;  %v3839_v31 = vld [vmem:[%s5318_s0 + $0xd0] sm:$0xff]  }
   0x8   :  { %3601 = vmatpush3.bf16.msra.mxu0 %v3817_v6  ;;  %v3830_v21 = vld [vmem:[%s5318_s0 + $0x88] sm:$0xff]   ;;  %v3838_v25 = vld [vmem:[%s5319_s1 + $0x4] ss:$16 sps:$4 sm:$0xff]   ;;  %v3836_v32 = vld [vmem:[%s5319_s1] ss:$16 sps:$4 sm:$0xff]  }
   0x9   :  { %3602 = vmatprep.subr.bf16.mxu0 %v3819_v8  ;;  %v3832_v22 = vld [vmem:[%s5318_s0 + $0x8] sm:$0xff]   ;;  %v3833_v26 = vld [vmem:[%s5318_s0 + $0x80] sm:$0xff]   ;;  %329 = vmatprep.mubr.bf16.mxu0 %v3838_v25 }
   0xa   :  { %351 = vmatpush1.bf16.msra.mxu1 %v3818_v7  ;;  %v3835_v27 = vld [vmem:[%s5318_s0] sm:$0xff]   ;;  %v3844_v28 = vld [vmem:[%s5319_s1 + $0xc] ss:$16 sps:$4 sm:$0xff]   ;;  %v3842_v47 = vld [vmem:[%s5319_s1 + $0x8] ss:$16 sps:$4 sm:$0xff]  }
   0xb   :  { %352 = vmatprep.subr.bf16.mxu1 %v4005_v1  ;;  %3282 = vmatprep.mubr.msk.bf16.mxu1 %vm290_vm0, %v3844_v28  ;;  %v3845_v33 = vld [vmem:[%s5319_s1 + $0x24] ss:$16 sps:$4 sm:$0xff]   ;;  %v3840_v37 = vld [vmem:[%s5318_s0 + $0xc8] sm:$0xff]   ;;  %v3847_v45 = vld [vmem:[%s5319_s1 + $0x20] ss:$16 sps:$4 sm:$0xff]  }
   0xc   :  { %3603 = vmatpush3.bf16.msra.mxu0 %v3820_v9  ;;  %v531_v34 = vld [vmem:[%s5322_s4] sm:$0xff]  ;;  %v4198_v41 = vld [vmem:[%s5322_s4 + $0x8] sm:$0xff] }
   0xd   :  { %3604 = vmatprep.subr.bf16.mxu0 %v3822_v11  ;;  %v965_v38 = vrot.slane %v531_v34, %v4162_v29  ;;  %v904_v39 = vrot.slane %v531_v34, %v4165_v30  ;;  %v4202_v42 = vrot.slane %v4198_v41, %v4185_v36  ;;  %v3841_v43 = vld [vmem:[%s5318_s0 + $0xc0] sm:$0xff]   ;;  %v721_v44 = vrot.slane %v531_v34, %v4182_v35  ;;  %v3848_v48 = vld [vmem:[%s5319_s1 + $0x2c] ss:$16 sps:$4 sm:$0xff]  }
   0xe   :  { %353 = vmatpush1.bf16.msra.mxu1 %v3821_v10  ;;  %v660_v46 = vrot.slane %v531_v34, %v4193_v40  ;;  %v843_v49 = vrot.slane %v531_v34, %v4185_v36  ;;  %v1420_v51 = vrot.slane %v4198_v41, %v4162_v29  ;;  %v599_v53 = vrot.slane %v531_v34, %v4225_v50 }
   0xf   :  { %354 = vmatprep.subr.bf16.mxu1 %v4005_v1  ;;  %967 = vrot.lane.b32.xlu0 %v965_v38, %s4006_s21 }
  0x10   :  { %3605 = vmatpush3.bf16.msra.mxu0 %v3823_v12  ;;  %906 = vrot.lane.b32.xlu1 %v904_v39, %s4007_s24 }
  0x11   :  { %3606 = vmatprep.subr.bf16.mxu0 %v3825_v13 }
  0x12   :  { %355 = vmatpush1.bf16.msra.mxu1 %v3824_v14 }
  0x13   :  { %356 = vmatprep.subr.bf16.mxu1 %v4005_v1  ;;  %723 = vrot.lane.b32.xlu0 %v721_v44, %s4008_s28 }
  0x14   :  { %3607 = vmatpush3.bf16.msra.mxu0 %v3826_v15  ;;  %662 = vrot.lane.b32.xlu1 %v660_v46, %s5326_s29 }
  0x15   :  { %3608 = vmatprep.subr.bf16.mxu0 %v3828_v16 }
  0x16   :  { %357 = vmatpush1.bf16.msra.mxu1 %v3827_v17 }
  0x17   :  { %358 = vmatprep.subr.bf16.mxu1 %v4005_v1  ;;  %845 = vrot.lane.b32.xlu0 %v843_v49, %s4010_s30 }
  0x18   :  { %3609 = vmatpush3.bf16.msra.mxu0 %v3829_v18 }
  0x19   :  { %3610 = vmatprep.subr.bf16.mxu0 %v3831_v20 }
  0x1a   :  { %359 = vmatpush1.bf16.msra.mxu1 %v3830_v21 }
  0x1b   :  { %360 = vmatprep.subr.bf16.mxu1 %v4005_v1 }
  0x1c   :  { %3611 = vmatpush3.bf16.msra.mxu0 %v3832_v22 }
  0x1d   :  { %3612 = vmatprep.subr.bf16.mxu0 %v3834_v23 }
  0x1e   :  { %361 = vmatpush1.bf16.msra.mxu1 %v3833_v26 }
  0x1f   :  { %372 = vmatprep.subr.bf16.mxu1 %v4005_v1 }
  0x20   :  { %3613 = vmatpush3.bf16.msra.mxu0 %v3835_v27 }
  0x22   :  { %373 = vmatpush2.bf16.msra.mxu1 %v3839_v31 }
  0x23   :  { %330 = vmatmul.mubr.bf16.vlgmr.msra.gmra.mxu0 %v3836_v32  ;;  %374 = vmatprep.subr.bf16.mxu1 %v4005_v1 }
  0x24   :  { %337 = vmatprep.mubr.bf16.mxu0 %v3845_v33 }
  0x26   :  { %375 = vmatpush2.bf16.msra.mxu1 %v3840_v37 }
  0x27   :  { %376 = vmatprep.subr.bf16.mxu1 %v4005_v1 }
  0x2a   :  { %377 = vmatpush2.bf16.msra.mxu1 %v3841_v43 }
  0x2b   :  { %338 = vmatmul.mubr.bf16.gmra.mxu0 %v3847_v45 }
  0x2c   :  { %12 = vsyncpa [#allocation5], 0  ;;  %s4011_s8 = smov 3   ;;  %v1209_v54 = vrot.slane %v4198_v41, %v4182_v35  ;;  %s4012_s9 = smov 108   ;;  %v782_v55 = vrot.slane %v531_v34, %v781_v52  ;;  %v4239_v56 = vsub.s32 0, %v4146_v24  ;;  %v1359_v58 = vrot.slane %v4198_v41, %v4165_v30  ;;  %v533_v61 = vld [vmem:[%s5322_s4 + $0x10] sm:$0xff] }
  0x2d   :  { %379 = vmatmul.mubr.bf16.vlgmr.msra.gmra.mxu1 %v3842_v47  ;;  %1422 = vrot.lane.b32.xlu1 %v1420_v51, %s4011_s8  ;;  %v3850_v57 = vld [vmem:[%s5319_s1 + $0x28] ss:$16 sps:$4 sm:$0xff]   ;;  %s4013_s12 = smov 125   ;;  %s4014_s13 = smov 112   ;;  %v1148_v60 = vrot.slane %v4198_v41, %v4193_v40  ;;  %v1908_v62 = vrot.slane %v533_v61, %v4162_v29  ;;  %v1087_v63 = vrot.slane %v4198_v41, %v4225_v50  ;;  %vm1010_vm1 = vcmask 97280  }
  0x2e   :  { %3283 = vmatprep.mubr.msk.bf16.mxu1 %vm290_vm0, %v3848_v48  ;;  %601 = vrot.lane.b32.xlu0 %v599_v53, %s4012_s9  ;;  %v538_v59 = vrot.slane %v531_v34, %v4239_v56  ;;  %s4015_s14 = smov 1   ;;  %s4016_s16 = smov 107   ;;  %v1664_v0 = vrot.slane %v533_v61, %v4182_v35  ;;  %v1270_v2 = vrot.slane %v4198_v41, %v781_v52  ;;  %v534_v9 = vld [vmem:[%s5322_s4 + $0x18] sm:$0x7]  ;;  %vm5329_vm2 = vcmask 105472  }
  0x2f   :  { %s4017_s17 = smov 124   ;;  %s4018_s18 = smov 17   ;;  %v1847_v3 = vrot.slane %v533_v61, %v4165_v30  ;;  %v1026_v4 = vrot.slane %v4198_v41, %v4239_v56  ;;  %v1603_v5 = vrot.slane %v533_v61, %v4193_v40  ;;  %v1786_v6 = vrot.slane %v533_v61, %v4185_v36 }
  0x30   :  { %s4019_s19 = smov 123   ;;  %s4020_s20 = smov 12   ;;  %v1542_v7 = vrot.slane %v533_v61, %v4225_v50  ;;  %v1725_v8 = vrot.slane %v533_v61, %v781_v52  ;;  %v2091_v10 = vrot.slane %v534_v9, %v4193_v40  ;;  %v1481_v11 = vrot.slane %v533_v61, %v4239_v56 }
  0x31   :  { %1211 = vrot.lane.b32.xlu1 %v1209_v54, %s4013_s12  ;;  %s4021_s22 = smov 127   ;;  %s4022_s23 = smov 16   ;;  %v2030_v12 = vrot.slane %v534_v9, %v4225_v50  ;;  %v1969_v13 = vrot.slane %v534_v9, %v4239_v56  ;;  %vm766_vm3 = vcmask 138240   ;;  %vm5328_vm4 = vcmask 154624  }
  0x32   :  { %784 = vrot.lane.b32.xlu0 %v782_v55, %s4014_s13  ;;  %s4023_s25 = smov 117   ;;  %s4024_s0 = smov 11   ;;  %vm888_vm5 = vcmask 121856   ;;  %vm1465_vm6 = vcmask 1022976   ;;  %vm644_vm7 = vcmask 162816   ;;  %vm1254_vm8 = vcmask 23552  }
  0x33   :  { %s4025_s26 = smov 15   ;;  %s4026_s11 = smov 5   ;;  %vm827_vm9 = vcmask 130048   ;;  %vm1404_vm10 = vcmask 1039360   ;;  %vm583_vm11 = vcmask 171008   ;;  %vm1193_vm12 = vcmask 31744  }
  0x34   :  { %s4027_s15 = smov 13   ;;  %s4028_s1 = smov 21   ;;  %vm1953_vm13 = vcmask 908288   ;;  %vm1132_vm14 = vcmask 39936   ;;  %vm1709_vm15 = vcmask 949248   ;;  %vm1315_vm0 = vcmask 7168  }
  0x35   :  { %387 = vmatmul.mubr.bf16.gmra.mxu1 %v3850_v57  ;;  %1361 = vrot.lane.b32.xlu1 %v1359_v58, %s4015_s14  ;;  %s4029_s29 = smov 4   ;;  %s4030_s4 = smov 20  }
  0x36   :  { %540 = vrot.lane.b32.xlu0 %v538_v59, %s4016_s16  ;;  %s4031_s27 = smov 19  }
  0x39   :  { %1150 = vrot.lane.b32.xlu1 %v1148_v60, %s4017_s17 }
  0x3a   :  { %1910 = vrot.lane.b32.xlu0 %v1908_v62, %s4018_s18 }
  0x3d   :  { %1089 = vrot.lane.b32.xlu1 %v1087_v63, %s4019_s19 }
  0x3e   :  { %1666 = vrot.lane.b32.xlu0 %v1664_v0, %s4020_s20 }
  0x41   :  { %1272 = vrot.lane.b32.xlu1 %v1270_v2, %s4021_s22 }
  0x42   :  { %1849 = vrot.lane.b32.xlu0 %v1847_v3, %s4022_s23 }
  0x45   :  { %1028 = vrot.lane.b32.xlu1 %v1026_v4, %s4023_s25 }
  0x46   :  { %1605 = vrot.lane.b32.xlu0 %v1603_v5, %s4024_s0 }
  0x49   :  { %1788 = vrot.lane.b32.xlu1 %v1786_v6, %s4025_s26 }
  0x4a   :  { %1544 = vrot.lane.b32.xlu0 %v1542_v7, %s4026_s11 }
  0x4d   :  { %1727 = vrot.lane.b32.xlu1 %v1725_v8, %s4027_s15 }
  0x4e   :  { %2093 = vrot.lane.b32.xlu0 %v2091_v10, %s4028_s1 }
  0x51   :  { %1483 = vrot.lane.b32.xlu1 %v1481_v11, %s4029_s29 }
  0x52   :  { %2032 = vrot.lane.b32.xlu0 %v2030_v12, %s4030_s4 }
  0x55   :  { %1971 = vrot.lane.b32.xlu1 %v1969_v13, %s4031_s27 }
  0x81   :  { %v4289_v17 = vpop.permute.xlu0 %967 }
  0x82   :  { %v4291_v21 = vpop.permute.xlu1 %906  ;;  %v4294_v27 = vmul.f32 0.0, %v4289_v17 }
  0x83   :  { %v4297_v28 = vmul.f32 0.0, %v4291_v21 }
  0x85   :  { %v4299_v29 = vpop.permute.xlu0 %723 }
  0x86   :  { %v4303_v33 = vpop.permute.xlu1 %662  ;;  %v4310_v37 = vmul.f32 0.0, %v4299_v29 }
  0x87   :  { %v4313_v38 = vmul.f32 0.0, %v4303_v33 }
  0x89   :  { %v4325_v47 = vpop.permute.xlu0 %845 }
  0x8a   :  { %v4330_v48 = vmul.f32 0.0, %v4325_v47 }
  0x9f   :  { %v4340_v55 = vpop.permute.xlu1 %1422 }
  0xa0   :  { %v4345_v57 = vmul.f32 0.0, %v4340_v55  ;;  %v4353_v62 = vpop.permute.xlu0 %601 }
  0xa1   :  { %v4358_v63 = vmul.f32 0.0, %v4353_v62 }
  0xa3   :  { %v4366_v5 = vpop.permute.xlu1 %1211 }
  0xa4   :  { %v4371_v6 = vmul.f32 0.0, %v4366_v5  ;;  %v4379_v11 = vpop.permute.xlu0 %784 }
  0xa5   :  { %v4384_v12 = vmul.f32 0.0, %v4379_v11 }
  0xe3   :  { %v3614_v14 = vpop.f32.mrf.mxu0 }
  0xe5   :  { %v3615_v15 = vpop.f32.mrf.mxu0 }
  0xe6   :  { %v3616_v18 = vadd.f32 %v3615_v15, %v3614_v14 }
  0xe7   :  { %v3617_v16 = vpop.f32.mrf.mxu0 }
  0xe9   :  { %v3618_v19 = vpop.f32.mrf.mxu0 }
  0xea   :  { %v3619_v24 = vadd.f32 %v3618_v19, %v3617_v16 }
  0xed   :  { %v380_v20 = vpop.f32.mrf.mxu1 }
  0xee   :  { %v381_v22 = vadd.f32 %v3616_v18, %v380_v20  ;;  %v4392_v18 = vpop.permute.xlu1 %1361 }
  0xef   :  { %v382_v23 = vpop.f32.mrf.mxu1  ;;  %v4397_v19 = vmul.f32 0.0, %v4392_v18 }
  0xf0   :  { %v395_v25 = vmul.f32 0.2, %v381_v22 }
  0xf1   :  { %v383_v26 = vpop.f32.mrf.mxu1 }
  0xf2   :  { %v4301_v30 = vmax.f32 %v381_v22, %v395_v25  ;;  %v384_v31 = vadd.f32 %v3619_v24, %v383_v26  ;;  %v4405_v25 = vpop.permute.xlu0 %540 }
  0xf3   :  { %v385_v32 = vpop.f32.mrf.mxu1  ;;  %v4410_v26 = vmul.f32 0.0, %v4405_v25 }
  0xf4   :  { %v396_v34 = vmul.f32 0.2, %v384_v31  ;;  %v971_v35 = vmul.f32 %v4289_v17, %v4301_v30  ;;  %v910_v36 = vmul.f32 %v4291_v21, %v4301_v30  ;;  %v727_v40 = vmul.f32 %v4299_v29, %v4301_v30 }
  0xf5   :  { %v4315_v39 = vpop.f32.mrf.mxu1  ;;  %v666_v45 = vmul.f32 %v4303_v33, %v4301_v30  ;;  %v849_v53 = vmul.f32 %v4325_v47, %v4301_v30  ;;  %v1425_v61 = vmul.f32 %v4340_v55, %v4301_v30  ;;  %v605_v4 = vmul.f32 %v4353_v62, %v4301_v30 }
  0xf6   :  { %v4319_v41 = vmax.f32 %v384_v31, %v396_v34  ;;  %v3506_v43 = vpack.c.bf16 %v971_v35, %v4294_v27  ;;  %v3502_v44 = vpack.c.bf16 %v910_v36, %v4297_v28  ;;  %v3490_v50 = vpack.c.bf16 %v727_v40, %v4310_v37  ;;  %v3620_v31 = vpop.f32.mrf.mxu0  ;;  %v4418_v40 = vpop.permute.xlu1 %1150 }
  0xf7   :  { %v390_v46 = vpop.f32.mrf.mxu1  ;;  %v3486_v51 = vpack.c.bf16 %v666_v45, %v4313_v38  ;;  %v3498_v59 = vpack.c.bf16 %v849_v53, %v4330_v48  ;;  %v3538_v2 = vpack.c.bf16 %v4345_v57, %v1425_v61  ;;  %v3482_v8 = vpack.c.bf16 %v605_v4, %v4358_v63 }
  0xf8   :  { %998 = vrot.lane.b32.xlu1 %v3506_v43, %s4020_s20  ;;  %937 = vrot.lane.b32.xlu0 %v3502_v44, %s4027_s15  ;;  %v912_v52 = vmul.f32 %v4291_v21, %v4319_v41  ;;  %v668_v60 = vmul.f32 %v4303_v33, %v4319_v41  ;;  %v851_v3 = vmul.f32 %v4325_v47, %v4319_v41  ;;  %v4423_v43 = vmul.f32 0.0, %v4418_v40  ;;  %v3621_v44 = vpop.f32.mrf.mxu0 }
  0xf9   :  { %v4332_v49 = vpop.f32.mrf.mxu1  ;;  %v1427_v9 = vmul.f32 %v4340_v55, %v4319_v41  ;;  %v1215_v10 = vmul.f32 %v4366_v5, %v4301_v30  ;;  %v607_v15 = vmul.f32 %v4353_v62, %v4319_v41  ;;  %v788_v16 = vmul.f32 %v4379_v11, %v4301_v30 }
  0xfa   :  { %v3503_v58 = vpack.c.bf16 %v912_v52, %v4297_v28  ;;  %v3487_v0 = vpack.c.bf16 %v668_v60, %v4313_v38  ;;  %v3499_v7 = vpack.c.bf16 %v851_v3, %v4330_v48  ;;  %v1217_v23 = vmul.f32 %v4366_v5, %v4319_v41  ;;  %v4431_v52 = vpop.permute.xlu0 %1910 }
  0xfb   :  { %v393_v54 = vpop.f32.mrf.mxu1  ;;  %v3539_v13 = vpack.c.bf16 %v4345_v57, %v1427_v9  ;;  %v3522_v14 = vpack.c.bf16 %v1215_v10, %v4371_v6  ;;  %v3483_v20 = vpack.c.bf16 %v607_v15, %v4358_v63  ;;  %v3494_v22 = vpack.c.bf16 %v788_v16, %v4384_v12 }
  0xfc   :  { %754 = vrot.lane.b32.xlu1 %v3490_v50, %s4018_s18  ;;  %693 = vrot.lane.b32.xlu0 %v3486_v51, %s4031_s27  ;;  %v1364_v24 = vmul.f32 %v4392_v18, %v4301_v30  ;;  %v3523_v32 = vpack.c.bf16 %v1217_v23, %v4371_v6  ;;  %v790_v35 = vmul.f32 %v4379_v11, %v4319_v41  ;;  %v4436_v53 = vmul.f32 0.0, %v4431_v52  ;;  %v3623_v54 = vpop.f32.mrf.mxu0 }
  0xfd   :  { %v544_v36 = vmul.f32 %v4405_v25, %v4301_v30  ;;  %v1366_v50 = vmul.f32 %v4392_v18, %v4319_v41  ;;  %v1154_v51 = vmul.f32 %v4418_v40, %v4301_v30  ;;  %v546_v60 = vmul.f32 %v4405_v25, %v4319_v41 }
  0xfe   :  { %v3534_v34 = vpack.c.bf16 %v4397_v19, %v1364_v24  ;;  %v3495_v45 = vpack.c.bf16 %v790_v35, %v4384_v12  ;;  %v1913_v61 = vmul.f32 %v4431_v52, %v4301_v30  ;;  %v3622_v3 = vadd.f32 %v3621_v44, %v3620_v31  ;;  %v3624_v4 = vpop.f32.mrf.mxu0 }
  0xff   :  { %v3478_v46 = vpack.c.bf16 %v544_v36, %v4410_v26  ;;  %v1156_v9 = vmul.f32 %v4418_v40, %v4319_v41  ;;  %v1915_v23 = vmul.f32 %v4431_v52, %v4319_v41 }
 0x100   :  { %939 = vrot.lane.b32.xlu1 %v3503_v58, %s4027_s15  ;;  %876 = vrot.lane.b32.xlu0 %v3498_v59, %s4025_s26  ;;  %v3535_v58 = vpack.c.bf16 %v4397_v19, %v1366_v50  ;;  %v3518_v59 = vpack.c.bf16 %v1154_v51, %v4423_v43  ;;  %v389_v16 = vadd.f32 %v3622_v3, %v4315_v39 }
 0x101   :  { %v3571_v35 = vpack.c.bf16 %v4436_v53, %v1915_v23 }
 0x104   :  { %695 = vrot.lane.b32.xlu1 %v3487_v0, %s4031_s27  ;;  %1453 = vrot.lane.b32.xlu0 %v3538_v2, %s4013_s12  ;;  %v4444_v0 = vpop.permute.xlu1 %1089 }
 0x105   :  { %v4449_v2 = vmul.f32 0.0, %v4444_v0  ;;  %v1093_v10 = vmul.f32 %v4444_v0, %v4301_v30  ;;  %v1095_v44 = vmul.f32 %v4444_v0, %v4319_v41 }
 0x107   :  { %v3515_v51 = vpack.c.bf16 %v1095_v44, %v4449_v2 }
 0x108   :  { %878 = vrot.lane.b32.xlu1 %v3499_v7, %s4025_s26  ;;  %632 = vrot.lane.b32.xlu0 %v3482_v8, %s4030_s4  ;;  %v3479_v7 = vpack.c.bf16 %v546_v60, %v4410_v26  ;;  %v3570_v8 = vpack.c.bf16 %v4436_v53, %v1913_v61  ;;  %v4471_v31 = vpop.permute.xlu1 %1272 }
 0x109   :  { %v4477_v39 = vmul.f32 0.0, %v4471_v31  ;;  %v1278_v3 = vmul.f32 %v4471_v31, %v4319_v41 }
 0x10c   :  { %1455 = vrot.lane.b32.xlu1 %v3539_v13, %s4013_s12  ;;  %1242 = vrot.lane.b32.xlu0 %v3522_v14, %s4011_s8  ;;  %v4457_v13 = vpop.permute.xlu0 %1666  ;;  %v3625_v14 = vadd.f32 %v3624_v4, %v3623_v54  ;;  %v729_v4 = vmul.f32 %v4299_v29, %v4319_v41 }
 0x10d   :  { %v4462_v15 = vmul.f32 0.0, %v4457_v13  ;;  %v1669_v24 = vmul.f32 %v4457_v13, %v4301_v30 }
 0x10f   :  { %v3554_v36 = vpack.c.bf16 %v4462_v15, %v1669_v24 }
 0x110   :  { %634 = vrot.lane.b32.xlu1 %v3483_v20, %s4030_s4  ;;  %815 = vrot.lane.b32.xlu0 %v3494_v22, %s4022_s23  ;;  %v3519_v20 = vpack.c.bf16 %v1156_v9, %v4423_v43  ;;  %v3514_v22 = vpack.c.bf16 %v1093_v10, %v4449_v2  ;;  %v1332_v9 = vmul.f32 %v4202_v42, %v4301_v30 }
 0x111   :  { %v1333_v10 = vmul.f32 %v4202_v42, %v4319_v41 }
 0x114   :  { %1244 = vrot.lane.b32.xlu1 %v3523_v32, %s4011_s8  ;;  %1392 = vrot.lane.b32.xlu0 %v3534_v34, %s4021_s22  ;;  %v392_v32 = vadd.f32 %v3625_v14, %v4332_v49  ;;  %v397_v34 = vmul.f32 0.2, %v389_v16  ;;  %v1671_v49 = vmul.f32 %v4457_v13, %v4319_v41 }
 0x116   :  { %v4489_v50 = vmax.f32 %v389_v16, %v397_v34  ;;  %v3555_v61 = vpack.c.bf16 %v4462_v15, %v1671_v49  ;;  %v3589_v16 = vpack.c.bf16 %v1333_v10, %v1332_v9 }
 0x118   :  { %817 = vrot.lane.b32.xlu1 %v3495_v45, %s4022_s23  ;;  %571 = vrot.lane.b32.xlu0 %v3478_v46, %s4028_s1  ;;  %v1276_v45 = vmul.f32 %v4471_v31, %v4301_v30  ;;  %v398_v46 = vmul.f32 0.2, %v392_v32  ;;  %v1334_v60 = vmul.f32 %v4202_v42, %v4489_v50  ;;  %v914_v23 = vmul.f32 %v4291_v21, %v4489_v50 }
 0x119   :  { %v975_v24 = vmul.f32 %v4289_v17, %v4489_v50  ;;  %3596 = vst [vmem:[#allocation3 + $0xd0] sm:$0xff] %v3589_v16   ;;  %v670_v34 = vmul.f32 %v4303_v33, %v4489_v50  ;;  %v1219_v9 = vmul.f32 %v4366_v5, %v4489_v50 }
 0x11a   :  { %v3526_v54 = vpack.c.bf16 %v1276_v45, %v4477_v39 }
 0x11c   :  { %1394 = vrot.lane.b32.xlu1 %v3535_v58, %s4021_s22  ;;  %1181 = vrot.lane.b32.xlu0 %v3518_v59, %s4029_s29  ;;  %v973_v58 = vmul.f32 %v4289_v17, %v4319_v41  ;;  %v4495_v59 = vmax.f32 %v392_v32, %v398_v46  ;;  %v3508_v32 = vpack.c.bf16 %v975_v24, %v4294_v27 }
 0x11d   :  { %v853_v46 = vmul.f32 %v4325_v47, %v4489_v50 }
 0x11e   :  { %5336 = vst [vmem:[#allocation7_spill] sm:$0xff] %v4495_v59  ;;  %v977_v45 = vmul.f32 %v4289_v17, %v4495_v59  ;;  %v4547_v17 = vpop.permute.xlu0 %1849 }
 0x120   :  { %573 = vrot.lane.b32.xlu1 %v3479_v7, %s4028_s1  ;;  %1941 = vrot.lane.b32.xlu0 %v3570_v8, %s4008_s28  ;;  %v3507_v7 = vpack.c.bf16 %v973_v58, %v4294_v27  ;;  %v1335_v8 = vmul.f32 %v4202_v42, %v4495_v59  ;;  %v3504_v42 = vpack.c.bf16 %v914_v23, %v4297_v28 }
 0x121   :  { %v3509_v49 = vpack.c.bf16 %v977_v45, %v4294_v27  ;;  %v1429_v58 = vmul.f32 %v4340_v55, %v4489_v50  ;;  %v1854_v27 = vmul.f32 %v4547_v17, %v4319_v41  ;;  %v792_v23 = vmul.f32 %v4379_v11, %v4489_v50 }
 0x122   :  { %v3594_v14 = vpack.c.bf16 %v1335_v8, %v1334_v60 }
 0x124   :  { %1183 = vrot.lane.b32.xlu1 %v3519_v20, %s4029_s29  ;;  %1120 = vrot.lane.b32.xlu0 %v3514_v22, %s4026_s11  ;;  %v3527_v20 = vpack.c.bf16 %v1278_v3, %v4477_v39  ;;  %v3491_v22 = vpack.c.bf16 %v729_v4, %v4310_v37  ;;  %3597 = vst [vmem:[#allocation3 + $0xd8] sm:$0xff] %v3594_v14   ;;  %v4560_v4 = vpop.permute.xlu1 %1028  ;;  %v4573_v14 = vpop.permute.xlu0 %1605 }
 0x125   :  { %v609_v3 = vmul.f32 %v4353_v62, %v4489_v50  ;;  %v1034_v8 = vmul.f32 %v4560_v4, %v4319_v41  ;;  %v4569_v10 = vmul.f32 0.0, %v4560_v4  ;;  %v4582_v24 = vmul.f32 0.0, %v4573_v14 }
 0x127   :  { %v3511_v16 = vpack.c.bf16 %v1034_v8, %v4569_v10 }
 0x128   :  { %1943 = vrot.lane.b32.xlu1 %v3571_v35, %s4008_s28  ;;  %1697 = vrot.lane.b32.xlu0 %v3554_v36, %s4006_s21  ;;  %v731_v35 = vmul.f32 %v4299_v29, %v4489_v50  ;;  %v3488_v36 = vpack.c.bf16 %v670_v34, %v4313_v38  ;;  %v3496_v34 = vpack.c.bf16 %v792_v23, %v4384_v12  ;;  %v4599_v45 = vpop.permute.xlu0 %1544 }
 0x12a   :  { %v3492_v44 = vpack.c.bf16 %v731_v35, %v4310_v37 }
 0x12c   :  { %1122 = vrot.lane.b32.xlu1 %v3515_v51, %s4026_s11  ;;  %1303 = vrot.lane.b32.xlu0 %v3526_v54, %s4015_s14  ;;  %v3500_v51 = vpack.c.bf16 %v853_v46, %v4330_v48  ;;  %v733_v54 = vmul.f32 %v4299_v29, %v4495_v59  ;;  %v4556_v29 = vmul.f32 0.0, %v4547_v17  ;;  %v4625_v8 = vpop.permute.xlu0 %2093 }
 0x12d   :  { %v4634_v23 = vmul.f32 0.0, %v4625_v8 }
 0x12e   :  { %v3493_v60 = vpack.c.bf16 %v733_v54, %v4310_v37  ;;  %v3484_v37 = vpack.c.bf16 %v609_v3, %v4358_v63  ;;  %v548_v54 = vmul.f32 %v4405_v25, %v4489_v50 }
 0x130   :  { %1699 = vrot.lane.b32.xlu1 %v3555_v61, %s4006_s21  ;;  %1000 = vrot.lane.b32.xlu0 %v3507_v7, %s4020_s20  ;;  %v3540_v61 = vpack.c.bf16 %v4345_v57, %v1429_v58  ;;  %v3567_v7 = vpack.c.bf16 %v4556_v29, %v1854_v27  ;;  %v4608_v58 = vmul.f32 0.0, %v4599_v45  ;;  %v3480_v27 = vpack.c.bf16 %v548_v54, %v4410_v26 }
 0x131   :  { %v1431_v54 = vmul.f32 %v4340_v55, %v4495_v59  ;;  %v1280_v55 = vmul.f32 %v4471_v31, %v4489_v50 }
 0x134   :  { %1305 = vrot.lane.b32.xlu1 %v3527_v20, %s4015_s14  ;;  %756 = vrot.lane.b32.xlu0 %v3491_v22, %s4018_s18  ;;  %v3524_v20 = vpack.c.bf16 %v1219_v9, %v4371_v6  ;;  %v1610_v22 = vmul.f32 %v4573_v14, %v4319_v41 }
 0x138   :  { %941 = vrot.lane.b32.xlu1 %v3504_v42, %s4027_s15  ;;  %1002 = vrot.lane.b32.xlu0 %v3508_v32, %s4020_s20  ;;  %v4586_v42 = vpop.permute.xlu1 %1788  ;;  %v3551_v32 = vpack.c.bf16 %v4582_v24, %v1610_v22  ;;  %v1917_v22 = vmul.f32 %v4431_v52, %v4489_v50 }
 0x139   :  { %v1793_v35 = vmul.f32 %v4586_v42, %v4319_v41 }
 0x13c   :  { %697 = vrot.lane.b32.xlu1 %v3488_v36, %s4031_s27  ;;  %758 = vrot.lane.b32.xlu0 %v3492_v44, %s4018_s18  ;;  %v1368_v36 = vmul.f32 %v4392_v18, %v4489_v50  ;;  %v4595_v44 = vmul.f32 0.0, %v4586_v42 }
 0x13e   :  { %v3563_v46 = vpack.c.bf16 %v4595_v44, %v1793_v35  ;;  %v855_v35 = vmul.f32 %v4325_v47, %v4495_v59 }
 0x140   :  { %1004 = vrot.lane.b32.xlu1 %v3509_v49, %s4020_s20  ;;  %880 = vrot.lane.b32.xlu0 %v3500_v51, %s4025_s26  ;;  %v3536_v49 = vpack.c.bf16 %v4397_v19, %v1368_v36  ;;  %v1549_v51 = vmul.f32 %v4599_v45, %v4319_v41  ;;  %v1097_v36 = vmul.f32 %v4444_v0, %v4489_v50 }
 0x144   :  { %760 = vrot.lane.b32.xlu1 %v3493_v60, %s4018_s18  ;;  %1457 = vrot.lane.b32.xlu0 %v3540_v61, %s4013_s12  ;;  %v4612_v60 = vpop.permute.xlu1 %1727  ;;  %v3547_v61 = vpack.c.bf16 %v4608_v58, %v1549_v51  ;;  %v3516_v51 = vpack.c.bf16 %v1097_v36, %v4449_v2 }
 0x145   :  { %v1732_v3 = vmul.f32 %v4612_v60, %v4319_v41 }
 0x148   :  { %1882 = vrot.lane.b32.xlu1 %v3567_v7, %s4014_s13  ;;  %636 = vrot.lane.b32.xlu0 %v3484_v37, %s4030_s4  ;;  %v1158_v7 = vmul.f32 %v4418_v40, %v4489_v50  ;;  %v4621_v37 = vmul.f32 0.0, %v4612_v60 }
 0x14a   :  { %v3559_v9 = vpack.c.bf16 %v4621_v37, %v1732_v3  ;;  %v3541_v3 = vpack.c.bf16 %v4345_v57, %v1431_v54  ;;  %v3528_v57 = vpack.c.bf16 %v1280_v55, %v4477_v39  ;;  %v794_v54 = vmul.f32 %v4379_v11, %v4495_v59 }
 0x14c   :  { %1061 = vrot.lane.b32.xlu1 %v3511_v16, %s4024_s0  ;;  %1246 = vrot.lane.b32.xlu0 %v3524_v20, %s4011_s8  ;;  %v3520_v16 = vpack.c.bf16 %v1158_v7, %v4423_v43  ;;  %v2098_v20 = vmul.f32 %v4625_v8, %v4319_v41  ;;  %v611_v7 = vmul.f32 %v4353_v62, %v4495_v59 }
 0x14d   :  { %v1856_v62 = vmul.f32 %v4547_v17, %v4489_v50  ;;  %v3497_v11 = vpack.c.bf16 %v794_v54, %v4384_v12 }
 0x150   :  { %1638 = vrot.lane.b32.xlu1 %v3551_v32, %s4023_s25  ;;  %819 = vrot.lane.b32.xlu0 %v3496_v34, %s4022_s23  ;;  %v3583_v32 = vpack.c.bf16 %v4634_v23, %v2098_v20  ;;  %v3572_v34 = vpack.c.bf16 %v4436_v53, %v1917_v22  ;;  %v3485_v20 = vpack.c.bf16 %v611_v7, %v4358_v63 }
 0x151   :  { %v1221_v22 = vmul.f32 %v4366_v5, %v4495_v59 }
 0x153   :  { %v3525_v5 = vpack.c.bf16 %v1221_v22, %v4371_v6 }
 0x154   :  { %1821 = vrot.lane.b32.xlu1 %v3563_v46, %s4010_s30  ;;  %1396 = vrot.lane.b32.xlu0 %v3536_v49, %s4021_s22  ;;  %v4644_v46 = vpop.permute.xlu1 %1483  ;;  %v3501_v49 = vpack.c.bf16 %v855_v35, %v4330_v48 }
 0x158   :  { %1577 = vrot.lane.b32.xlu1 %v3547_v61, %s4019_s19  ;;  %575 = vrot.lane.b32.xlu0 %v3480_v27, %s4028_s1  ;;  %v1673_v61 = vmul.f32 %v4457_v13, %v4489_v50  ;;  %v4656_v47 = vpop.permute.xlu1 %1971  ;;  %v4658_v27 = vpop.permute.xlu0 %2032 }
 0x15a   :  { %v3556_v48 = vpack.c.bf16 %v4462_v15, %v1673_v61  ;;  %v1036_v61 = vmul.f32 %v4560_v4, %v4489_v50 }
 0x15c   :  { %1760 = vrot.lane.b32.xlu1 %v3559_v9, %s4007_s24  ;;  %1185 = vrot.lane.b32.xlu0 %v3520_v16, %s4029_s29 }
 0x160   :  { %2126 = vrot.lane.b32.xlu1 %v3583_v32, %s4016_s16  ;;  %1945 = vrot.lane.b32.xlu0 %v3572_v34, %s4008_s28 }
 0x164   :  { %882 = vrot.lane.b32.xlu1 %v3501_v49, %s4025_s26  ;;  %1124 = vrot.lane.b32.xlu0 %v3516_v51, %s4026_s11  ;;  %v3568_v51 = vpack.c.bf16 %v4556_v29, %v1856_v62 }
 0x168   :  { %1459 = vrot.lane.b32.xlu1 %v3541_v3, %s4013_s12  ;;  %1701 = vrot.lane.b32.xlu0 %v3556_v48, %s4006_s21  ;;  %s3238_s12 = sshll.u32 %s5325_s7, 4  ;;  %s3239_s12 = int_to_ptr.vmem [resolvable:$true] %s3238_s12 }
 0x169   :  { %p3996_p1 = scmp.lt.s32.totalorder %s3239_s12, %s3239_s12 }
 0x16a   :  { %v999_v9 = vpop.permute.xlu1 %998  ;;  %v938_v16 = vpop.permute.xlu0 %937 }
 0x16b   :  { %v1006_v32 = vrot.slane %v999_v9, 4  ;;  %v945_v34 = vrot.slane %v938_v16, 4 }
 0x16c   :  { %638 = vrot.lane.b32.xlu1 %v3485_v20, %s4030_s4  ;;  %1307 = vrot.lane.b32.xlu0 %v3528_v57, %s4015_s14  ;;  %v1370_v20 = vmul.f32 %v4392_v18, %v4495_v59  ;;  %v1612_v57 = vmul.f32 %v4573_v14, %v4489_v50 }
 0x16d   :  { %v1011_v35 = vsel %vm1010_vm1, %v999_v9, %v1006_v32  ;;  %v950_v36 = vsel %vm5329_vm2, %v938_v16, %v945_v34  ;;  %v3512_v16 = vpack.c.bf16 %v1036_v61, %v4569_v10 }
 0x16e   :  { %1019 = vst [vmem:[#allocation3 + $0x70] sm:$0xf] %v1011_v35  ;;  %958 = vst [vmem:[#allocation3 + $0x60] sm:$0xf] %v950_v36  ;;  %v755_v63 = vpop.permute.xlu1 %754  ;;  %v694_v49 = vpop.permute.xlu0 %693  ;;  %v3537_v18 = vpack.c.bf16 %v4397_v19, %v1370_v20  ;;  %v3552_v36 = vpack.c.bf16 %v4582_v24, %v1612_v57  ;;  %v1852_v20 = vmul.f32 %v4547_v17, %v4301_v30 }
 0x16f   :  { %v762_v3 = vrot.slane %v755_v63, 4  ;;  %v701_v48 = vrot.slane %v694_v49, 4 }
 0x170   :  { %1248 = vrot.lane.b32.xlu1 %v3525_v5, %s4011_s8  ;;  %1884 = vrot.lane.b32.xlu0 %v3568_v51, %s4014_s13 }
 0x171   :  { %v767_v7 = vsel %vm766_vm3, %v755_v63, %v762_v3  ;;  %v706_v55 = vsel %vm5328_vm4, %v694_v49, %v701_v48  ;;  %v550_v63 = vmul.f32 %v4405_v25, %v4495_v59  ;;  %v916_v49 = vmul.f32 %v4291_v21, %v4495_v59 }
 0x172   :  { %775 = vst [vmem:[#allocation3 + $0x30] sm:$0xf] %v767_v7  ;;  %714 = vst [vmem:[#allocation3 + $0x20] sm:$0xf] %v706_v55  ;;  %v940_v6 = vpop.permute.xlu1 %939  ;;  %v877_v9 = vpop.permute.xlu0 %876  ;;  %v1160_v21 = vmul.f32 %v4418_v40, %v4495_v59  ;;  %v672_v7 = vmul.f32 %v4303_v33, %v4495_v59  ;;  %v1919_v33 = vmul.f32 %v4431_v52, %v4495_v59 }
 0x173   :  { %v946_v22 = vrot.slane %v940_v6, 4  ;;  %v884_v62 = vrot.slane %v877_v9, 4  ;;  %v3481_v25 = vpack.c.bf16 %v550_v63, %v4410_v26  ;;  %v3505_v48 = vpack.c.bf16 %v916_v49, %v4297_v28 }
 0x174   :  { %821 = vrot.lane.b32.xlu1 %v3497_v11, %s4022_s23  ;;  %1063 = vrot.lane.b32.xlu0 %v3512_v16, %s4024_s0  ;;  %v3521_v40 = vpack.c.bf16 %v1160_v21, %v4423_v43  ;;  %v3489_v16 = vpack.c.bf16 %v672_v7, %v4313_v38  ;;  %v3573_v52 = vpack.c.bf16 %v4436_v53, %v1919_v33 }
 0x175   :  { %v951_v32 = vsel %vm5329_vm2, %v940_v6, %v946_v22  ;;  %v889_v34 = vsel %vm888_vm5, %v877_v9, %v884_v62  ;;  %v1858_v33 = vmul.f32 %v4547_v17, %v4495_v59 }
 0x176   :  { %959 = vst [vmem:[#allocation3 + $0x64] sm:$0xf] %v951_v32  ;;  %897 = vst [vmem:[#allocation3 + $0x50] sm:$0xf] %v889_v34  ;;  %v696_v12 = vpop.permute.xlu1 %695  ;;  %v1454_v35 = vpop.permute.xlu0 %1453  ;;  %v3566_v34 = vpack.c.bf16 %v4556_v29, %v1852_v20  ;;  %v1551_v20 = vmul.f32 %v4599_v45, %v4489_v50 }
 0x177   :  { %v702_v5 = vrot.slane %v696_v12, 4  ;;  %v1461_v51 = vrot.slane %v1454_v35, 4  ;;  %v3569_v17 = vpack.c.bf16 %v4556_v29, %v1858_v33 }
 0x178   :  { %1398 = vrot.lane.b32.xlu1 %v3537_v18, %s4021_s22  ;;  %1640 = vrot.lane.b32.xlu0 %v3552_v36, %s4023_s25 }
 0x179   :  { %v707_v54 = vsel %vm5328_vm4, %v696_v12, %v702_v5  ;;  %v1466_v61 = vsel %vm1465_vm6, %v1454_v35, %v1461_v51  ;;  %v1099_v12 = vmul.f32 %v4444_v0, %v4495_v59  ;;  %v1032_v35 = vmul.f32 %v4560_v4, %v4301_v30 }
 0x17a   :  { %715 = vst [vmem:[#allocation3 + $0x24] sm:$0xf] %v707_v54  ;;  %1474 = vst [vmem:[#allocation3 + $0xf0] sm:$0xf] %v1466_v61  ;;  %v879_v19 = vpop.permute.xlu1 %878  ;;  %v633_v3 = vpop.permute.xlu0 %632  ;;  %v1675_v54 = vmul.f32 %v4457_v13, %v4495_v59  ;;  %v1608_v61 = vmul.f32 %v4573_v14, %v4301_v30 }
 0x17b   :  { %v885_v55 = vrot.slane %v879_v19, 4  ;;  %v640_v6 = vrot.slane %v633_v3, 4  ;;  %v3517_v0 = vpack.c.bf16 %v1099_v12, %v4449_v2  ;;  %v3510_v51 = vpack.c.bf16 %v1032_v35, %v4569_v10 }
 0x17c   :  { %577 = vrot.lane.b32.xlu1 %v3481_v25, %s4028_s1  ;;  %943 = vrot.lane.b32.xlu0 %v3505_v48, %s4027_s15  ;;  %v3557_v13 = vpack.c.bf16 %v4462_v15, %v1675_v54  ;;  %v3550_v7 = vpack.c.bf16 %v4582_v24, %v1608_v61 }
 0x17d   :  { %v890_v9 = vsel %vm888_vm5, %v879_v19, %v885_v55  ;;  %v645_v11 = vsel %vm644_vm7, %v633_v3, %v640_v6  ;;  %v1282_v55 = vmul.f32 %v4471_v31, %v4495_v59  ;;  %v1795_v6 = vmul.f32 %v4586_v42, %v4489_v50 }
 0x17e   :  { %898 = vst [vmem:[#allocation3 + $0x54] sm:$0xf] %v890_v9  ;;  %653 = vst [vmem:[#allocation3 + $0x10] sm:$0xf] %v645_v11  ;;  %v1456_v28 = vpop.permute.xlu1 %1455  ;;  %v1243_v26 = vpop.permute.xlu0 %1242 }
 0x17f   :  { %v1462_v57 = vrot.slane %v1456_v28, 4  ;;  %v1250_v22 = vrot.slane %v1243_v26, 4  ;;  %v3529_v31 = vpack.c.bf16 %v1282_v55, %v4477_v39 }
 0x180   :  { %1187 = vrot.lane.b32.xlu1 %v3521_v40, %s4029_s29  ;;  %699 = vrot.lane.b32.xlu0 %v3489_v16, %s4031_s27  ;;  %v3564_v16 = vpack.c.bf16 %v4595_v44, %v1795_v6 }
 0x181   :  { %v1467_v62 = vsel %vm1465_vm6, %v1456_v28, %v1462_v57  ;;  %v1255_v32 = vsel %vm1254_vm8, %v1243_v26, %v1250_v22 }
 0x182   :  { %1475 = vst [vmem:[#allocation3 + $0xf4] sm:$0xf] %v1467_v62  ;;  %1263 = vst [vmem:[#allocation3 + $0xb0] sm:$0xf] %v1255_v32  ;;  %v635_v38 = vpop.permute.xlu1 %634  ;;  %v816_v43 = vpop.permute.xlu0 %815 }
 0x183   :  { %v641_v18 = vrot.slane %v635_v38, 4  ;;  %v823_v36 = vrot.slane %v816_v43, 4 }
 0x184   :  { %1947 = vrot.lane.b32.xlu1 %v3573_v52, %s4008_s28  ;;  %1880 = vrot.lane.b32.xlu0 %v3566_v34, %s4014_s13  ;;  %v1038_v52 = vmul.f32 %v4560_v4, %v4495_v59  ;;  %v1791_v34 = vmul.f32 %v4586_v42, %v4301_v30 }
 0x185   :  { %v646_v63 = vsel %vm644_vm7, %v635_v38, %v641_v18  ;;  %v828_v49 = vsel %vm827_vm9, %v816_v43, %v823_v36  ;;  %v3548_v43 = vpack.c.bf16 %v4608_v58, %v1551_v20 }
 0x186   :  { %654 = vst [vmem:[#allocation3 + $0x14] sm:$0xf] %v646_v63  ;;  %836 = vst [vmem:[#allocation3 + $0x40] sm:$0xf] %v828_v49  ;;  %v1245_v53 = vpop.permute.xlu1 %1244  ;;  %v1393_v5 = vpop.permute.xlu0 %1392  ;;  %v3513_v4 = vpack.c.bf16 %v1038_v52, %v4569_v10  ;;  %v3562_v49 = vpack.c.bf16 %v4595_v44, %v1791_v34 }
 0x187   :  { %v1251_v19 = vrot.slane %v1245_v53, 4  ;;  %v1400_v3 = vrot.slane %v1393_v5, 4 }
 0x188   :  { %1126 = vrot.lane.b32.xlu1 %v3517_v0, %s4026_s11  ;;  %1059 = vrot.lane.b32.xlu0 %v3510_v51, %s4024_s0  ;;  %v3883_v0 = vld [vmem:[%s5321_s3 + $0x4] ss:$28 sps:$4 sm:$0xff]  }
 0x189   :  { %v1256_v25 = vsel %vm1254_vm8, %v1245_v53, %v1251_v19  ;;  %v1405_v48 = vsel %vm1404_vm10, %v1393_v5, %v1400_v3  ;;  %v1614_v53 = vmul.f32 %v4573_v14, %v4495_v59  ;;  %v1547_v5 = vmul.f32 %v4599_v45, %v4301_v30  ;;  %2798 = vmatprep.mubr.bf16.mxu0 %v3883_v0 }
 0x18a   :  { %1264 = vst [vmem:[#allocation3 + $0xb4] sm:$0xf] %v1256_v25  ;;  %1413 = vst [vmem:[#allocation3 + $0xe0] sm:$0xf] %v1405_v48  ;;  %v818_v2 = vpop.permute.xlu1 %817  ;;  %v572_v21 = vpop.permute.xlu0 %571  ;;  %v1797_v48 = vmul.f32 %v4586_v42, %v4495_v59  ;;  %v2096_v0 = vmul.f32 %v4625_v8, %v4301_v30 }
 0x18b   :  { %v824_v9 = vrot.slane %v818_v2, 4  ;;  %v579_v11 = vrot.slane %v572_v21, 4  ;;  %v3553_v3 = vpack.c.bf16 %v4582_v24, %v1614_v53  ;;  %v3546_v25 = vpack.c.bf16 %v4608_v58, %v1547_v5 }
 0x18c   :  { %1703 = vrot.lane.b32.xlu1 %v3557_v13, %s4006_s21  ;;  %1636 = vrot.lane.b32.xlu0 %v3550_v7, %s4023_s25  ;;  %v3565_v42 = vpack.c.bf16 %v4595_v44, %v1797_v48 }
 0x18d   :  { %v829_v28 = vsel %vm827_vm9, %v818_v2, %v824_v9  ;;  %v584_v26 = vsel %vm583_vm11, %v572_v21, %v579_v11  ;;  %v1734_v2 = vmul.f32 %v4612_v60, %v4489_v50  ;;  %v1553_v11 = vmul.f32 %v4599_v45, %v4495_v59 }
 0x18e   :  { %837 = vst [vmem:[#allocation3 + $0x44] sm:$0xf] %v829_v28  ;;  %592 = vst [vmem:[#allocation3] sm:$0xf] %v584_v26  ;;  %v1395_v15 = vpop.permute.xlu1 %1394  ;;  %v1182_v40 = vpop.permute.xlu0 %1181  ;;  %v2100_v28 = vmul.f32 %v4625_v8, %v4489_v50  ;;  %v3893_v26 = vld [vmem:[%s5321_s3 + $0xc] ss:$28 sps:$4 sm:$0xff]  }
 0x18f   :  { %v1401_v57 = vrot.slane %v1395_v15, 4  ;;  %v1189_v22 = vrot.slane %v1182_v40, 4  ;;  %v3560_v9 = vpack.c.bf16 %v4621_v37, %v1734_v2  ;;  %2863 = vmatprep.mubr.bf16.mxu1 %v3893_v26  ;;  %v3549_v33 = vpack.c.bf16 %v4608_v58, %v1553_v11 }
 0x190   :  { %1309 = vrot.lane.b32.xlu1 %v3529_v31, %s4015_s14  ;;  %1823 = vrot.lane.b32.xlu0 %v3564_v16, %s4010_s30  ;;  %v3584_v20 = vpack.c.bf16 %v4634_v23, %v2100_v28  ;;  %v2036_v11 = vmul.f32 0.0, %v4658_v27 }
 0x191   :  { %v1406_v62 = vsel %vm1404_vm10, %v1395_v15, %v1401_v57  ;;  %v1194_v32 = vsel %vm1193_vm12, %v1182_v40, %v1189_v22  ;;  %v1736_v57 = vmul.f32 %v4612_v60, %v4495_v59  ;;  %v1490_v22 = vmul.f32 %v4644_v46, %v4489_v50 }
 0x192   :  { %1414 = vst [vmem:[#allocation3 + $0xe4] sm:$0xf] %v1406_v62  ;;  %1202 = vst [vmem:[#allocation3 + $0xa0] sm:$0xf] %v1194_v32  ;;  %v574_v39 = vpop.permute.xlu1 %573  ;;  %v1942_v38 = vpop.permute.xlu0 %1941 }
 0x193   :  { %v580_v12 = vrot.slane %v574_v39, 4  ;;  %v1949_v35 = vrot.slane %v1942_v38, 4  ;;  %v3561_v52 = vpack.c.bf16 %v4621_v37, %v1736_v57 }
 0x194   :  { %1886 = vrot.lane.b32.xlu1 %v3569_v17, %s4014_s13  ;;  %1579 = vrot.lane.b32.xlu0 %v3548_v43, %s4019_s19 }
 0x195   :  { %v585_v18 = vsel %vm583_vm11, %v574_v39, %v580_v12  ;;  %v1954_v36 = vsel %vm1953_vm13, %v1942_v38, %v1949_v35  ;;  %v1487_v39 = vmul.f32 0.0, %v4644_v46  ;;  %v2102_v12 = vmul.f32 %v4625_v8, %v4495_v59 }
 0x196   :  { %593 = vst [vmem:[#allocation3 + $0x4] sm:$0xf] %v585_v18  ;;  %1962 = vst [vmem:[#allocation3 + $0x170] sm:$0xf] %v1954_v36  ;;  %v1184_v29 = vpop.permute.xlu1 %1183  ;;  %v1121_v63 = vpop.permute.xlu0 %1120  ;;  %v1730_v35 = vmul.f32 %v4612_v60, %v4301_v30  ;;  %v1492_v60 = vmul.f32 %v4644_v46, %v4495_v59  ;;  %v1488_v8 = vmul.f32 %v4644_v46, %v4319_v41 }
 0x197   :  { %v1190_v51 = vrot.slane %v1184_v29, 4  ;;  %v1128_v54 = vrot.slane %v1121_v63, 4  ;;  %v3544_v34 = vpack.c.bf16 %v1487_v39, %v1490_v22  ;;  %v3585_v53 = vpack.c.bf16 %v4634_v23, %v2102_v12 }
 0x198   :  { %1065 = vrot.lane.b32.xlu1 %v3513_v4, %s4024_s0  ;;  %1819 = vrot.lane.b32.xlu0 %v3562_v49, %s4010_s30  ;;  %v3558_v5 = vpack.c.bf16 %v4621_v37, %v1730_v35 }
 0x199   :  { %v1195_v10 = vsel %vm1193_vm12, %v1184_v29, %v1190_v51  ;;  %v1133_v61 = vsel %vm1132_vm14, %v1121_v63, %v1128_v54 }
 0x19a   :  { %1203 = vst [vmem:[#allocation3 + $0xa4] sm:$0xf] %v1195_v10  ;;  %1141 = vst [vmem:[#allocation3 + $0x90] sm:$0xf] %v1133_v61  ;;  %v1944_v14 = vpop.permute.xlu1 %1943  ;;  %v1698_v19 = vpop.permute.xlu0 %1697 }
 0x19b   :  { %v1950_v21 = vrot.slane %v1944_v14, 4  ;;  %v1705_v13 = vrot.slane %v1698_v19, 4 }
 0x19c   :  { %1642 = vrot.lane.b32.xlu1 %v3553_v3, %s4023_s25  ;;  %1575 = vrot.lane.b32.xlu0 %v3546_v25, %s4019_s19  ;;  %v3582_v3 = vpack.c.bf16 %v4634_v23, %v2096_v0  ;;  %v1486_v25 = vmul.f32 %v4644_v46, %v4301_v30  ;;  %v2039_v46 = vmul.f32 %v4658_v27, %v4489_v50 }
 0x19d   :  { %v1955_v7 = vsel %vm1953_vm13, %v1944_v14, %v1950_v21  ;;  %v1710_v55 = vsel %vm1709_vm15, %v1698_v19, %v1705_v13  ;;  %v3545_v19 = vpack.c.bf16 %v1487_v39, %v1492_v60 }
 0x19e   :  { %1963 = vst [vmem:[#allocation3 + $0x174] sm:$0xf] %v1955_v7  ;;  %1718 = vst [vmem:[#allocation3 + $0x130] sm:$0xf] %v1710_v55  ;;  %v1123_v24 = vpop.permute.xlu1 %1122  ;;  %v1304_v6 = vpop.permute.xlu0 %1303  ;;  %v3543_v55 = vpack.c.bf16 %v1487_v39, %v1488_v8 }
 0x19f   :  { %v1129_v15 = vrot.slane %v1123_v24, 4  ;;  %v1311_v40 = vrot.slane %v1304_v6, 4 }
 0x1a0   :  { %1825 = vrot.lane.b32.xlu1 %v3565_v42, %s4010_s30  ;;  %1762 = vrot.lane.b32.xlu0 %v3560_v9, %s4007_s24 }
 0x1a1   :  { %v1134_v44 = vsel %vm1132_vm14, %v1123_v24, %v1129_v15  ;;  %v1316_v31 = vsel %vm1315_vm0, %v1304_v6, %v1311_v40  ;;  %v3542_v24 = vpack.c.bf16 %v1487_v39, %v1486_v25  ;;  %v2041_v6 = vmul.f32 %v4658_v27, %v4495_v59 }
 0x1a2   :  { %1142 = vst [vmem:[#allocation3 + $0x94] sm:$0xf] %v1134_v44  ;;  %1324 = vst [vmem:[#allocation3 + $0xc0] sm:$0xf] %v1316_v31  ;;  %v1700_v45 = vpop.permute.xlu1 %1699  ;;  %v1001_v16 = vpop.permute.xlu0 %1000  ;;  %v3580_v31 = vpack.c.bf16 %v2036_v11, %v2039_v46 }
 0x1a3   :  { %v1706_v62 = vrot.slane %v1700_v45, 4  ;;  %v1007_v32 = vrot.slane %v1001_v16, 4  ;;  %v3581_v44 = vpack.c.bf16 %v2036_v11, %v2041_v6 }
 0x1a4   :  { %1581 = vrot.lane.b32.xlu1 %v3549_v33, %s4019_s19  ;;  %2128 = vrot.lane.b32.xlu0 %v3584_v20, %s4016_s16 }
 0x1a5   :  { %v1711_v38 = vsel %vm1709_vm15, %v1700_v45, %v1706_v62  ;;  %v1012_v58 = vsel %vm1010_vm1, %v1001_v16, %v1007_v32  ;;  %v2037_v45 = vmul.f32 %v4658_v27, %v4319_v41  ;;  %v2035_v16 = vmul.f32 %v4658_v27, %v4301_v30 }
 0x1a6   :  { %1719 = vst [vmem:[#allocation3 + $0x134] sm:$0xf] %v1711_v38  ;;  %1020 = vst [vmem:[#allocation3 + $0x74] sm:$0xf] %v1012_v58  ;;  %v1306_v17 = vpop.permute.xlu1 %1305  ;;  %v757_v43 = vpop.permute.xlu0 %756  ;;  %v1980_v62 = vmul.f32 %v4656_v47, %v4495_v59  ;;  %v1978_v58 = vmul.f32 %v4656_v47, %v4489_v50 }
 0x1a7   :  { %v1312_v18 = vrot.slane %v1306_v17, 4  ;;  %v763_v36 = vrot.slane %v757_v43, 4  ;;  %v3579_v38 = vpack.c.bf16 %v2036_v11, %v2037_v45  ;;  %v3578_v27 = vpack.c.bf16 %v2036_v11, %v2035_v16 }
 0x1a8   :  { %1764 = vrot.lane.b32.xlu1 %v3561_v52, %s4007_s24  ;;  %1518 = vrot.lane.b32.xlu0 %v3544_v34, %s4017_s17  ;;  %v1975_v52 = vmul.f32 0.0, %v4656_v47 }
 0x1a9   :  { %v1317_v29 = vsel %vm1315_vm0, %v1306_v17, %v1312_v18  ;;  %v768_v63 = vsel %vm766_vm3, %v757_v43, %v763_v36  ;;  %v1976_v18 = vmul.f32 %v4656_v47, %v4319_v41 }
 0x1aa   :  { %1325 = vst [vmem:[#allocation3 + $0xc4] sm:$0xf] %v1317_v29  ;;  %776 = vst [vmem:[#allocation3 + $0x34] sm:$0xf] %v768_v63  ;;  %v942_v4 = vpop.permute.xlu1 %941  ;;  %v1003_v49 = vpop.permute.xlu0 %1002  ;;  %v3577_v63 = vpack.c.bf16 %v1975_v52, %v1980_v62 }
 0x1ab   :  { %v947_v51 = vrot.slane %v942_v4, 4  ;;  %v1008_v54 = vrot.slane %v1003_v49, 4 }
 0x1ac   :  { %2130 = vrot.lane.b32.xlu1 %v3585_v53, %s4016_s16  ;;  %1758 = vrot.lane.b32.xlu0 %v3558_v5, %s4007_s24  ;;  %s5337_s24 = smov 109  }
 0x1ad   :  { %v952_v10 = vsel %vm5329_vm2, %v942_v4, %v947_v51  ;;  %v1013_v61 = vsel %vm1010_vm1, %v1003_v49, %v1008_v54  ;;  %v3576_v4 = vpack.c.bf16 %v1975_v52, %v1978_v58  ;;  %v1974_v49 = vmul.f32 %v4656_v47, %v4301_v30 }
 0x1ae   :  { %960 = vst [vmem:[#allocation3 + $0x68] sm:$0xf] %v952_v10  ;;  %1021 = vst [vmem:[#allocation3 + $0x78] sm:$0xf] %v1013_v61  ;;  %v698_v14 = vpop.permute.xlu1 %697  ;;  %v759_v37 = vpop.permute.xlu0 %758  ;;  %v3575_v61 = vpack.c.bf16 %v1975_v52, %v1976_v18  ;;  %vm5333_vm2 = vcmask 924672  }
 0x1af   :  { %v703_v48 = vrot.slane %v698_v14, 4  ;;  %v764_v2 = vrot.slane %v759_v37, 4 }
 0x1b0   :  { %1520 = vrot.lane.b32.xlu1 %v3545_v19, %s4017_s17  ;;  %2124 = vrot.lane.b32.xlu0 %v3582_v3, %s4016_s16  ;;  %v3853_v19 = vld [vmem:[#allocation3 + $0x70] sm:$0xff]   ;;  %s3991_s16 = scalar_lea.vmem %s3239_s12, 16 }
 0x1b1   :  { %v708_v21 = vsel %vm5328_vm4, %v698_v14, %v703_v48  ;;  %v769_v13 = vsel %vm766_vm3, %v759_v37, %v764_v2  ;;  %vm5331_vm4 = vcmask 957440   ;;  %v3574_v14 = vpack.c.bf16 %v1975_v52, %v1974_v49  ;;  %v3854_v25 = vld [vmem:[#allocation3 + $0x30] sm:$0xff]   ;;  %p3992_p0 = scmp.ne.s32.totalorder %s3239_s12, %s3991_s16  ;;  %p3997_p2 = scmp.lt.s32.totalorder %s3991_s16, %s3991_s16 }
 0x1b2   :  { %716 = vst [vmem:[#allocation3 + $0x28] sm:$0xf] %v708_v21  ;;  %777 = vst [vmem:[#allocation3 + $0x38] sm:$0xf] %v769_v13  ;;  %v1005_v7 = vpop.permute.xlu1 %1004  ;;  %v881_v23 = vpop.permute.xlu0 %880 }
 0x1b3   :  { %v1009_v42 = vrot.slane %v1005_v7, 4  ;;  %v886_v9 = vrot.slane %v881_v23, 4  ;;  %p3998_p3 = por %p3997_p2, %p3996_p1 }
 0x1b4   :  { %1516 = vrot.lane.b32.xlu1 %v3543_v55, %s4017_s17  ;;  %1514 = vrot.lane.b32.xlu0 %v3542_v24, %s4017_s17 }
 0x1b5   :  { %v1014_v28 = vsel %vm1010_vm1, %v1005_v7, %v1009_v42  ;;  %v891_v26 = vsel %vm888_vm5, %v881_v23, %v886_v9  ;;  %vm1892_vm1 = vcmask 916480   ;;  %p3999_p4 = pnand %p3998_p3, %p3992_p0 }
 0x1b6   :  { %1022 = vst [vmem:[#allocation3 + $0x7c] sm:$0xf] %v1014_v28  ;;  %899 = vst [vmem:[#allocation3 + $0x58] sm:$0xf] %v891_v26  ;;  %v761_v15 = vpop.permute.xlu1 %760  ;;  %v1458_v40 = vpop.permute.xlu0 %1457 }
 0x1b7   :  { %v765_v33 = vrot.slane %v761_v15, 4  ;;  %v1463_v20 = vrot.slane %v1458_v40, 4 }
 0x1b8   :  { %2069 = vrot.lane.b32.xlu1 %v3581_v44, %s4012_s9  ;;  %2067 = vrot.lane.b32.xlu0 %v3580_v31, %s4012_s9 }
 0x1b9   :  { %v770_v57 = vsel %vm766_vm3, %v761_v15, %v765_v33  ;;  %v1468_v22 = vsel %vm1465_vm6, %v1458_v40, %v1463_v20  ;;  %vm5330_vm3 = vcmask 89088   ;;  %v3042_v40 = vld [vmem:[%s5323_s5] sm:$0x1] }
 0x1ba   :  { %778 = vst [vmem:[#allocation3 + $0x3c] sm:$0xf] %v770_v57  ;;  %1476 = vst [vmem:[#allocation3 + $0xf8] sm:$0xf] %v1468_v22  ;;  %v1883_v32 = vpop.permute.xlu1 %1882  ;;  %v637_v39 = vpop.permute.xlu0 %636 }
 0x1bb   :  { %v1889_v17 = vrot.slane %v1883_v32, 4  ;;  %v642_v43 = vrot.slane %v637_v39, 4 }
 0x1bc   :  { %2065 = vrot.lane.b32.xlu1 %v3579_v38, %s4012_s9  ;;  %2063 = vrot.lane.b32.xlu0 %v3578_v27, %s4012_s9 }
 0x1bd   :  { %v1894_v34 = vsel %vm1892_vm1, %v1883_v32, %v1889_v17  ;;  %v647_v12 = vsel %vm644_vm7, %v637_v39, %v642_v43  ;;  %v3851_v35 = vld [vmem:[#allocation3 + $0x78] sm:$0xff]  }
 0x1be   :  { %1902 = vst [vmem:[#allocation3 + $0x164] sm:$0xf] %v1894_v34  ;;  %655 = vst [vmem:[#allocation3 + $0x18] sm:$0xf] %v647_v12  ;;  %v1062_v36 = vpop.permute.xlu1 %1061  ;;  %v1247_v29 = vpop.permute.xlu0 %1246  ;;  %3626 = vmatprep.subr.bf16.mxu0 %v3851_v35 }
 0x1bf   :  { %v1068_v53 = vrot.slane %v1062_v36, 4  ;;  %v1252_v5 = vrot.slane %v1247_v29, 4 }
 0x1c0   :  { %2008 = vrot.lane.b32.xlu1 %v3577_v63, %s5337_s24  ;;  %2006 = vrot.lane.b32.xlu0 %v3576_v4, %s5337_s24 }
 0x1c1   :  { %v1073_v60 = vsel %vm5330_vm3, %v1062_v36, %v1068_v53  ;;  %v1257_v0 = vsel %vm1254_vm8, %v1247_v29, %v1252_v5  ;;  %v3852_v51 = vld [vmem:[#allocation3 + $0x38] sm:$0xff]   ;;  %vm5332_vm3 = vcmask 1006592  }
 0x1c2   :  { %1081 = vst [vmem:[#allocation3 + $0x84] sm:$0xf] %v1073_v60  ;;  %1265 = vst [vmem:[#allocation3 + $0xb8] sm:$0xf] %v1257_v0  ;;  %v1639_v54 = vpop.permute.xlu1 %1638  ;;  %v820_v10 = vpop.permute.xlu0 %819  ;;  %3627 = vmatpush3.bf16.msra.mxu0 %v3852_v51  ;;  %v3043_v0 = vld [vmem:[%s5324_s6] sm:$0xff] }
 0x1c3   :  { %v1645_v47 = vrot.slane %v1639_v54, 4  ;;  %v825_v37 = vrot.slane %v820_v10, 4  ;;  %3628 = vmatprep.subr.bf16.mxu0 %v3853_v19 }
 0x1c4   :  { %2004 = vrot.lane.b32.xlu1 %v3575_v61, %s5337_s24  ;;  %2002 = vrot.lane.b32.xlu0 %v3574_v14, %s5337_s24 }
 0x1c5   :  { %v1650_v3 = vsel %vm5331_vm4, %v1639_v54, %v1645_v47  ;;  %v830_v8 = vsel %vm827_vm9, %v820_v10, %v825_v37  ;;  %vm1770_vm4 = vcmask 941056   ;;  %v3045_v37 = vld [vmem:[%s5324_s6 + $0x10] sm:$0xff] }
 0x1c6   :  { %1658 = vst [vmem:[#allocation3 + $0x124] sm:$0xf] %v1650_v3  ;;  %838 = vst [vmem:[#allocation3 + $0x48] sm:$0xf] %v830_v8  ;;  %v1822_v48 = vpop.permute.xlu1 %1821  ;;  %v1397_v2 = vpop.permute.xlu0 %1396  ;;  %3629 = vmatpush3.bf16.msra.mxu0 %v3854_v25 }
 0x1c7   :  { %v1828_v21 = vrot.slane %v1822_v48, 4  ;;  %v1402_v13 = vrot.slane %v1397_v2, 4 }
 0x1c9   :  { %v1833_v7 = vsel %vm5333_vm2, %v1822_v48, %v1828_v21  ;;  %v1407_v23 = vsel %vm1404_vm10, %v1397_v2, %v1402_v13  ;;  %vm3047_vm2 = vcmp.gt.f32.partialorder %v3042_v40, 0.0 }
 0x1ca   :  { %1841 = vst [vmem:[#allocation3 + $0x154] sm:$0xf] %v1833_v7  ;;  %1415 = vst [vmem:[#allocation3 + $0xe8] sm:$0xf] %v1407_v23  ;;  %v1578_v55 = vpop.permute.xlu1 %1577  ;;  %v576_v24 = vpop.permute.xlu0 %575  ;;  %v3048_v62 = vsel %vm3047_vm2, 1, %v4005_v1  ;;  %vm5340_vm2 = vcmask 89088  }
 0x1cb   :  { %v1584_v6 = vrot.slane %v1578_v55, 4  ;;  %v581_v46 = vrot.slane %v576_v24, 4  ;;  %v3052_v58 = vrot.slane %v3048_v62, %v4239_v56  ;;  %v3044_v56 = vld [vmem:[%s5324_s6 + $0x8] sm:$0xff]  ;;  %v3858_v62 = vld [vmem:[#allocation3 + $0xb0] sm:$0xff]  }
 0x1cd   :  { %v1589_v42 = vsel %vm5332_vm3, %v1578_v55, %v1584_v6  ;;  %v586_v9 = vsel %vm583_vm11, %v576_v24, %v581_v46  ;;  %vm5334_vm3 = vcmask 875520   ;;  %v3046_v24 = vld [vmem:[%s5324_s6 + $0x18] sm:$0xff] }
 0x1ce   :  { %1597 = vst [vmem:[#allocation3 + $0x114] sm:$0xf] %v1589_v42  ;;  %594 = vst [vmem:[#allocation3 + $0x8] sm:$0xf] %v586_v9  ;;  %v1761_v11 = vpop.permute.xlu1 %1760  ;;  %v1186_v28 = vpop.permute.xlu0 %1185 }
 0x1cf   :  { %v1767_v26 = vrot.slane %v1761_v11, 4  ;;  %v1191_v15 = vrot.slane %v1186_v28, 4 }
 0x1d1   :  { %v1772_v44 = vsel %vm1770_vm4, %v1761_v11, %v1767_v26  ;;  %v1196_v31 = vsel %vm1193_vm12, %v1186_v28, %v1191_v15 }
 0x1d2   :  { %1780 = vst [vmem:[#allocation3 + $0x144] sm:$0xf] %v1772_v44  ;;  %1204 = vst [vmem:[#allocation3 + $0xa8] sm:$0xf] %v1196_v31  ;;  %v2127_v45 = vpop.permute.xlu1 %2126  ;;  %v1946_v16 = vpop.permute.xlu0 %1945 }
 0x1d3   :  { %v2133_v33 = vrot.slane %v2127_v45, 4  ;;  %v1951_v20 = vrot.slane %v1946_v16, 4 }
 0x1d5   :  { %v2138_v57 = vsel %vm5334_vm3, %v2127_v45, %v2133_v33  ;;  %v1956_v22 = vsel %vm1953_vm13, %v1946_v16, %v1951_v20  ;;  %vm4906_vm3 = vcmp.eq.s32.totalorder %v3052_v58, 1  ;;  %v3857_v45 = vld [vmem:[#allocation3 + $0xf0] sm:$0xff]  }
 0x1d6   :  { %2146 = vst [vmem:[#allocation3 + $0x1a4] sm:$0xf] %v2138_v57  ;;  %1964 = vst [vmem:[#allocation3 + $0x178] sm:$0xf] %v1956_v22  ;;  %v883_v32 = vpop.permute.xlu1 %882  ;;  %v1125_v39 = vpop.permute.xlu0 %1124  ;;  %v3135_v53 = vsel %vm4906_vm3, %v3044_v56, 1e+30 }
 0x1d7   :  { %v887_v38 = vrot.slane %v883_v32, 4  ;;  %v1130_v27 = vrot.slane %v1125_v39, 4  ;;  %v3147_v14 = vsel %vm4906_vm3, %v3044_v56, -1e+30  ;;  %v3134_v47 = vsel %vm4906_vm3, %v3043_v0, 1e+30 }
 0x1d8   :  { %v3148_v13 = vsel %vm4906_vm3, %v3045_v37, -1e+30  ;;  %v3146_v7 = vsel %vm4906_vm3, %v3043_v0, -1e+30  ;;  %v3149_v11 = vsel %vm4906_vm3, %v3046_v24, -1e+30 }
 0x1d9   :  { %v892_v17 = vsel %vm888_vm5, %v883_v32, %v887_v38  ;;  %v1135_v43 = vsel %vm1132_vm14, %v1125_v39, %v1130_v27  ;;  %v3136_v28 = vsel %vm4906_vm3, %v3045_v37, 1e+30  ;;  %vm5341_vm5 = vcmask 957440  }
 0x1da   :  { %900 = vst [vmem:[#allocation3 + $0x5c] sm:$0xf] %v892_v17  ;;  %1143 = vst [vmem:[#allocation3 + $0x98] sm:$0xf] %v1135_v43  ;;  %v1460_v52 = vpop.permute.xlu1 %1459  ;;  %v1702_v34 = vpop.permute.xlu0 %1701  ;;  %v3137_v20 = vsel %vm4906_vm3, %v3046_v24, 1e+30 }
 0x1db   :  { %v1464_v12 = vrot.slane %v1460_v52, 4  ;;  %v1707_v35 = vrot.slane %v1702_v34, 4 }
 0x1dd   :  { %v1469_v18 = vsel %vm1465_vm6, %v1460_v52, %v1464_v12  ;;  %v1712_v36 = vsel %vm1709_vm15, %v1702_v34, %v1707_v35  ;;  %vm5342_vm6 = vcmask 105472  }
 0x1de   :  { %1477 = vst [vmem:[#allocation3 + $0xfc] sm:$0xf] %v1469_v18  ;;  %1720 = vst [vmem:[#allocation3 + $0x138] sm:$0xf] %v1712_v36  ;;  %v639_v29 = vpop.permute.xlu1 %638  ;;  %v1308_v63 = vpop.permute.xlu0 %1307 }
 0x1df   :  { %v643_v4 = vrot.slane %v639_v29, 4  ;;  %v1313_v49 = vrot.slane %v1308_v63, 4 }
 0x1e1   :  { %v648_v5 = vsel %vm644_vm7, %v639_v29, %v643_v4  ;;  %v1318_v60 = vsel %vm1315_vm0, %v1308_v63, %v1313_v49  ;;  %vm5343_vm7 = vcmask 154624  }
 0x1e2   :  { %656 = vst [vmem:[#allocation3 + $0x1c] sm:$0xf] %v648_v5  ;;  %1326 = vst [vmem:[#allocation3 + $0xc8] sm:$0xf] %v1318_v60  ;;  %v1249_v51 = vpop.permute.xlu1 %1248  ;;  %v1885_v54 = vpop.permute.xlu0 %1884 }
 0x1e3   :  { %v1253_v10 = vrot.slane %v1249_v51, 4  ;;  %v1890_v61 = vrot.slane %v1885_v54, 4  ;;  %3140 = vmin.xlane.f32.xlu0 %v3135_v53 }
 0x1e5   :  { %v1258_v19 = vsel %vm1254_vm8, %v1249_v51, %v1253_v10  ;;  %v1895_v3 = vsel %vm1892_vm1, %v1885_v54, %v1890_v61  ;;  %v3855_v8 = vld [vmem:[#allocation3 + $0xf8] sm:$0xff]   ;;  %vm5344_vm8 = vmmov %vm5340_vm2 }
 0x1e6   :  { %1266 = vst [vmem:[#allocation3 + $0xbc] sm:$0xf] %v1258_v19  ;;  %1903 = vst [vmem:[#allocation3 + $0x168] sm:$0xf] %v1895_v3  ;;  %v822_v25 = vpop.permute.xlu1 %821  ;;  %v1064_v48 = vpop.permute.xlu0 %1063  ;;  %3666 = vmatprep.subr.bf16.mxu1 %v3855_v8  ;;  %v3865_v3 = vld [vmem:[#allocation3 + $0x20] sm:$0xff]  }
 0x1e7   :  { %v826_v2 = vrot.slane %v822_v25, 4  ;;  %v1069_v21 = vrot.slane %v1064_v48, 4  ;;  %3152 = vmax.xlane.f32.xlu0 %v3147_v14  ;;  %v3863_v14 = vld [vmem:[#allocation3 + $0x60] sm:$0xff]  }
 0x1e8   :  { %3138 = vmin.xlane.f32.xlu1 %v3134_v47  ;;  %v3864_v47 = vld [vmem:[#allocation3 + $0xe0] sm:$0xff]  }
 0x1e9   :  { %v831_v23 = vsel %vm827_vm9, %v822_v25, %v826_v2  ;;  %v1074_v55 = vsel %vm5340_vm2, %v1064_v48, %v1069_v21  ;;  %vm5345_vm9 = vmmov %vm5341_vm5  ;;  %v3866_v48 = vld [vmem:[#allocation3 + $0xa0] sm:$0xff]  }
 0x1ea   :  { %839 = vst [vmem:[#allocation3 + $0x4c] sm:$0xf] %v831_v23  ;;  %1082 = vst [vmem:[#allocation3 + $0x88] sm:$0xf] %v1074_v55  ;;  %v1399_v6 = vpop.permute.xlu1 %1398  ;;  %v1641_v46 = vpop.permute.xlu0 %1640  ;;  %v3869_v23 = vld [vmem:[#allocation3 + $0x18] sm:$0xff]  }
 0x1eb   :  { %v1403_v42 = vrot.slane %v1399_v6, 4  ;;  %v1646_v9 = vrot.slane %v1641_v46, 4  ;;  %3154 = vmax.xlane.f32.xlu0 %v3148_v13  ;;  %v3867_v13 = vld [vmem:[#allocation3 + $0x58] sm:$0xff]  }
 0x1ec   :  { %3150 = vmax.xlane.f32.xlu1 %v3146_v7  ;;  %v3868_v7 = vld [vmem:[#allocation3 + $0xd8] sm:$0xff]  }
 0x1ed   :  { %v1408_v26 = vsel %vm1404_vm10, %v1399_v6, %v1403_v42  ;;  %v1651_v15 = vsel %vm5341_vm5, %v1641_v46, %v1646_v9  ;;  %v3856_v40 = vld [vmem:[#allocation3 + $0xb8] sm:$0xff]   ;;  %vm5346_vm10 = vcmask 924672   ;;  %v3871_v9 = vld [vmem:[#allocation3 + $0x50] sm:$0xff]  }
 0x1ee   :  { %1416 = vst [vmem:[#allocation3 + $0xec] sm:$0xf] %v1408_v26  ;;  %1659 = vst [vmem:[#allocation3 + $0x128] sm:$0xf] %v1651_v15  ;;  %v578_v44 = vpop.permute.xlu1 %577  ;;  %v944_v31 = vpop.permute.xlu0 %943  ;;  %3667 = vmatpush3.bf16.msra.mxu1 %v3856_v40  ;;  %v3872_v26 = vld [vmem:[#allocation3 + $0xd0] sm:$0xff]  }
 0x1ef   :  { %v582_v16 = vrot.slane %v578_v44, 4  ;;  %v948_v33 = vrot.slane %v944_v31, 4  ;;  %3156 = vmax.xlane.f32.xlu0 %v3149_v11  ;;  %3668 = vmatprep.subr.bf16.mxu1 %v3857_v45 }
 0x1f0   :  { %3142 = vmin.xlane.f32.xlu1 %v3136_v28 }
 0x1f1   :  { %v587_v57 = vsel %vm583_vm11, %v578_v44, %v582_v16  ;;  %v953_v22 = vsel %vm5342_vm6, %v944_v31, %v948_v33  ;;  %vm5347_vm11 = vcmask 1006592   ;;  %v3873_v44 = vld [vmem:[#allocation3 + $0x10] sm:$0xff]   ;;  %v3875_v33 = vld [vmem:[#allocation3 + $0x48] sm:$0xff]  }
 0x1f2   :  { %595 = vst [vmem:[#allocation3 + $0xc] sm:$0xf] %v587_v57  ;;  %961 = vst [vmem:[#allocation3 + $0x6c] sm:$0xf] %v953_v22  ;;  %v1188_v32 = vpop.permute.xlu1 %1187  ;;  %v700_v39 = vpop.permute.xlu0 %699  ;;  %3669 = vmatpush3.bf16.msra.mxu1 %v3858_v62  ;;  %v3874_v16 = vld [vmem:[#allocation3 + $0x90] sm:$0xff]  }
 0x1f3   :  { %v1192_v38 = vrot.slane %v1188_v32, 4  ;;  %v704_v27 = vrot.slane %v700_v39, 4  ;;  %405 = vmin.xlane.f32.xlu0 %v4319_v41 }
 0x1f4   :  { %3144 = vmin.xlane.f32.xlu1 %v3137_v20 }
 0x1f5   :  { %v1197_v58 = vsel %vm1193_vm12, %v1188_v32, %v1192_v38  ;;  %v709_v17 = vsel %vm5343_vm7, %v700_v39, %v704_v27  ;;  %v3859_v43 = vld [vmem:[#allocation3 + $0xe8] sm:$0xff]   ;;  %vm5348_vm12 = vmmov %vm5340_vm2  ;;  %vm5354_vm2 = vcmask 875520   ;;  %vm2075_vm7 = vcmask 883712  }
 0x1f6   :  { %1205 = vst [vmem:[#allocation3 + $0xac] sm:$0xf] %v1197_v58  ;;  %717 = vst [vmem:[#allocation3 + $0x2c] sm:$0xf] %v709_v17  ;;  %v1948_v52 = vpop.permute.xlu1 %1947  ;;  %v1881_v34 = vpop.permute.xlu0 %1880  ;;  %3670 = vmatprep.subr.bf16.mxu1 %v3859_v43  ;;  %v3878_v58 = vld [vmem:[#allocation3 + $0x40] sm:$0xff]  }
 0x1f7   :  { %v1952_v12 = vrot.slane %v1948_v52, 4  ;;  %v1888_v35 = vrot.slane %v1881_v34, 4  ;;  %409 = vmin.xlane.f32.xlu0 %v4495_v59  ;;  %vm5355_vm6 = vmmov %vm5354_vm2 }
 0x1f8   :  { %403 = vmin.xlane.f32.xlu1 %v4301_v30 }
 0x1f9   :  { %v1957_v18 = vsel %vm1953_vm13, %v1948_v52, %v1952_v12  ;;  %v1893_v36 = vsel %vm1892_vm1, %v1881_v34, %v1888_v35  ;;  %v3860_v56 = vld [vmem:[#allocation3 + $0x68] sm:$0xff]   ;;  %vm5349_vm13 = vmmov %vm5346_vm10  ;;  %v3879_v12 = vld [vmem:[#allocation3] sm:$0xff]  }
 0x1fa   :  { %1965 = vst [vmem:[#allocation3 + $0x17c] sm:$0xf] %v1957_v18  ;;  %1901 = vst [vmem:[#allocation3 + $0x160] sm:$0xf] %v1893_v36  ;;  %v1127_v29 = vpop.permute.xlu1 %1126  ;;  %v1060_v63 = vpop.permute.xlu0 %1059  ;;  %3630 = vmatprep.subr.bf16.mxu0 %v3860_v56  ;;  %v3876_v22 = vld [vmem:[#allocation3 + $0x8] sm:$0xff]  }
 0x1fb   :  { %v1131_v4 = vrot.slane %v1127_v29, 4  ;;  %v1067_v49 = vrot.slane %v1060_v63, 4  ;;  %413 = vmax.xlane.f32.xlu0 %v4319_v41  ;;  %v3881_v56 = vld [vmem:[%s5321_s3] ss:$28 sps:$4 sm:$0xff]  }
 0x1fc   :  { %407 = vmin.xlane.f32.xlu1 %v4489_v50 }
 0x1fd   :  { %v1136_v53 = vsel %vm1132_vm14, %v1127_v29, %v1131_v4  ;;  %v1072_v5 = vsel %vm5344_vm8, %v1060_v63, %v1067_v49  ;;  %v3861_v60 = vld [vmem:[#allocation3 + $0x28] sm:$0xff]   ;;  %vm5350_vm14 = vmmov %vm5341_vm5  ;;  %v3894_v49 = vld [vmem:[%s5321_s3 + $0x3c] ss:$28 sps:$4 sm:$0xff]   ;;  %vm1526_vm5 = vcmask 1014784   ;;  %vm2014_vm8 = vcmask 891904  }
 0x1fe   :  { %1144 = vst [vmem:[#allocation3 + $0x9c] sm:$0xf] %v1136_v53  ;;  %1080 = vst [vmem:[#allocation3 + $0x80] sm:$0xf] %v1072_v5  ;;  %v1704_v0 = vpop.permute.xlu1 %1703  ;;  %v1637_v51 = vpop.permute.xlu0 %1636  ;;  %v3862_v54 = vld [vmem:[#allocation3 + $0xa8] sm:$0xff]   ;;  %3631 = vmatpush3.bf16.msra.mxu0 %v3861_v60 }
 0x1ff   :  { %v1708_v10 = vrot.slane %v1704_v0, 4  ;;  %v1644_v61 = vrot.slane %v1637_v51, 4  ;;  %417 = vmax.xlane.f32.xlu0 %v4495_v59  ;;  %3671 = vmatpush3.bf16.msra.mxu1 %v3862_v54  ;;  %v3886_v54 = vld [vmem:[#allocation3 + $0xc0] sm:$0xff]  }
 0x200   :  { %411 = vmax.xlane.f32.xlu1 %v4301_v30  ;;  %3632 = vmatprep.subr.bf16.mxu0 %v3863_v14 }
 0x201   :  { %v1713_v37 = vsel %vm1709_vm15, %v1704_v0, %v1708_v10  ;;  %v1649_v19 = vsel %vm5345_vm9, %v1637_v51, %v1644_v61  ;;  %3672 = vmatprep.subr.bf16.mxu1 %v3864_v47  ;;  %vm5351_vm15 = vmmov %vm5347_vm11  ;;  %v3880_v36 = vld [vmem:[#allocation3 + $0x178] sm:$0xff]   ;;  %v3887_v10 = vld [vmem:[#allocation3 + $0x170] sm:$0xff]   ;;  %vm2753_vm9 = vcmask 785408  }
 0x202   :  { %1721 = vst [vmem:[#allocation3 + $0x13c] sm:$0xf] %v1713_v37  ;;  %1657 = vst [vmem:[#allocation3 + $0x120] sm:$0xf] %v1649_v19  ;;  %v1310_v8 = vpop.permute.xlu1 %1309  ;;  %v1824_v25 = vpop.permute.xlu0 %1823  ;;  %3633 = vmatpush3.bf16.msra.mxu0 %v3865_v3  ;;  %v3889_v47 = vld [vmem:[#allocation3 + $0x130] sm:$0xff]  }
 0x203   :  { %v1314_v2 = vrot.slane %v1310_v8, 4  ;;  %v1829_v21 = vrot.slane %v1824_v25, 4  ;;  %3673 = vmatpush3.bf16.msra.mxu1 %v3866_v48  ;;  %3634 = vmatprep.subr.bf16.mxu0 %v3867_v13 }
 0x204   :  { %415 = vmax.xlane.f32.xlu1 %v4489_v50  ;;  %3674 = vmatprep.subr.bf16.mxu1 %v3868_v7 }
 0x205   :  { %v1319_v55 = vsel %vm1315_vm0, %v1310_v8, %v1314_v2  ;;  %v1834_v24 = vsel %vm5346_vm10, %v1824_v25, %v1829_v21  ;;  %v3870_v6 = vld [vmem:[#allocation3 + $0x98] sm:$0xff]   ;;  %vm5352_vm0 = vmmov %vm5346_vm10  ;;  %v3888_v3 = vld [vmem:[#allocation3 + $0x80] sm:$0xff]  }
 0x206   :  { %1327 = vst [vmem:[#allocation3 + $0xcc] sm:$0xf] %v1319_v55  ;;  %1842 = vst [vmem:[#allocation3 + $0x158] sm:$0xf] %v1834_v24  ;;  %v1887_v46 = vpop.permute.xlu1 %1886  ;;  %v1580_v42 = vpop.permute.xlu0 %1579  ;;  %3635 = vmatpush3.bf16.msra.mxu0 %v3869_v23  ;;  %v3891_v2 = vld [vmem:[%s5321_s3 + $0x8] ss:$28 sps:$4 sm:$0xff]  }
 0x207   :  { %v1891_v11 = vrot.slane %v1887_v46, 4  ;;  %v1585_v28 = vrot.slane %v1580_v42, 4  ;;  %3675 = vmatpush3.bf16.msra.mxu1 %v3870_v6  ;;  %3636 = vmatprep.subr.bf16.mxu0 %v3871_v9  ;;  %v3896_v21 = vld [vmem:[%s5321_s3 + $0x38] ss:$28 sps:$4 sm:$0xff]   ;;  %v3903_v55 = vld [vmem:[%s5321_s3 + $0x44] ss:$28 sps:$4 sm:$0xff]  }
 0x208   :  { %3676 = vmatprep.subr.bf16.mxu1 %v3872_v26  ;;  %v3901_v23 = vld [vmem:[%s5321_s3 + $0x74] ss:$28 sps:$4 sm:$0xff]  }
 0x209   :  { %v1896_v15 = vsel %vm1892_vm1, %v1887_v46, %v1891_v11  ;;  %v1590_v40 = vsel %vm5347_vm11, %v1580_v42, %v1585_v28  ;;  %v3885_v4 = vld [vmem:[#allocation3 + $0x138] sm:$0xff]   ;;  %vm5353_vm1 = vmmov %vm5347_vm11  ;;  %v3898_v11 = vld [vmem:[#allocation3 + $0x160] sm:$0xff]  }
 0x20a   :  { %1904 = vst [vmem:[#allocation3 + $0x16c] sm:$0xf] %v1896_v15  ;;  %1598 = vst [vmem:[#allocation3 + $0x118] sm:$0xf] %v1590_v40  ;;  %v1066_v31 = vpop.permute.xlu1 %1065  ;;  %v1820_v45 = vpop.permute.xlu0 %1819  ;;  %3637 = vmatpush3.bf16.msra.mxu0 %v3873_v44  ;;  %v3899_v44 = vld [vmem:[#allocation3 + $0x120] sm:$0xff]  }
 0x20b   :  { %v1070_v20 = vrot.slane %v1066_v31, 4  ;;  %v1827_v57 = vrot.slane %v1820_v45, 4  ;;  %3677 = vmatpush3.bf16.msra.mxu1 %v3874_v16  ;;  %3638 = vmatprep.subr.bf16.mxu0 %v3875_v33  ;;  %v3905_v33 = vld [vmem:[%s5321_s3 + $0x70] ss:$28 sps:$4 sm:$0xff]  }
 0x20d   :  { %v1075_v62 = vsel %vm5348_vm12, %v1066_v31, %v1070_v20  ;;  %v1832_v32 = vsel %vm5349_vm13, %v1820_v45, %v1827_v57  ;;  %v3877_v39 = vld [vmem:[#allocation3 + $0xc8] sm:$0xff]   ;;  %v3906_v20 = vld [vmem:[%s5321_s3 + $0x40] ss:$28 sps:$4 sm:$0xff]  }
 0x20e   :  { %1083 = vst [vmem:[#allocation3 + $0x8c] sm:$0xf] %v1075_v62  ;;  %1840 = vst [vmem:[#allocation3 + $0x150] sm:$0xf] %v1832_v32  ;;  %v1643_v38 = vpop.permute.xlu1 %1642  ;;  %v1576_v27 = vpop.permute.xlu0 %1575  ;;  %3639 = vmatpush3.bf16.msra.mxu0 %v3876_v22  ;;  %3678 = vmatprep.subr.bf16.mxu1 %v3877_v39  ;;  %v3912_v62 = vld [vmem:[%s5321_s3 + $0xac] ss:$28 sps:$4 sm:$0xff]  }
 0x20f   :  { %v1647_v17 = vrot.slane %v1643_v38, 4  ;;  %v1583_v43 = vrot.slane %v1576_v27, 4  ;;  %3640 = vmatprep.subr.bf16.mxu0 %v3878_v58  ;;  %v3914_v32 = vld [vmem:[%s5321_s3 + $0x7c] ss:$28 sps:$4 sm:$0xff]  }
 0x211   :  { %v1652_v52 = vsel %vm5350_vm14, %v1643_v38, %v1647_v17  ;;  %v1588_v34 = vsel %vm5351_vm15, %v1576_v27, %v1583_v43  ;;  %v3890_v48 = vld [vmem:[#allocation3 + $0x168] sm:$0xff]  }
 0x212   :  { %1660 = vst [vmem:[#allocation3 + $0x12c] sm:$0xf] %v1652_v52  ;;  %1596 = vst [vmem:[#allocation3 + $0x110] sm:$0xf] %v1588_v34  ;;  %v1826_v35 = vpop.permute.xlu1 %1825  ;;  %v1763_v18 = vpop.permute.xlu0 %1762  ;;  %3641 = vmatpush3.bf16.msra.mxu0 %v3879_v12 }
 0x213   :  { %v1830_v29 = vrot.slane %v1826_v35, 4  ;;  %v1768_v63 = vrot.slane %v1763_v18, 4  ;;  %3706 = vmatprep.subr.bf16.mxu0 %v3880_v36 }
 0x215   :  { %v1835_v53 = vsel %vm5352_vm0, %v1826_v35, %v1830_v29  ;;  %v1773_v5 = vsel %vm1770_vm4, %v1763_v18, %v1768_v63  ;;  %v3884_v60 = vld [vmem:[#allocation3 + $0x88] sm:$0xff]   ;;  %2799 = vmatmul.mubr.bf16.vlgmr.msra.gmra.mxu0 %v3881_v56  ;;  %v3908_v43 = vld [vmem:[#allocation3 + $0x150] sm:$0xff]  }
 0x216   :  { %1843 = vst [vmem:[#allocation3 + $0x15c] sm:$0xf] %v1835_v53  ;;  %1781 = vst [vmem:[#allocation3 + $0x148] sm:$0xf] %v1773_v5  ;;  %v1582_v0 = vpop.permute.xlu1 %1581  ;;  %v2129_v51 = vpop.permute.xlu0 %2128  ;;  %3679 = vmatpush3.bf16.msra.mxu1 %v3884_v60  ;;  %3707 = vmatpush3.bf16.msra.mxu0 %v3885_v4  ;;  %v3916_v4 = vld [vmem:[%s5321_s3 + $0xa8] ss:$28 sps:$4 sm:$0xff]  }
 0x217   :  { %v1586_v61 = vrot.slane %v1582_v0, 4  ;;  %v2134_v14 = vrot.slane %v2129_v51, 4  ;;  %3680 = vmatprep.subr.bf16.mxu1 %v3886_v54  ;;  %3708 = vmatprep.subr.bf16.mxu0 %v3887_v10  ;;  %v3922_v60 = vld [vmem:[%s5321_s3 + $0xb4] ss:$28 sps:$4 sm:$0xff]  }
 0x218   :  { %2806 = vmatprep.mubr.bf16.mxu0 %v3894_v49  ;;  %v3917_v49 = vld [vmem:[%s5321_s3 + $0x78] ss:$28 sps:$4 sm:$0xff]  }
 0x219   :  { %v1591_v37 = vsel %vm5353_vm1, %v1582_v0, %v1586_v61  ;;  %v2139_v19 = vsel %vm5354_vm2, %v2129_v51, %v2134_v14  ;;  %v3897_v46 = vld [vmem:[#allocation3 + $0x128] sm:$0xff]   ;;  %v3909_v12 = vld [vmem:[#allocation3 + $0x110] sm:$0xff]  }
 0x21a   :  { %1599 = vst [vmem:[#allocation3 + $0x11c] sm:$0xf] %v1591_v37  ;;  %2147 = vst [vmem:[#allocation3 + $0x1a8] sm:$0xf] %v2139_v19  ;;  %v1765_v8 = vpop.permute.xlu1 %1764  ;;  %v1519_v25 = vpop.permute.xlu0 %1518  ;;  %3681 = vmatpush3.bf16.msra.mxu1 %v3888_v3  ;;  %3709 = vmatpush3.bf16.msra.mxu0 %v3889_v47  ;;  %v3926_v0 = vld [vmem:[%s5321_s3 + $0x14] ss:$28 sps:$4 sm:$0xff]  }
 0x21b   :  { %v1769_v13 = vrot.slane %v1765_v8, 4  ;;  %v1524_v7 = vrot.slane %v1519_v25, 4  ;;  %3710 = vmatprep.subr.bf16.mxu0 %v3890_v48 }
 0x21d   :  { %v1774_v24 = vsel %vm1770_vm4, %v1765_v8, %v1769_v13  ;;  %v1529_v6 = vsel %vm1526_vm5, %v1519_v25, %v1524_v7  ;;  %2807 = vmatmul.mubr.bf16.gmra.mxu0 %v3896_v21  ;;  %2864 = vmatmul.mubr.bf16.vlgmr.msra.gmra.mxu1 %v3891_v2  ;;  %v3900_v16 = vld [vmem:[#allocation3 + $0x158] sm:$0xff]   ;;  %v3924_v13 = vld [vmem:[%s5321_s3 + $0x10] ss:$28 sps:$4 sm:$0xff]  }
 0x21e   :  { %1782 = vst [vmem:[#allocation3 + $0x14c] sm:$0xf] %v1774_v24  ;;  %1537 = vst [vmem:[#allocation3 + $0x108] sm:$0xf] %v1529_v6  ;;  %v2131_v42 = vpop.permute.xlu1 %2130  ;;  %v1759_v9 = vpop.permute.xlu0 %1758  ;;  %3711 = vmatpush3.bf16.msra.mxu0 %v3897_v46  ;;  %2814 = vmatprep.mubr.bf16.mxu0 %v3901_v23  ;;  %v3927_v7 = vld [vmem:[%s5321_s3 + $0xb0] ss:$28 sps:$4 sm:$0xff]  }
 0x21f   :  { %v2135_v28 = vrot.slane %v2131_v42, 4  ;;  %v1766_v26 = vrot.slane %v1759_v9, 4  ;;  %3712 = vmatprep.subr.bf16.mxu0 %v3898_v11  ;;  %2871 = vmatprep.mubr.bf16.mxu1 %v3903_v55  ;;  %v3930_v24 = vld [vmem:[%s5321_s3 + $0x4c] ss:$28 sps:$4 sm:$0xff]   ;;  %v3938_v6 = vld [vmem:[%s5321_s3 + $0x18] ss:$28 sps:$4 sm:$0xff]  }
 0x221   :  { %v2140_v15 = vsel %vm5355_vm6, %v2131_v42, %v2135_v28  ;;  %v1771_v40 = vsel %vm1770_vm4, %v1759_v9, %v1766_v26  ;;  %vm5356_vm4 = vmmov %vm5354_vm2  ;;  %v3907_v27 = vld [vmem:[#allocation3 + $0x118] sm:$0xff]  }
 0x222   :  { %2148 = vst [vmem:[#allocation3 + $0x1ac] sm:$0xf] %v2140_v15  ;;  %1779 = vst [vmem:[#allocation3 + $0x140] sm:$0xf] %v1771_v40  ;;  %v1521_v31 = vpop.permute.xlu1 %1520  ;;  %v2125_v45 = vpop.permute.xlu0 %2124  ;;  %3713 = vmatpush3.bf16.msra.mxu0 %v3899_v44 }
 0x223   :  { %v1525_v57 = vrot.slane %v1521_v31, 4  ;;  %v2132_v22 = vrot.slane %v2125_v45, 4  ;;  %3714 = vmatprep.subr.bf16.mxu0 %v3900_v16  ;;  %v3935_v16 = vld [vmem:[%s5321_s3 + $0x84] ss:$28 sps:$4 sm:$0xff]  }
 0x225   :  { %v1530_v39 = vsel %vm1526_vm5, %v1521_v31, %v1525_v57  ;;  %v2137_v38 = vsel %vm5356_vm4, %v2125_v45, %v2132_v22  ;;  %2815 = vmatmul.mubr.bf16.gmra.mxu0 %v3905_v33  ;;  %2872 = vmatmul.mubr.bf16.gmra.mxu1 %v3906_v20  ;;  %v3911_v63 = vld [vmem:[#allocation3 + $0x148] sm:$0xff]   ;;  %v3937_v57 = vld [vmem:[%s5321_s3 + $0x80] ss:$28 sps:$4 sm:$0xff]  }
 0x226   :  { %1538 = vst [vmem:[#allocation3 + $0x10c] sm:$0xf] %v1530_v39  ;;  %2145 = vst [vmem:[#allocation3 + $0x1a0] sm:$0xf] %v2137_v38  ;;  %v1517_v58 = vpop.permute.xlu1 %1516  ;;  %v1515_v17 = vpop.permute.xlu0 %1514  ;;  %3715 = vmatpush3.bf16.msra.mxu0 %v3907_v27  ;;  %2822 = vmatprep.mubr.bf16.mxu0 %v3912_v62  ;;  %v3932_v45 = vld [vmem:[%s5321_s3 + $0x48] ss:$28 sps:$4 sm:$0xff]  }
 0x227   :  { %v1523_v52 = vrot.slane %v1517_v58, 4  ;;  %v1522_v34 = vrot.slane %v1515_v17, 4  ;;  %3716 = vmatprep.subr.bf16.mxu0 %v3908_v43  ;;  %2879 = vmatprep.mubr.bf16.mxu1 %v3914_v32  ;;  %v3939_v22 = vld [vmem:[%s5321_s3 + $0x50] ss:$28 sps:$4 sm:$0xff]   ;;  %v3940_v62 = vld [vmem:[%s5321_s3 + $0xbc] ss:$28 sps:$4 sm:$0xff]  }
 0x228   :  { %v3943_v32 = vld [vmem:[%s5321_s3 + $0x88] ss:$28 sps:$4 sm:$0xff]   ;;  %v3942_v39 = vld [vmem:[%s5321_s3 + $0xb8] ss:$28 sps:$4 sm:$0xff]   ;;  %v3944_v38 = vld [vmem:[%s5321_s3 + $0xc0] ss:$28 sps:$4 sm:$0xff]  }
 0x229   :  { %v1528_v35 = vsel %vm1526_vm5, %v1517_v58, %v1523_v52  ;;  %v1527_v18 = vsel %vm1526_vm5, %v1515_v17, %v1522_v34  ;;  %v3910_v36 = vld [vmem:[#allocation3 + $0x1a8] sm:$0xff]   ;;  %v3920_v37 = vld [vmem:[#allocation3 + $0x140] sm:$0xff]   ;;  %v5091_v17 = vld [vmem:[%s5320_s2 + $0x10] sm:$0xff] }
 0x22a   :  { %1536 = vst [vmem:[#allocation3 + $0x104] sm:$0xf] %v1528_v35  ;;  %1535 = vst [vmem:[#allocation3 + $0x100] sm:$0xf] %v1527_v18  ;;  %v2070_v56 = vpop.permute.xlu1 %2069  ;;  %v2068_v29 = vpop.permute.xlu0 %2067  ;;  %3717 = vmatpush3.bf16.msra.mxu0 %v3909_v12  ;;  %3756 = vmatprep.subr.bf16.mxu1 %v3910_v36  ;;  %v5079_v27 = vld [vmem:[%s5320_s2] sm:$0xff]  ;;  %v5084_v58 = vld [vmem:[%s5320_s2 + $0x8] sm:$0xff] }
 0x22b   :  { %v2074_v53 = vrot.slane %v2070_v56, 4  ;;  %v2073_v5 = vrot.slane %v2068_v29, 4  ;;  %3718 = vmatprep.subr.bf16.mxu0 %v3911_v63  ;;  %3757 = vmatpush3.bf16.msra.mxu1 %v3910_v36  ;;  %v5096_v43 = vld [vmem:[%s5320_s2 + $0x18] sm:$0xff] }
 0x22c   :  { %439 = vmin.xlane.f32.xlu1 %v5079_v27  ;;  %441 = vmin.xlane.f32.xlu0 %v5084_v58 }
 0x22d   :  { %v2079_v51 = vsel %vm2075_vm7, %v2070_v56, %v2074_v53  ;;  %v2078_v54 = vsel %vm2075_vm7, %v2068_v29, %v2073_v5  ;;  %v3918_v10 = vld [vmem:[#allocation3 + $0x108] sm:$0xff]   ;;  %2823 = vmatmul.mubr.bf16.gmra.mxu0 %v3916_v4  ;;  %2880 = vmatmul.mubr.bf16.gmra.mxu1 %v3917_v49  ;;  %v3919_v47 = vld [vmem:[#allocation3 + $0x1a0] sm:$0xff]  }
 0x22e   :  { %2087 = vst [vmem:[#allocation3 + $0x19c] sm:$0xf] %v2079_v51  ;;  %2086 = vst [vmem:[#allocation3 + $0x198] sm:$0xf] %v2078_v54  ;;  %v2066_v61 = vpop.permute.xlu1 %2065  ;;  %v2064_v14 = vpop.permute.xlu0 %2063  ;;  %3719 = vmatpush3.bf16.msra.mxu0 %v3918_v10  ;;  %2887 = vmatprep.mubr.bf16.mxu1 %v3922_v60 }
 0x22f   :  { %v2072_v19 = vrot.slane %v2066_v61, 4  ;;  %v2071_v3 = vrot.slane %v2064_v14, 4  ;;  %3758 = vmatprep.subr.bf16.mxu1 %v3919_v47  ;;  %3720 = vmatprep.subr.bf16.mxu0 %v3920_v37 }
 0x230   :  { %3759 = vmatpush3.bf16.msra.mxu1 %v3919_v47  ;;  %2928 = vmatprep.mubr.bf16.mxu0 %v3926_v0 }
 0x231   :  { %v2077_v8 = vsel %vm2075_vm7, %v2066_v61, %v2072_v19  ;;  %v2076_v25 = vsel %vm2075_vm7, %v2064_v14, %v2071_v3  ;;  %v3921_v48 = vld [vmem:[#allocation3 + $0x100] sm:$0xff]   ;;  %443 = vmin.xlane.f32.xlu1 %v5091_v17  ;;  %445 = vmin.xlane.f32.xlu0 %v5096_v43 }
 0x232   :  { %2085 = vst [vmem:[#allocation3 + $0x194] sm:$0xf] %v2077_v8  ;;  %2084 = vst [vmem:[#allocation3 + $0x190] sm:$0xf] %v2076_v25  ;;  %v2009_v2 = vpop.permute.xlu1 %2008  ;;  %v2007_v21 = vpop.permute.xlu0 %2006  ;;  %3721 = vmatpush3.bf16.msra.mxu0 %v3921_v48 }
 0x233   :  { %v2013_v23 = vrot.slane %v2009_v2, 4  ;;  %v2012_v55 = vrot.slane %v2007_v21, 4 }
 0x235   :  { %v2018_v46 = vsel %vm2014_vm8, %v2009_v2, %v2013_v23  ;;  %v2017_v42 = vsel %vm2014_vm8, %v2007_v21, %v2012_v55  ;;  %v3928_v9 = vld [vmem:[#allocation3 + $0x198] sm:$0xff]   ;;  %2888 = vmatmul.mubr.bf16.gmra.mxu1 %v3927_v7  ;;  %2929 = vmatmul.mubr.bf16.vlgmr.msra.gmra.mxu0 %v3924_v13 }
 0x236   :  { %2026 = vst [vmem:[#allocation3 + $0x18c] sm:$0xf] %v2018_v46  ;;  %2025 = vst [vmem:[#allocation3 + $0x188] sm:$0xf] %v2017_v42  ;;  %v2005_v11 = vpop.permute.xlu1 %2004  ;;  %v2003_v28 = vpop.permute.xlu0 %2002  ;;  %3760 = vmatprep.subr.bf16.mxu1 %v3928_v9  ;;  %2936 = vmatprep.mubr.bf16.mxu0 %v3930_v24 }
 0x237   :  { %v2011_v26 = vrot.slane %v2005_v11, 4  ;;  %v2010_v15 = vrot.slane %v2003_v28, 4  ;;  %3761 = vmatpush3.bf16.msra.mxu1 %v3928_v9  ;;  %3768 = vmatprep.mubr.msk.bf16.mxu1 %vm2753_vm9, %v3938_v6 }
 0x239   :  { %v2016_v40 = vsel %vm2014_vm8, %v2005_v11, %v2011_v26  ;;  %v2015_v44 = vsel %vm2014_vm8, %v2003_v28, %v2010_v15  ;;  %v3929_v31 = vld [vmem:[#allocation3 + $0x190] sm:$0xff]  }
 0x23a   :  { %2024 = vst [vmem:[#allocation3 + $0x184] sm:$0xf] %v2016_v40  ;;  %2023 = vst [vmem:[#allocation3 + $0x180] sm:$0xf] %v2015_v44  ;;  %3762 = vmatprep.subr.bf16.mxu1 %v3929_v31 }
 0x23b   :  { %3763 = vmatpush3.bf16.msra.mxu1 %v3929_v31 }
 0x23d   :  { %v3933_v33 = vld [vmem:[#allocation3 + $0x188] sm:$0xff]   ;;  %2937 = vmatmul.mubr.bf16.gmra.mxu0 %v3932_v45 }
 0x23e   :  { %3764 = vmatprep.subr.bf16.mxu1 %v3933_v33  ;;  %2944 = vmatprep.mubr.bf16.mxu0 %v3935_v16 }
 0x23f   :  { %3765 = vmatpush3.bf16.msra.mxu1 %v3933_v33 }
 0x241   :  { %v3934_v20 = vld [vmem:[#allocation3 + $0x180] sm:$0xff]  }
 0x242   :  { %3766 = vmatprep.subr.bf16.mxu1 %v3934_v20 }
 0x243   :  { %3767 = vmatpush3.bf16.msra.mxu1 %v3934_v20 }
 0x245   :  { %2945 = vmatmul.mubr.bf16.gmra.mxu0 %v3937_v57 }
 0x246   :  { %3769 = vmatmul.mubr.msk.bf16.vlgmr.msra.gmra.mxu1 %vm2753_vm9, %v3939_v22  ;;  %2952 = vmatprep.mubr.bf16.mxu0 %v3940_v62 }
 0x247   :  { %3772 = vmatprep.mubr.msk.bf16.mxu1 %vm2753_vm9, %v3943_v32 }
 0x24d   :  { %2953 = vmatmul.mubr.bf16.gmra.mxu0 %v3942_v39 }
 0x24e   :  { %3773 = vmatmul.mubr.msk.bf16.gmra.mxu1 %vm2753_vm9, %v3944_v38 }
 0x2d5   :  { %v3642_v52 = vpop.f32.mrf.mxu0 }
 0x2d7   :  { %v3643_v34 = vpop.f32.mrf.mxu0 }
 0x2d8   :  { %v3644_v26 = vadd.f32 %v3643_v34, %v3642_v52 }
 0x2d9   :  { %v3645_v12 = vpop.f32.mrf.mxu0 }
 0x2db   :  { %v3646_v35 = vpop.f32.mrf.mxu0 }
 0x2dc   :  { %v3647_v62 = vadd.f32 %v3646_v35, %v3645_v12 }
 0x2dd   :  { %v3648_v18 = vpop.f32.mrf.mxu0  ;;  %v3682_v36 = vpop.f32.mrf.mxu1 }
 0x2df   :  { %v3649_v56 = vpop.f32.mrf.mxu0  ;;  %v3683_v29 = vpop.f32.mrf.mxu1 }
 0x2e0   :  { %v3684_v9 = vadd.f32 %v3683_v29, %v3682_v36  ;;  %v3650_v44 = vadd.f32 %v3649_v56, %v3648_v18 }
 0x2e1   :  { %v3651_v63 = vpop.f32.mrf.mxu0  ;;  %v3685_v4 = vpop.f32.mrf.mxu1 }
 0x2e2   :  { %v2866_v16 = vadd.f32 %v3684_v9, %v3644_v26 }
 0x2e3   :  { %v3652_v49 = vpop.f32.mrf.mxu0  ;;  %v3686_v53 = vpop.f32.mrf.mxu1 }
 0x2e4   :  { %v3687_v33 = vadd.f32 %v3686_v53, %v3685_v4 }
 0x2e5   :  { %v3654_v5 = vpop.f32.mrf.mxu0  ;;  %v3688_v60 = vpop.f32.mrf.mxu1 }
 0x2e6   :  { %v2869_v29 = vadd.f32 %v3687_v33, %v3647_v62 }
 0x2e7   :  { %v3655_v0 = vpop.f32.mrf.mxu0  ;;  %v3689_v51 = vpop.f32.mrf.mxu1 }
 0x2e8   :  { %v3690_v28 = vadd.f32 %v3689_v51, %v3688_v60 }
 0x2e9   :  { %v3657_v54 = vpop.f32.mrf.mxu0  ;;  %v3691_v10 = vpop.f32.mrf.mxu1 }
 0x2ea   :  { %v2874_v57 = vadd.f32 %v3690_v28, %v3650_v44 }
 0x2eb   :  { %v3658_v61 = vpop.f32.mrf.mxu0  ;;  %v3692_v14 = vpop.f32.mrf.mxu1 }
 0x2ec   :  { %v3693_v51 = vadd.f32 %v3692_v14, %v3691_v10 }
 0x2ed   :  { %v5100_v47 = vpop.f32.mrf.mxu0  ;;  %v3694_v37 = vpop.f32.mrf.mxu1 }
 0x2ef   :  { %v5102_v19 = vpop.f32.mrf.mxu0  ;;  %v3695_v3 = vpop.f32.mrf.mxu1 }
 0x2f0   :  { %v3696_v60 = vadd.f32 %v3695_v3, %v3694_v37  ;;  %v3659_v37 = vadd.f32 %v3658_v61, %v3657_v54  ;;  %v3662_v44 = vadd.f32 %v5102_v19, %v5100_v47 }
 0x2f1   :  { %v5104_v8 = vpop.f32.mrf.mxu0  ;;  %v3697_v25 = vpop.f32.mrf.mxu1 }
 0x2f3   :  { %v5106_v48 = vpop.f32.mrf.mxu0  ;;  %v3698_v2 = vpop.f32.mrf.mxu1 }
 0x2f4   :  { %v3699_v9 = vadd.f32 %v3698_v2, %v3697_v25 }
 0x2f5   :  { %v3722_v21 = vpop.f32.mrf.mxu0  ;;  %v3700_v7 = vpop.f32.mrf.mxu1 }
 0x2f7   :  { %v3723_v13 = vpop.f32.mrf.mxu0  ;;  %v3701_v24 = vpop.f32.mrf.mxu1 }
 0x2f8   :  { %v3724_v15 = vadd.f32 %v3723_v13, %v3722_v21  ;;  %v3656_v21 = vadd.f32 %v3655_v0, %v3654_v5  ;;  %v3702_v54 = vadd.f32 %v3701_v24, %v3700_v7 }
 0x2f9   :  { %v3725_v23 = vpop.f32.mrf.mxu0  ;;  %v5108_v42 = vpop.f32.mrf.mxu1 }
 0x2fa   :  { %v2931_v38 = vadd.f32 %v3724_v15, %v2866_v16  ;;  %v2890_v47 = vadd.f32 %v3702_v54, %v3662_v44 }
 0x2fb   :  { %v3726_v55 = vpop.f32.mrf.mxu0  ;;  %v5110_v31 = vpop.f32.mrf.mxu1 }
 0x2fc   :  { %v3727_v32 = vadd.f32 %v3726_v55, %v3725_v23  ;;  %v2882_v23 = vadd.f32 %v3696_v60, %v3656_v21 }
 0x2fd   :  { %v3728_v6 = vpop.f32.mrf.mxu0 }
 0x2fe   :  { %v2934_v53 = vadd.f32 %v3727_v32, %v2869_v29 }
 0x2ff   :  { %v3729_v46 = vpop.f32.mrf.mxu0 }
 0x300   :  { %v3730_v45 = vadd.f32 %v3729_v46, %v3728_v6  ;;  %v3653_v46 = vadd.f32 %v3652_v49, %v3651_v63  ;;  %v2885_v49 = vadd.f32 %v3699_v9, %v3659_v37 }
 0x301   :  { %v3731_v11 = vpop.f32.mrf.mxu0 }
 0x302   :  { %v2939_v59 = vadd.f32 %v3730_v45, %v2874_v57  ;;  %v2877_v3 = vadd.f32 %v3693_v51, %v3653_v46  ;;  %v3705_v51 = vadd.f32 %v5110_v31, %v5108_v42 }
 0x303   :  { %v3732_v40 = vpop.f32.mrf.mxu0 }
 0x304   :  { %v3733_v12 = vadd.f32 %v3732_v40, %v3731_v11 }
 0x305   :  { %v3734_v20 = vpop.f32.mrf.mxu0 }
 0x306   :  { %v3770_v22 = vpop.f32.mrf.mxu1  ;;  %v2942_v25 = vadd.f32 %v3733_v12, %v2877_v3 }
 0x307   :  { %v3735_v39 = vpop.f32.mrf.mxu0  ;;  %v3004_v18 = vadd.f32 %v3770_v22, %v2939_v59 }
 0x308   :  { %v2995_v36 = vpop.f32.mrf.mxu1  ;;  %v3736_v13 = vadd.f32 %v3735_v39, %v3734_v20 }
 0x309   :  { %v2996_v52 = vadd.f32 %v2995_v36, %v2931_v38  ;;  %v3737_v34 = vpop.f32.mrf.mxu0  ;;  %v3028_v15 = vmul.f32 0.2, %v3004_v18 }
 0x30a   :  { %v3771_v56 = vpop.f32.mrf.mxu1  ;;  %v2947_v5 = vadd.f32 %v3736_v13, %v2882_v23 }
 0x30b   :  { %v3026_v6 = vmul.f32 0.2, %v2996_v52  ;;  %v3738_v4 = vpop.f32.mrf.mxu0  ;;  %v5124_v45 = vmax.f32 %v3004_v18, %v3028_v15  ;;  %v3007_v16 = vadd.f32 %v3771_v56, %v2942_v25  ;;  %v3665_v18 = vadd.f32 %v5106_v48, %v5104_v8 }
 0x30c   :  { %v2998_v35 = vpop.f32.mrf.mxu1  ;;  %v3739_v10 = vadd.f32 %v3738_v4, %v3737_v34 }
 0x30d   :  { %v5112_v55 = vmax.f32 %v2996_v52, %v3026_v6  ;;  %v2999_v28 = vadd.f32 %v2998_v35, %v2934_v53  ;;  %v3740_v26 = vpop.f32.mrf.mxu0  ;;  %v3029_v38 = vmul.f32 0.2, %v3007_v16  ;;  %v3056_v60 = vsel %vm4906_vm3, %v5124_v45, 1e+30 }
 0x30e   :  { %v3774_v59 = vpop.f32.mrf.mxu1  ;;  %v2950_v20 = vadd.f32 %v3739_v10, %v2885_v49  ;;  %v3080_v56 = vsel %vm4906_vm3, %v5124_v45, -1e+30  ;;  %v2893_v53 = vadd.f32 %v3705_v51, %v3665_v18 }
 0x30f   :  { %v3027_v14 = vmul.f32 0.2, %v2999_v28  ;;  %v3078_v0 = vsel %vm4906_vm3, %v5112_v55, -1e+30  ;;  %v3054_v63 = vsel %vm4906_vm3, %v5112_v55, 1e+30  ;;  %v3741_v2 = vpop.f32.mrf.mxu0  ;;  %v5147_v21 = vmax.f32 %v3007_v16, %v3029_v38 }
 0x310   :  { %v3011_v11 = vpop.f32.mrf.mxu1  ;;  %3086 = vmax.xlane.f32.xlu1 %v3078_v0  ;;  %3062 = vmin.xlane.f32.xlu0 %v3054_v63  ;;  %v3742_v57 = vadd.f32 %v3741_v2, %v3740_v26 }
 0x311   :  { %v5120_v61 = vmax.f32 %v2999_v28, %v3027_v14  ;;  %v3012_v40 = vadd.f32 %v3011_v11, %v2947_v5  ;;  %v3743_v24 = vpop.f32.mrf.mxu0  ;;  %v3057_v8 = vsel %vm4906_vm3, %v5147_v21, 1e+30  ;;  %v3081_v31 = vsel %vm4906_vm3, %v5147_v21, -1e+30  ;;  %v3139_v14 = vpop.xlane.xlu1 %3138 }
 0x312   :  { %v3775_v33 = vpop.f32.mrf.mxu1  ;;  %v2955_v36 = vadd.f32 %v3742_v57, %v2890_v47 }
 0x313   :  { %v3030_v22 = vmul.f32 0.2, %v3012_v40  ;;  %v3055_v62 = vsel %vm4906_vm3, %v5120_v61, 1e+30  ;;  %v3079_v7 = vsel %vm4906_vm3, %v5120_v61, -1e+30  ;;  %v3744_v34 = vpop.f32.mrf.mxu0 }
 0x314   :  { %v3014_v32 = vpop.f32.mrf.mxu1  ;;  %3064 = vmin.xlane.f32.xlu1 %v3055_v62  ;;  %3088 = vmax.xlane.f32.xlu0 %v3079_v7  ;;  %v3020_v13 = vadd.f32 %v3774_v59, %v2955_v36  ;;  %v3745_v6 = vadd.f32 %v3744_v34, %v3743_v24  ;;  %v3141_v59 = vpop.xlane.xlu0 %3140 }
 0x315   :  { %v5132_v19 = vmax.f32 %v3012_v40, %v3030_v22  ;;  %v3015_v39 = vadd.f32 %v3014_v32, %v2950_v20  ;;  %v3151_v0 = vpop.xlane.xlu1 %3150 }
 0x316   :  { %v3032_v46 = vmul.f32 0.2, %v3020_v13  ;;  %v2958_v9 = vadd.f32 %v3745_v6, %v2893_v53  ;;  %v3162_v24 = vsub.f32 %v3151_v0, %v3139_v14 }
 0x317   :  { %v3031_v29 = vmul.f32 0.2, %v3015_v39  ;;  %v3058_v52 = vsel %vm4906_vm3, %v5132_v19, 1e+30  ;;  %v3082_v28 = vsel %vm4906_vm3, %v5132_v19, -1e+30 }
 0x318   :  { %3066 = vmin.xlane.f32.xlu1 %v3056_v60  ;;  %3070 = vmin.xlane.f32.xlu0 %v3058_v52  ;;  %v3023_v42 = vadd.f32 %v3775_v33, %v2958_v9  ;;  %v5164_v35 = vmax.f32 %v3020_v13, %v3032_v46  ;;  %v3153_v5 = vpop.xlane.xlu0 %3152  ;;  %3945 = vrcp.f32 %v3162_v24  ;;  %v3985_v13 = vld [vmem:[%s5324_s6] sm:$0xff] }
 0x319   :  { %v5149_v4 = vmax.f32 %v3015_v39, %v3031_v29  ;;  %v5186_v49 = vpop.xlane.xlu1 %3142  ;;  %v3163_v32 = vsub.f32 %v3153_v5, %v3141_v59  ;;  %v3158_v6 = vsub.f32 %v3985_v13, %v3139_v14 }
 0x31a   :  { %v3033_v23 = vmul.f32 0.2, %v3023_v42  ;;  %v3060_v26 = vsel %vm4906_vm3, %v5164_v35, 1e+30  ;;  %v3084_v37 = vsel %vm4906_vm3, %v5164_v35, -1e+30 }
 0x31b   :  { %v3059_v48 = vsel %vm4906_vm3, %v5149_v4, 1e+30  ;;  %v3083_v12 = vsel %vm4906_vm3, %v5149_v4, -1e+30 }
 0x31c   :  { %3090 = vmax.xlane.f32.xlu1 %v3080_v56  ;;  %449 = vmax.xlane.f32.xlu0 %v5084_v58  ;;  %v5175_v3 = vmax.f32 %v3023_v42, %v3033_v23  ;;  %v3155_v63 = vpop.xlane.xlu0 %3154 }
 0x31d   :  { %v5188_v2 = vpop.xlane.xlu1 %3144  ;;  %v3164_v52 = vsub.f32 %v3155_v63, %v5186_v49 }
 0x31e   :  { %v3061_v15 = vsel %vm4906_vm3, %v5175_v3, 1e+30  ;;  %v3085_v10 = vsel %vm4906_vm3, %v5175_v3, -1e+30 }
 0x320   :  { %3068 = vmin.xlane.f32.xlu1 %v3057_v8  ;;  %3072 = vmin.xlane.f32.xlu0 %v3059_v48  ;;  %v3157_v25 = vpop.xlane.xlu0 %3156  ;;  %v3986_v48 = vld [vmem:[%s5324_s6 + $0x8] sm:$0xff] }
 0x321   :  { %v5192_v54 = vpop.xlane.xlu1 %403  ;;  %v3159_v42 = vsub.f32 %v3986_v48, %v3141_v59 }
 0x324   :  { %3092 = vmax.xlane.f32.xlu1 %v3081_v31  ;;  %3096 = vmax.xlane.f32.xlu0 %v3083_v12  ;;  %v5190_v11 = vpop.xlane.xlu0 %405  ;;  %v3165_v31 = vsub.f32 %v3157_v25, %v5188_v2 }
 0x325   :  { %v5196_v1 = vpop.xlane.xlu1 %407  ;;  %v3946_v46 = vpop.eup %3945 }
 0x328   :  { %3094 = vmax.xlane.f32.xlu1 %v3082_v28  ;;  %3074 = vmin.xlane.f32.xlu0 %v3060_v26  ;;  %v5194_v40 = vpop.xlane.xlu0 %409  ;;  %v5229_v26 = vmul.f32 %v3946_v46, %v3158_v6 }
 0x329   :  { %v5200_v16 = vpop.xlane.xlu1 %411 }
 0x32c   :  { %447 = vmax.xlane.f32.xlu1 %v5079_v27  ;;  %3098 = vmax.xlane.f32.xlu0 %v3084_v37  ;;  %v5198_v44 = vpop.xlane.xlu0 %413 }
 0x32d   :  { %v5204_v20 = vpop.xlane.xlu1 %415 }
 0x330   :  { %451 = vmax.xlane.f32.xlu1 %v5091_v17  ;;  %3076 = vmin.xlane.f32.xlu0 %v3061_v15  ;;  %v5202_v33 = vpop.xlane.xlu0 %417 }
 0x331   :  { %v5206_v57 = vpop.xlane.xlu1 %439 }
 0x334   :  { %3100 = vmax.xlane.f32.xlu0 %v3085_v10  ;;  %v5208_v22 = vpop.xlane.xlu0 %441 }
 0x335   :  { %v5210_v62 = vpop.xlane.xlu1 %443 }
 0x338   :  { %453 = vmax.xlane.f32.xlu0 %v5096_v43  ;;  %v5212_v7 = vpop.xlane.xlu0 %445 }
 0x399   :  { %v3087_v47 = vpop.xlane.xlu1 %3086  ;;  %v3063_v39 = vpop.xlane.xlu0 %3062 }
 0x39a   :  { %v3110_v38 = vsub.f32 %v3087_v47, %v3063_v39  ;;  %v3102_v9 = vsub.f32 %v5112_v55, %v3063_v39  ;;  %v5234_v55 = vld [vmem:[%s5323_s5] ss:$0 sm:$0xff]  ;;  %v424_v47 = vsub.f32 %v5198_v44, %v5190_v11 }
 0x39c   :  { %3947 = vrcp.f32 %v3110_v38  ;;  %v3988_v38 = vld [vmem:[%s5324_s6 + $0x10] sm:$0xff] }
 0x39d   :  { %3949 = vrcp.f32 %v3163_v32  ;;  %v3065_v36 = vpop.xlane.xlu1 %3064  ;;  %v3089_v29 = vpop.xlane.xlu0 %3088 }
 0x39e   :  { %v3111_v60 = vsub.f32 %v3089_v29, %v3065_v36  ;;  %v3103_v10 = vsub.f32 %v5120_v61, %v3065_v36  ;;  %v3160_v36 = vsub.f32 %v3988_v38, %v5186_v49  ;;  %v423_v29 = vsub.f32 %v5200_v16, %v5192_v54 }
 0x3a0   :  { %3951 = vrcp.f32 %v3111_v60 }
 0x3a1   :  { %v3067_v34 = vpop.xlane.xlu1 %3066  ;;  %v5215_v51 = vpop.xlane.xlu0 %3070  ;;  %3953 = vrcp.f32 %v3164_v52 }
 0x3a2   :  { %v3104_v6 = vsub.f32 %v5124_v45, %v3067_v34  ;;  %v3989_v45 = vld [vmem:[%s5324_s6 + $0x18] sm:$0xff] }
 0x3a5   :  { %v3091_v18 = vpop.xlane.xlu1 %3090  ;;  %v450_v56 = vpop.xlane.xlu0 %449 }
 0x3a6   :  { %v3112_v53 = vsub.f32 %v3091_v18, %v3067_v34  ;;  %v460_v63 = vsub.f32 %v450_v56, %v5208_v22  ;;  %v3161_v34 = vsub.f32 %v3989_v45, %v5188_v2  ;;  %v426_v2 = vsub.f32 %v5202_v33, %v5194_v40 }
 0x3a7   :  { %v3106_v33 = vsub.f32 %v5132_v19, %v5215_v51  ;;  %v419_v19 = vsub.f32 %v4301_v30, %v5192_v54 }
 0x3a8   :  { %3955 = vrcp.f32 %v3112_v53 }
 0x3a9   :  { %v3948_v8 = vpop.eup %3947  ;;  %v5225_v12 = vpop.xlane.xlu1 %3068  ;;  %3957 = vrcp.f32 %v3165_v31 }
 0x3aa   :  { %v5227_v23 = vpop.xlane.xlu0 %3072  ;;  %v3950_v28 = vpop.eup %3949  ;;  %v3126_v37 = vmul.f32 %v3948_v8, %v3102_v9 }
 0x3ab   :  { %v5238_v0 = vmul.f32 %v3950_v28, %v3159_v42 }
 0x3ac   :  { %v3174_v15 = vsub.f32 %v3126_v37, %v5229_v26 }
 0x3ad   :  { %v3952_v59 = vpop.eup %3951  ;;  %v3093_v14 = vpop.xlane.xlu1 %3092 }
 0x3ae   :  { %v3097_v5 = vpop.xlane.xlu0 %3096  ;;  %v3113_v25 = vsub.f32 %v3093_v14, %v5225_v12  ;;  %v3127_v32 = vmul.f32 %v3952_v59, %v3103_v10  ;;  %v3184_v39 = vmul.f32 %v5234_v55, %v3174_v15  ;;  %v3954_v18 = vpop.eup %3953 }
 0x3af   :  { %v3115_v24 = vsub.f32 %v3097_v5, %v5227_v23  ;;  %v5258_v46 = vmul.f32 %v3954_v18, %v3160_v36  ;;  %v425_v5 = vsub.f32 %v5204_v20, %v5196_v1  ;;  %v420_v18 = vsub.f32 %v4319_v41, %v5190_v11 }
 0x3b0   :  { %3959 = vrcp.f32 %v3113_v25  ;;  %v3175_v61 = vsub.f32 %v3127_v32, %v5238_v0  ;;  %v3196_v13 = vmul.f32 %v3184_v39, %v3184_v39 }
 0x3b1   :  { %3961 = vrcp.f32 %v3115_v24  ;;  %v3095_v60 = vpop.xlane.xlu1 %3094 }
 0x3b2   :  { %v5253_v52 = vpop.xlane.xlu0 %3074  ;;  %3963 = vrcp.f32 %v460_v63  ;;  %v3114_v44 = vsub.f32 %v3095_v60, %v5215_v51  ;;  %v3185_v56 = vmul.f32 %v5234_v55, %v3175_v61  ;;  %v3105_v63 = vsub.f32 %v5147_v21, %v5225_v12 }
 0x3b3   :  { %3965 = vrcp.f32 %v424_v47  ;;  %v3107_v47 = vsub.f32 %v5149_v4, %v5227_v23  ;;  %v456_v60 = vsub.f32 %v5084_v58, %v5208_v22  ;;  %v455_v51 = vsub.f32 %v5079_v27, %v5206_v57 }
 0x3b4   :  { %3967 = vrcp.f32 %v3114_v44  ;;  %v3197_v53 = vmul.f32 %v3185_v56, %v3185_v56 }
 0x3b5   :  { %v3956_v49 = vpop.eup %3955  ;;  %3969 = vrcp.f32 %v423_v29  ;;  %v448_v16 = vpop.xlane.xlu1 %447 }
 0x3b6   :  { %v3099_v9 = vpop.xlane.xlu0 %3098  ;;  %v459_v8 = vsub.f32 %v448_v16, %v5206_v57  ;;  %v3128_v42 = vmul.f32 %v3956_v49, %v3104_v6  ;;  %v3200_v31 = vadd.f32 %v3197_v53, %v3196_v13  ;;  %v3958_v10 = vpop.eup %3957 }
 0x3b7   :  { %v3116_v48 = vsub.f32 %v3099_v9, %v5253_v52  ;;  %v5275_v32 = vmul.f32 %v3958_v10, %v3161_v34  ;;  %v3108_v9 = vsub.f32 %v5164_v35, %v5253_v52  ;;  %v457_v52 = vsub.f32 %v5091_v17, %v5210_v62 }
 0x3b8   :  { %3971 = vrcp.f32 %v459_v8  ;;  %v3176_v28 = vsub.f32 %v3128_v42, %v5258_v46  ;;  %v458_v17 = vsub.f32 %v5096_v43, %v5212_v7 }
 0x3b9   :  { %3973 = vrcp.f32 %v3116_v48  ;;  %v452_v37 = vpop.xlane.xlu1 %451 }
 0x3ba   :  { %v5267_v15 = vpop.xlane.xlu0 %3076  ;;  %v461_v59 = vsub.f32 %v452_v37, %v5210_v62  ;;  %v3186_v14 = vmul.f32 %v5234_v55, %v3176_v28 }
 0x3bc   :  { %v3198_v25 = vmul.f32 %v3186_v14, %v3186_v14  ;;  %3975 = vrcp.f32 %v461_v59 }
 0x3bd   :  { %v3960_v24 = vpop.eup %3959  ;;  %3977 = vrcp.f32 %v425_v5  ;;  %v3109_v5 = vsub.f32 %v5175_v3, %v5267_v15 }
 0x3be   :  { %v3101_v39 = vpop.xlane.xlu0 %3100  ;;  %v3962_v61 = vpop.eup %3961  ;;  %v3129_v36 = vmul.f32 %v3960_v24, %v3105_v63  ;;  %v3201_v20 = vadd.f32 %v3200_v31, %v3198_v25 }
 0x3bf   :  { %v3117_v38 = vsub.f32 %v3101_v39, %v5267_v15  ;;  %v3964_v29 = vpop.eup %3963  ;;  %v3131_v21 = vmul.f32 %v3962_v61, %v3107_v47 }
 0x3c0   :  { %v3966_v12 = vpop.eup %3965  ;;  %v3177_v4 = vsub.f32 %v3129_v36, %v5275_v32  ;;  %v468_v53 = vmul.f32 %v3964_v29, %v456_v60 }
 0x3c1   :  { %3979 = vrcp.f32 %v3117_v38  ;;  %v3968_v23 = vpop.eup %3967  ;;  %v3189_v56 = vsub.f32 %v3131_v21, %v5238_v0  ;;  %v432_v49 = vmul.f32 %v3966_v12, %v420_v18  ;;  %v5357_v38 = vld [vmem:[#allocation7_spill] sm:$0xff] }
 0x3c2   :  { %3981 = vrcp.f32 %v426_v2  ;;  %v454_v44 = vpop.xlane.xlu0 %453  ;;  %v3970_v13 = vpop.eup %3969  ;;  %v3187_v58 = vmul.f32 %v5234_v55, %v3177_v4  ;;  %v3130_v22 = vmul.f32 %v3968_v23, %v3106_v33  ;;  %v422_v36 = vsub.f32 %v5357_v38, %v5194_v40 }
 0x3c3   :  { %v462_v6 = vsub.f32 %v454_v44, %v5212_v7  ;;  %v3193_v0 = vmul.f32 %v5234_v55, %v3189_v56  ;;  %v431_v8 = vmul.f32 %v3970_v13, %v419_v19  ;;  %v472_v31 = vsub.f32 %v432_v49, %v468_v53 }
 0x3c4   :  { %v3199_v41 = vmul.f32 %v3187_v58, %v3187_v58  ;;  %v3188_v11 = vsub.f32 %v3130_v22, %v5229_v26 }
 0x3c5   :  { %3983 = vrcp.f32 %v462_v6  ;;  %v3972_v16 = vpop.eup %3971  ;;  %v3215_v45 = vmul.f32 %v3193_v0, %v3193_v0  ;;  %v476_v37 = vmul.f32 %v472_v31, %v472_v31 }
 0x3c6   :  { %v3974_v48 = vpop.eup %3973  ;;  %v467_v42 = vmul.f32 %v3972_v16, %v455_v51  ;;  %v3202_v28 = vadd.f32 %v3201_v20, %v3199_v41  ;;  %v3192_v30 = vmul.f32 %v5234_v55, %v3188_v11 }
 0x3c7   :  { %v3132_v54 = vmul.f32 %v3974_v48, %v3108_v9 }
 0x3c8   :  { %v471_v27 = vsub.f32 %v431_v8, %v467_v42  ;;  %v3214_v57 = vmul.f32 %v3192_v30, %v3192_v30 }
 0x3c9   :  { %v3190_v34 = vsub.f32 %v3132_v54, %v5258_v46  ;;  %v3976_v59 = vpop.eup %3975  ;;  %v421_v46 = vsub.f32 %v4489_v50, %v5196_v1 }
 0x3ca   :  { %v475_v26 = vmul.f32 %v471_v27, %v471_v27  ;;  %v3218_v10 = vadd.f32 %v3215_v45, %v3214_v57  ;;  %v3978_v35 = vpop.eup %3977  ;;  %v469_v47 = vmul.f32 %v3976_v59, %v457_v52 }
 0x3cb   :  { %v3194_v14 = vmul.f32 %v5234_v55, %v3190_v34  ;;  %v433_v62 = vmul.f32 %v3978_v35, %v421_v46 }
 0x3cc   :  { %v479_v63 = vadd.f32 %v476_v37, %v475_v26 }
 0x3cd   :  { %v3216_v24 = vmul.f32 %v3194_v14, %v3194_v14  ;;  %v473_v21 = vsub.f32 %v433_v62, %v469_v47 }
 0x3ce   :  { %v3980_v25 = vpop.eup %3979  ;;  %480 = vadd.xlane.f32.xlu1 %v479_v63 }
 0x3cf   :  { %v3982_v2 = vpop.eup %3981  ;;  %v3133_v39 = vmul.f32 %v3980_v25, %v3109_v5  ;;  %v3219_v61 = vadd.f32 %v3218_v10, %v3216_v24  ;;  %v477_v60 = vmul.f32 %v473_v21, %v473_v21 }
 0x3d0   :  { %v434_v20 = vmul.f32 %v3982_v2, %v422_v36 }
 0x3d1   :  { %v3191_v3 = vsub.f32 %v3133_v39, %v5275_v32 }
 0x3d2   :  { %v3984_v15 = vpop.eup %3983  ;;  %3203 = vadd.xlane.f32.xlu1 %v3202_v28 }
 0x3d3   :  { %v470_v29 = vmul.f32 %v3984_v15, %v458_v17  ;;  %v3195_v50 = vmul.f32 %v5234_v55, %v3191_v3 }
 0x3d5   :  { %v474_v1 = vsub.f32 %v434_v20, %v470_v29  ;;  %v3217_v12 = vmul.f32 %v3195_v50, %v3195_v50 }
 0x3d7   :  { %v478_v33 = vmul.f32 %v474_v1, %v474_v1  ;;  %v3220_v4 = vadd.f32 %v3219_v61, %v3217_v12 }
 0x3d9   :  { %v491_v23 = vadd.f32 %v478_v33, %v477_v60 }
 0x3db   :  { %492 = vadd.xlane.f32.xlu0 %v491_v23 }
 0x3df   :  { %3221 = vadd.xlane.f32.xlu0 %v3220_v4 }
 0x457   :  { %v481_v40 = vpop.xlane.xlu1 %480 }
 0x458   :  { %v482_v43 = vrot.slane %v481_v40, 4 }
 0x45a   :  { %v483_v7 = vadd.f32 %v482_v43, %v481_v40 }
 0x45b   :  { %v3204_v18 = vpop.xlane.xlu1 %3203 }
 0x45c   :  { %v484_v32 = vrot.slane %v483_v7, 2  ;;  %v3205_v44 = vrot.slane %v3204_v18, 4 }
 0x45e   :  { %v485_v56 = vadd.f32 %v484_v32, %v483_v7  ;;  %v3206_v13 = vadd.f32 %v3205_v44, %v3204_v18 }
 0x460   :  { %v486_v6 = vrot.slane %v485_v56, 1  ;;  %v3207_v58 = vrot.slane %v3206_v13, 2 }
 0x462   :  { %v487_v53 = vadd.f32 %v486_v6, %v485_v56  ;;  %v3208_v51 = vadd.f32 %v3207_v58, %v3206_v13 }
 0x464   :  { %v493_v55 = vpop.xlane.xlu0 %492  ;;  %3776 = vpush %v487_v53  ;;  %v3209_v9 = vrot.slane %v3208_v51, 1 }
 0x465   :  { %v494_v22 = vrot.slane %v493_v55, 4 }
 0x466   :  { %v3210_v28 = vadd.f32 %v3209_v9, %v3208_v51 }
 0x467   :  { %v495_v19 = vadd.f32 %v494_v22, %v493_v55 }
 0x468   :  { %v3222_v49 = vpop.xlane.xlu0 %3221 }
 0x469   :  { %v496_v41 = vrot.slane %v495_v19, 2  ;;  %v3223_v11 = vrot.slane %v3222_v49, 4 }
 0x46b   :  { %v3224_v0 = vadd.f32 %v3223_v11, %v3222_v49  ;;  %v497_v16 = vadd.f32 %v496_v41, %v495_v19 }
 0x46d   :  { %v3225_v8 = vrot.slane %v3224_v0, 2  ;;  %v498_v48 = vrot.slane %v497_v16, 1 }
 0x46f   :  { %v3226_v42 = vadd.f32 %v3225_v8, %v3224_v0  ;;  %v499_v31 = vadd.f32 %v498_v48, %v497_v16 }
 0x471   :  { %3778 = vpush %v499_v31  ;;  %v3227_v30 = vrot.slane %v3226_v42, 1 }
 0x472   :  { %3780 = vpush %v3210_v28 }
 0x473   :  { %v3228_v54 = vadd.f32 %v3227_v30, %v3226_v42 }
 0x475   :  { %3782 = vpush %v3228_v54 }
 0x495   :  { %s3777_s6 = spop %3776 }
 0x496   :  { %490 = sst [smem:[#allocation4]] %s3777_s6 }
 0x4a2   :  { %s3779_s24 = spop %3778 }
 0x4a3   :  { %502 = sst [smem:[#allocation4 + $0x1]] %s3779_s24  ;;  %s3781_s13 = spop %3780 }
 0x4a4   :  { %3213 = sst [smem:[#allocation4 + $0x2]] %s3781_s13 }
 0x4a6   :  { %s3783_s14 = spop %3782 }
 0x4a7   :  { %3231 = sst [smem:[#allocation4 + $0x3]] %s3783_s14 }
 0x4a8   :  { %4002 = shalt.err (!%p3999_p4)
}
 0x4a9   :  { %s4032_s17 = smov [#allocation4]  }
 0x4aa   :  { %3241 = dma.smem_to_vmem %s4032_s17, 16, %s3239_s12, [#allocation5]  }
 0x4ab   :  { %4003 = dma.done.wait [#allocation5], 16  }
 0x4ac   :  { %4004 = vsyncadd [#allocation5], 4294967280 }
 0x4ad   :  { %3245 = sfence }
 0x4ae   :  { %3246 = vsyncpa [#allocation5], 1 }

</bundles_post_ra>
